<compile_context>
chip_gen: v7x
topology: tpu7x:2x2x1
jax: 0.10.0
libtpu: 0.0.40
codegen_flags: <defaults>
</compile_context>

<pallas_src>
import jax
import jax.numpy as jnp
from jax import lax
from jax.experimental import pallas as pl
from jax.experimental.pallas import tpu as pltpu


def _round_up(x, m):
    return (x + m - 1) // m * m


def _mlp_kernel(x_ref, w0_ref, b0_ref, w1_ref, b1_ref, w2_ref, b2_ref, o_ref):
    # layer 0: Linear(state_dim_p, 1024) + ReLU   (MXU, f32 accumulation)
    h = jnp.dot(x_ref[...], w0_ref[...], preferred_element_type=jnp.float32)
    h = jnp.maximum(h + b0_ref[...], 0.0)

    # layer 1: Linear(1024, 256) + ReLU           (MXU, f32 accumulation)
    h = jnp.dot(h.astype(w1_ref.dtype), w1_ref[...],
                preferred_element_type=jnp.float32)
    h = jnp.maximum(h + b1_ref[...], 0.0)

    # layer 2: Linear(256, 1) + sigmoid, computed as w2_row . h^T so the result
    # is a lane-dense [1, bt] row instead of a masked [bt, 1] column.
    z = lax.dot_general(
        w2_ref[...], h,                       # [1, H1p] x [bt, H1p] (contract last dims)
        dimension_numbers=(((1,), (1,)), ((), ())),
        preferred_element_type=jnp.float32,
    )                                          # -> [1, bt]
    z = z + b2_ref[...]                        # [1, 1] broadcast over lanes
    o_ref[...] = jax.nn.sigmoid(z).reshape(o_ref.shape).astype(o_ref.dtype)


def prior_discriminator(x, params, *, batch_tile=256, compute_dtype=jnp.float32):
    """x: [B, state_dim] float32. Returns [B, 1] float32 in (0, 1).

    batch_tile: rows per grid step. Keep it a multiple of 128 (v5e) / 256
    (v6e/v7x). Up to ~1024 fits comfortably in the default scoped-VMEM limit on
    all generations; raise vmem_limit_bytes if you push further.
    compute_dtype: operand dtype for the two large matmuls (jnp.bfloat16 uses
    the fast MXU path on v6e/v7x); accumulation is always f32.
    """
    w0, b0, w1, b1, w2, b2 = params
    B, d_in = x.shape
    h0 = w0.shape[1]
    h1 = w1.shape[1]

    # Padded (lane-aligned) sizes.
    d_in_p = _round_up(d_in, 128)
    h0_p = _round_up(h0, 128)
    h1_p = _round_up(h1, 128)

    bt = batch_tile
    b_pad = _round_up(max(B, 1), bt)
    n_tiles = b_pad // bt

    mm_dtype = jnp.dtype(compute_dtype)

    # Zero-pad once in the wrapper (exactness preserved: padded rows/cols are 0).
    xp = jnp.pad(x, ((0, b_pad - B), (0, d_in_p - d_in))).astype(mm_dtype)
    w0p = jnp.pad(w0, ((0, d_in_p - d_in), (0, h0_p - h0))).astype(mm_dtype)
    b0p = jnp.pad(b0, ((0, 0), (0, h0_p - h0))).astype(jnp.float32)
    w1p = jnp.pad(w1, ((0, h0_p - h0), (0, h1_p - h1))).astype(mm_dtype)
    b1p = jnp.pad(b1, ((0, 0), (0, h1_p - h1))).astype(jnp.float32)
    w2p = jnp.pad(w2.reshape(1, h1), ((0, 0), (0, h1_p - h1))).astype(jnp.float32)
    b2p = b2.reshape(1, 1).astype(jnp.float32)

    const = lambda shape: pl.BlockSpec(shape, lambda i: tuple(0 for _ in shape))

    out = pl.pallas_call(
        _mlp_kernel,
        out_shape=jax.ShapeDtypeStruct((n_tiles, 1, bt), jnp.float32),
        grid_spec=pltpu.PrefetchScalarGridSpec(
            num_scalar_prefetch=0,
            grid=(n_tiles,),
            in_specs=[
                pl.BlockSpec((bt, d_in_p), lambda i: (i, 0)),   # x tile
                const((d_in_p, h0_p)), const((1, h0_p)),        # w0, b0
                const((h0_p, h1_p)), const((1, h1_p)),          # w1, b1
                const((1, h1_p)), const((1, 1)),                # w2 row, b2
            ],
            out_specs=pl.BlockSpec((1, 1, bt), lambda i: (i, 0, 0)),
        ),
        compiler_params=pltpu.CompilerParams(
            dimension_semantics=("parallel",),   # shards tiles across TCs (v7x)
        ),
    )(xp, w0p, b0p, w1p, b1p, w2p, b2p)

    # (tiles, 1, bt) -> [B, 1]
    return out.reshape(-1)[:B].reshape(B, 1)


def init_params(key, state_dim=50):
    """Deterministic synthetic parameters matching the nn.Linear shapes.

    Stored as [in, out] (transposed vs. PyTorch's [out, in]); biases kept 2-D
    [1, out] for clean TPU layout / broadcasting inside the kernel.
    """
    dims = [(state_dim, 1000), (1000, 200), (200, 1)]
    params = []
    for fan_in, fan_out in dims:
        kw, kb, key = jax.random.split(key, 3)
        bound = 1.0 / jnp.sqrt(jnp.float32(fan_in))
        w = jax.random.uniform(kw, (fan_in, fan_out), jnp.float32, -bound, bound)
        b = jax.random.uniform(kb, (1, fan_out), jnp.float32, -bound, bound)
        params += [w, b]
    return tuple(params)


def prior_discriminator_ref(x, params):
    """Pure-JAX reference for correctness checking."""
    w0, b0, w1, b1, w2, b2 = params
    h = jax.nn.relu(x @ w0 + b0)
    h = jax.nn.relu(h @ w1 + b1)
    return jax.nn.sigmoid(h @ w2 + b2)


if __name__ == "__main__":
    key = jax.random.PRNGKey(0)
    kx, kp = jax.random.split(key)

    state_dim = 50
    batch = 8  # small correctness shape; kernel pads batch to one 256-row tile

    x = jax.random.normal(kx, (batch, state_dim), jnp.float32)
    params = init_params(kp, state_dim=state_dim)

    # f32 path (bit-accurate vs reference).
    out = jax.block_until_ready(prior_discriminator(x, params))
    ref = prior_discriminator_ref(x, params)
    assert out.shape == (batch, 1)
    assert jnp.allclose(out, ref, atol=1e-5, rtol=1e-5), "f32 mismatch vs reference"

    # bf16-operand path (v6e/v7x MXU fast path); f32 accumulation keeps the
    # error well under the relaxed tolerance.
    out_bf16 = jax.block_until_ready(
        prior_discriminator(x, params, compute_dtype=jnp.bfloat16))
    assert out_bf16.shape == (batch, 1)
    assert jnp.allclose(out_bf16, ref, atol=5e-2, rtol=0.0), "bf16 mismatch vs reference"

    print("KERNEL_OK")
</pallas_src>

<mosaic_0001>
module attributes {stable_mosaic.version = 11 : i64} {
  func.func @_mlp_kernel(%arg0: i32, %arg1: memref<256x128xf32, #tpu.memory_space<vmem>>, %arg2: memref<128x1024xf32, #tpu.memory_space<vmem>>, %arg3: memref<1x1024xf32, #tpu.memory_space<vmem>>, %arg4: memref<1024x256xf32, #tpu.memory_space<vmem>>, %arg5: memref<1x256xf32, #tpu.memory_space<vmem>>, %arg6: memref<1x256xf32, #tpu.memory_space<vmem>>, %arg7: memref<1x1xf32, #tpu.memory_space<vmem>>, %arg8: memref<1x1x256xf32, #tpu.memory_space<vmem>>) attributes {dimension_semantics = [#tpu.dimension_semantics<parallel>], iteration_bounds = array<i64: 1>, scalar_prefetch = 0 : i64, scratch_operands = 0 : i64, tpu.core_type = #tpu.core_type<tc>, window_params = [{transform_indices = @transform_0, window_bounds = array<i64: 256, 128>}, {pipeline_mode = #tpu.pipeline_mode<synchronous>, transform_indices = @transform_1, window_bounds = array<i64: 128, 1024>}, {pipeline_mode = #tpu.pipeline_mode<synchronous>, transform_indices = @transform_2, window_bounds = array<i64: 1, 1024>}, {pipeline_mode = #tpu.pipeline_mode<synchronous>, transform_indices = @transform_3, window_bounds = array<i64: 1024, 256>}, {pipeline_mode = #tpu.pipeline_mode<synchronous>, transform_indices = @transform_4, window_bounds = array<i64: 1, 256>}, {pipeline_mode = #tpu.pipeline_mode<synchronous>, transform_indices = @transform_5, window_bounds = array<i64: 1, 256>}, {pipeline_mode = #tpu.pipeline_mode<synchronous>, transform_indices = @transform_6, window_bounds = array<i64: 1, 1>}, {transform_indices = @transform_7, window_bounds = array<i64: 1, 1, 256>}]} {
    %c0 = arith.constant 0 : index
    %c0_0 = arith.constant 0 : index
    %0 = vector.load %arg1[%c0, %c0_0] : memref<256x128xf32, #tpu.memory_space<vmem>>, vector<256x128xf32>
    %c0_1 = arith.constant 0 : index
    %c0_2 = arith.constant 0 : index
    %1 = vector.load %arg2[%c0_1, %c0_2] : memref<128x1024xf32, #tpu.memory_space<vmem>>, vector<128x1024xf32>
    %cst = arith.constant dense<0.000000e+00> : vector<256x1024xf32>
    %2 = tpu.matmul %0, %1, %cst {dimension_numbers = #tpu.dot_dimension_numbers<[1], [0], [0], [1], [0, 0, 1, 1], [], []>} : vector<256x128xf32>, vector<128x1024xf32>, vector<256x1024xf32> -> vector<256x1024xf32>
    %c0_3 = arith.constant 0 : index
    %c0_4 = arith.constant 0 : index
    %3 = vector.load %arg3[%c0_3, %c0_4] : memref<1x1024xf32, #tpu.memory_space<vmem>>, vector<1x1024xf32>
    %4 = vector.broadcast %3 : vector<1x1024xf32> to vector<256x1024xf32>
    %5 = arith.addf %2, %4 : vector<256x1024xf32>
    %cst_5 = arith.constant 0.000000e+00 : f32
    %6 = vector.broadcast %cst_5 : f32 to vector<256x1024xf32>
    %7 = arith.maximumf %5, %6 : vector<256x1024xf32>
    %c0_6 = arith.constant 0 : index
    %c0_7 = arith.constant 0 : index
    %8 = vector.load %arg4[%c0_6, %c0_7] : memref<1024x256xf32, #tpu.memory_space<vmem>>, vector<1024x256xf32>
    %cst_8 = arith.constant dense<0.000000e+00> : vector<256x256xf32>
    %9 = tpu.matmul %7, %8, %cst_8 {dimension_numbers = #tpu.dot_dimension_numbers<[1], [0], [0], [1], [0, 0, 1, 1], [], []>} : vector<256x1024xf32>, vector<1024x256xf32>, vector<256x256xf32> -> vector<256x256xf32>
    %c0_9 = arith.constant 0 : index
    %c0_10 = arith.constant 0 : index
    %10 = vector.load %arg5[%c0_9, %c0_10] : memref<1x256xf32, #tpu.memory_space<vmem>>, vector<1x256xf32>
    %11 = vector.broadcast %10 : vector<1x256xf32> to vector<256x256xf32>
    %12 = arith.addf %9, %11 : vector<256x256xf32>
    %cst_11 = arith.constant 0.000000e+00 : f32
    %13 = vector.broadcast %cst_11 : f32 to vector<256x256xf32>
    %14 = arith.maximumf %12, %13 : vector<256x256xf32>
    %c0_12 = arith.constant 0 : index
    %c0_13 = arith.constant 0 : index
    %15 = vector.load %arg6[%c0_12, %c0_13] : memref<1x256xf32, #tpu.memory_space<vmem>>, vector<1x256xf32>
    %cst_14 = arith.constant dense<0.000000e+00> : vector<1x256xf32>
    %16 = tpu.matmul %15, %14, %cst_14 {dimension_numbers = #tpu.dot_dimension_numbers<[1], [1], [0], [0], [0, 0, 1, 0], [], []>} : vector<1x256xf32>, vector<256x256xf32>, vector<1x256xf32> -> vector<1x256xf32>
    %c0_15 = arith.constant 0 : index
    %c0_16 = arith.constant 0 : index
    %17 = vector.load %arg7[%c0_15, %c0_16] : memref<1x1xf32, #tpu.memory_space<vmem>>, vector<1x1xf32>
    %18 = vector.broadcast %17 : vector<1x1xf32> to vector<1x256xf32>
    %19 = arith.addf %16, %18 : vector<1x256xf32>
    %20 = arith.negf %19 : vector<1x256xf32>
    %21 = math.exp %20 : vector<1x256xf32>
    %cst_17 = arith.constant 1.000000e+00 : f32
    %22 = vector.broadcast %cst_17 : f32 to vector<1x256xf32>
    %23 = arith.addf %22, %21 : vector<1x256xf32>
    %24 = arith.divf %22, %23 : vector<1x256xf32>
    %25 = vector.shape_cast %24 : vector<1x256xf32> to vector<1x1x256xf32>
    %c0_18 = arith.constant 0 : index
    %c0_19 = arith.constant 0 : index
    %c0_20 = arith.constant 0 : index
    %26 = vector.load %arg8[%c0_18, %c0_19, %c0_20] : memref<1x1x256xf32, #tpu.memory_space<vmem>>, vector<1x1x256xf32>
    tpu.vector_store %arg8[%c0_18, %c0_19, %c0_20], %25 {strides = array<i32>} : memref<1x1x256xf32, #tpu.memory_space<vmem>>, vector<1x1x256xf32>,
    return
  }
  func.func @transform_0(%arg0: i32) -> (i32, i32) {
    %c0_i32 = arith.constant 0 : i32
    %c0_i32_0 = arith.constant 0 : i32
    return %arg0, %c0_i32 : i32, i32
  }
  func.func @transform_1(%arg0: i32) -> (i32, i32) {
    %c0_i32 = arith.constant 0 : i32
    %c0_i32_0 = arith.constant 0 : i32
    %c0_i32_1 = arith.constant 0 : i32
    return %c0_i32, %c0_i32_0 : i32, i32
  }
  func.func @transform_2(%arg0: i32) -> (i32, i32) {
    %c0_i32 = arith.constant 0 : i32
    %c0_i32_0 = arith.constant 0 : i32
    %c0_i32_1 = arith.constant 0 : i32
    return %c0_i32, %c0_i32_0 : i32, i32
  }
  func.func @transform_3(%arg0: i32) -> (i32, i32) {
    %c0_i32 = arith.constant 0 : i32
    %c0_i32_0 = arith.constant 0 : i32
    %c0_i32_1 = arith.constant 0 : i32
    return %c0_i32, %c0_i32_0 : i32, i32
  }
  func.func @transform_4(%arg0: i32) -> (i32, i32) {
    %c0_i32 = arith.constant 0 : i32
    %c0_i32_0 = arith.constant 0 : i32
    %c0_i32_1 = arith.constant 0 : i32
    return %c0_i32, %c0_i32_0 : i32, i32
  }
  func.func @transform_5(%arg0: i32) -> (i32, i32) {
    %c0_i32 = arith.constant 0 : i32
    %c0_i32_0 = arith.constant 0 : i32
    %c0_i32_1 = arith.constant 0 : i32
    return %c0_i32, %c0_i32_0 : i32, i32
  }
  func.func @transform_6(%arg0: i32) -> (i32, i32) {
    %c0_i32 = arith.constant 0 : i32
    %c0_i32_0 = arith.constant 0 : i32
    %c0_i32_1 = arith.constant 0 : i32
    return %c0_i32, %c0_i32_0 : i32, i32
  }
  func.func @transform_7(%arg0: i32) -> (i32, i32, i32) {
    %c0_i32 = arith.constant 0 : i32
    %c0_i32_0 = arith.constant 0 : i32
    %c0_i32_1 = arith.constant 0 : i32
    return %arg0, %c0_i32, %c0_i32_0 : i32, i32, i32
  }
}

</mosaic_0001>

<bundles_post_ra>
// kernel: tpu_custom_call.1
= control target key start
LH: loop header
LB: loop body
LE: loop exit
PB: predicated region body
PF: predicated region fallthrough
CT: control target
= control target key end

     0   :  { %s5467_s0 = inlined_call_operand.hbm [shape: f32[256,128], index: 0, kind: input, shape index: {}]   ;;  %s5468_s1 = inlined_call_operand.hbm [shape: f32[128,1024], index: 1, kind: input, shape index: {}]   ;;  %s5469_s2 = inlined_call_operand.vmem [shape: f32[1,1024], index: 2, kind: input, shape index: {}]   ;;  %s5470_s3 = inlined_call_operand.hbm [shape: f32[1024,256], index: 3, kind: input, shape index: {}]   ;;  %s5471_s4 = inlined_call_operand.vmem [shape: f32[1,256], index: 4, kind: input, shape index: {}]   ;;  %s5472_s5 = inlined_call_operand.vmem [shape: f32[1,256], index: 5, kind: input, shape index: {}]   ;;  %s5473_s6 = inlined_call_operand.<no memory space> [shape: f32[1,1], index: 6, kind: input, shape index: {}]   ;;  %s5474_s7 = inlined_call_operand.hbm [shape: f32[1,1,256], index: 7, kind: output, shape index: {}]  }
   0x1   :  { %v12_v0 = vstv %s5473_s6 }
   0x2   :  { %13 = vst [vmem:[#allocation2] sm:$0x1] %v12_v0 }
   0x3   :  { %14 = vsyncpa [#allocation4], 0 }
   0x4   :  { %15 = vsyncpa [#allocation7], 0 }
   0x5   :  { %16 = vsyncpa [#allocation5], 0  ;;  %s3915_s26 = smov [#allocation6]   ;;  %s3821_s30 = scalar_lea.hbm %s5468_s1, 16384 }
   0x6   :  { %s34_s27 = sshll.u32 %s3915_s26, 4  ;;  %p3822_p0 = scmp.ne.s32.totalorder %s5468_s1, %s3821_s30  ;;  %s35_s27 = int_to_ptr.vmem [resolvable:$true] %s34_s27 }
   0x7   :  { %p3825_p1 = scmp.lt.u32.totalorder %s3821_s30, %s5468_s1 }
   0x9   :  { %p3827_p2 = pnand %p3825_p1, %p3822_p0 }
   0xb   :  { %3830 = shalt.err (!%p3827_p2)
}
   0xc   :  { %s3831_s6 = scalar_lea.vmem %s35_s27, 16384  ;;  %p3836_p4 = scmp.lt.s32.totalorder %s35_s27, %s35_s27 }
   0xd   :  { %p3832_p3 = scmp.ne.s32.totalorder %s35_s27, %s3831_s6  ;;  %p3837_p5 = scmp.lt.s32.totalorder %s3831_s6, %s3831_s6 }
   0xf   :  { %p3838_p6 = por %p3837_p5, %p3836_p4 }
  0x11   :  { %p3839_p7 = pnand %p3838_p6, %p3832_p3 }
  0x13   :  { %3842 = shalt.err (!%p3839_p7)
}
  0x14   :  { %s3916_s12 = smov 1024   ;;  %s3917_s13 = smov 64  }
  0x15   :  { %40 = dma.hbm_to_vmem [thread:$0]  %s5468_s1, 16384, %s35_s27, [#allocation7], %s3916_s12, %s3916_s12, %s3917_s13  }
  0x16   :  { %s3918_s16 = smov [#allocation3]   ;;  %s3843_s20 = scalar_lea.hbm %s5467_s0, 4096 }
  0x17   :  { %s22_s17 = sshll.u32 %s3918_s16, 4  ;;  %p3844_p8 = scmp.ne.s32.totalorder %s5467_s0, %s3843_s20  ;;  %s23_s17 = int_to_ptr.vmem [resolvable:$true] %s22_s17 }
  0x18   :  { %p3847_p9 = scmp.lt.u32.totalorder %s3843_s20, %s5467_s0 }
  0x1a   :  { %p3849_p10 = pnand %p3847_p9, %p3844_p8 }
  0x1c   :  { %3852 = shalt.err (!%p3849_p10)
}
  0x1d   :  { %s3853_s25 = scalar_lea.vmem %s23_s17, 4096  ;;  %p3858_p12 = scmp.lt.s32.totalorder %s23_s17, %s23_s17 }
  0x1e   :  { %p3854_p11 = scmp.ne.s32.totalorder %s23_s17, %s3853_s25  ;;  %p3859_p13 = scmp.lt.s32.totalorder %s3853_s25, %s3853_s25 }
  0x20   :  { %p3860_p0 = por %p3859_p13, %p3858_p12 }
  0x22   :  { %p3861_p1 = pnand %p3860_p0, %p3854_p11 }
  0x24   :  { %3864 = shalt.err (!%p3861_p1)
}
  0x25   :  { %s3919_s1 = smov 128   ;;  %s3920_s26 = smov 8  }
  0x26   :  { %28 = dma.hbm_to_vmem [thread:$0]  %s5467_s0, 4096, %s23_s17, [#allocation4], %s3919_s1, %s3919_s1, %s3920_s26  }
  0x27   :  { %s3921_s29 = smov [#allocation8]   ;;  %s3865_s10 = scalar_lea.hbm %s5470_s3, 32768 }
  0x28   :  { %s48_s30 = sshll.u32 %s3921_s29, 4  ;;  %p3866_p2 = scmp.ne.s32.totalorder %s5470_s3, %s3865_s10  ;;  %s49_s30 = int_to_ptr.vmem [resolvable:$true] %s48_s30 }
  0x29   :  { %p3869_p3 = scmp.lt.u32.totalorder %s3865_s10, %s5470_s3 }
  0x2b   :  { %p3871_p4 = pnand %p3869_p3, %p3866_p2 }
  0x2d   :  { %3874 = shalt.err (!%p3871_p4)
}
  0x2e   :  { %s3875_s14 = scalar_lea.vmem %s49_s30, 32768  ;;  %p3880_p6 = scmp.lt.s32.totalorder %s49_s30, %s49_s30 }
  0x2f   :  { %p3876_p5 = scmp.ne.s32.totalorder %s49_s30, %s3875_s14  ;;  %p3881_p7 = scmp.lt.s32.totalorder %s3875_s14, %s3875_s14 }
  0x31   :  { %p3882_p8 = por %p3881_p7, %p3880_p6 }
  0x33   :  { %p3883_p9 = pnand %p3882_p8, %p3876_p5 }
  0x35   :  { %3886 = shalt.err (!%p3883_p9)
}
  0x36   :  { %s3922_s0 = smov 256   ;;  %s3923_s15 = smov 16  }
  0x37   :  { %54 = dma.hbm_to_vmem [thread:$0]  %s5470_s3, 32768, %s49_s30, [#allocation7], %s3922_s0, %s3922_s0, %s3923_s15  }
  0x38   :  { %3909 = dma.done.wait [#allocation4], 4096  }
  0x39   :  { %3910 = vsyncadd [#allocation4], 4294963200 }
  0x3a   :  { %3911 = dma.done.wait [#allocation7], 49152  }
  0x3b   :  { %3912 = vsyncadd [#allocation7], 4294918144  ;;  %v5476_v1 = vmov 0.0   ;;  %v103_v2 = vld [vmem:[#allocation6 + $0x8] sm:$0xff]  ;;  %v102_v4 = vld [vmem:[#allocation6] sm:$0xff] }
  0x3c   :  { %336 = vmatprep.mubr.f32.mxu1 %v5476_v1  ;;  %850 = vmatprep.mubr.f32.mxu0 %v5476_v1  ;;  %v111_v3 = vld [vmem:[#allocation6 + $0x48] sm:$0xff]  ;;  %v110_v6 = vld [vmem:[#allocation6 + $0x40] sm:$0xff]  ;;  %v105_v49 = vld [vmem:[#allocation6 + $0x18] sm:$0xff] }
  0x3d   :  { %v3062_v5 = vpack.c.bf16 %v111_v3, %v103_v2  ;;  %v119_v7 = vld [vmem:[#allocation6 + $0x88] sm:$0xff]  ;;  %v3064_v9 = vpack.c.bf16 %v110_v6, %v102_v4  ;;  %v118_v11 = vld [vmem:[#allocation6 + $0x80] sm:$0xff]  ;;  %v113_v50 = vld [vmem:[#allocation6 + $0x58] sm:$0xff] }
  0x3e   :  { %v127_v8 = vld [vmem:[#allocation6 + $0xc8] sm:$0xff]  ;;  %v126_v12 = vld [vmem:[#allocation6 + $0xc0] sm:$0xff]  ;;  %v3094_v52 = vpack.c.bf16 %v113_v50, %v105_v49  ;;  %v104_v53 = vld [vmem:[#allocation6 + $0x10] sm:$0xff] }
  0x3f   :  { %v3066_v10 = vpack.c.bf16 %v127_v8, %v119_v7  ;;  %v135_v13 = vld [vmem:[#allocation6 + $0x108] sm:$0xff]  ;;  %3063 = vmatprep.subr.bf16.mxu1 %v3062_v5  ;;  %v3068_v15 = vpack.c.bf16 %v126_v12, %v118_v11  ;;  %v134_v17 = vld [vmem:[#allocation6 + $0x100] sm:$0xff]  ;;  %v112_v54 = vld [vmem:[#allocation6 + $0x50] sm:$0xff] }
  0x40   :  { %v143_v14 = vld [vmem:[#allocation6 + $0x148] sm:$0xff]  ;;  %3065 = vmatpush1.bf16.msra.mxu1 %v3064_v9  ;;  %v142_v18 = vld [vmem:[#allocation6 + $0x140] sm:$0xff]  ;;  %v121_v55 = vld [vmem:[#allocation6 + $0x98] sm:$0xff]  ;;  %v3096_v58 = vpack.c.bf16 %v112_v54, %v104_v53 }
  0x41   :  { %3067 = vmatprep.subr.bf16.mxu1 %v3066_v10  ;;  %v3070_v16 = vpack.c.bf16 %v143_v14, %v135_v13  ;;  %v151_v19 = vld [vmem:[#allocation6 + $0x188] sm:$0xff]  ;;  %v3072_v21 = vpack.c.bf16 %v142_v18, %v134_v17  ;;  %v150_v23 = vld [vmem:[#allocation6 + $0x180] sm:$0xff]  ;;  %v129_v56 = vld [vmem:[#allocation6 + $0xd8] sm:$0xff] }
  0x42   :  { %v159_v20 = vld [vmem:[#allocation6 + $0x1c8] sm:$0xff]  ;;  %v158_v24 = vld [vmem:[#allocation6 + $0x1c0] sm:$0xff]  ;;  %v3098_v59 = vpack.c.bf16 %v129_v56, %v121_v55  ;;  %v120_v60 = vld [vmem:[#allocation6 + $0x90] sm:$0xff] }
  0x43   :  { %v3074_v22 = vpack.c.bf16 %v159_v20, %v151_v19  ;;  %v167_v25 = vld [vmem:[#allocation6 + $0x208] sm:$0xff]  ;;  %v3076_v27 = vpack.c.bf16 %v158_v24, %v150_v23  ;;  %v166_v29 = vld [vmem:[#allocation6 + $0x200] sm:$0xff]  ;;  %v128_v61 = vld [vmem:[#allocation6 + $0xd0] sm:$0xff] }
  0x44   :  { %3069 = vmatpush1.bf16.msra.mxu1 %v3068_v15  ;;  %v175_v26 = vld [vmem:[#allocation6 + $0x248] sm:$0xff]  ;;  %v174_v30 = vld [vmem:[#allocation6 + $0x240] sm:$0xff]  ;;  %v137_v62 = vld [vmem:[#allocation6 + $0x118] sm:$0xff]  ;;  %v3100_v2 = vpack.c.bf16 %v128_v61, %v120_v60 }
  0x45   :  { %3071 = vmatprep.subr.bf16.mxu1 %v3070_v16  ;;  %v3078_v28 = vpack.c.bf16 %v175_v26, %v167_v25  ;;  %v183_v31 = vld [vmem:[#allocation6 + $0x288] sm:$0xff]  ;;  %v3080_v33 = vpack.c.bf16 %v174_v30, %v166_v29  ;;  %v182_v35 = vld [vmem:[#allocation6 + $0x280] sm:$0xff]  ;;  %v145_v63 = vld [vmem:[#allocation6 + $0x158] sm:$0xff] }
  0x46   :  { %v191_v32 = vld [vmem:[#allocation6 + $0x2c8] sm:$0xff]  ;;  %v190_v36 = vld [vmem:[#allocation6 + $0x2c0] sm:$0xff]  ;;  %v3102_v3 = vpack.c.bf16 %v145_v63, %v137_v62  ;;  %v136_v4 = vld [vmem:[#allocation6 + $0x110] sm:$0xff] }
  0x47   :  { %v3082_v34 = vpack.c.bf16 %v191_v32, %v183_v31  ;;  %v199_v37 = vld [vmem:[#allocation6 + $0x308] sm:$0xff]  ;;  %v3084_v39 = vpack.c.bf16 %v190_v36, %v182_v35  ;;  %v198_v41 = vld [vmem:[#allocation6 + $0x300] sm:$0xff]  ;;  %v144_v5 = vld [vmem:[#allocation6 + $0x150] sm:$0xff] }
  0x48   :  { %3073 = vmatpush1.bf16.msra.mxu1 %v3072_v21  ;;  %v207_v38 = vld [vmem:[#allocation6 + $0x348] sm:$0xff]  ;;  %v206_v42 = vld [vmem:[#allocation6 + $0x340] sm:$0xff]  ;;  %v153_v6 = vld [vmem:[#allocation6 + $0x198] sm:$0xff]  ;;  %v3104_v9 = vpack.c.bf16 %v144_v5, %v136_v4 }
  0x49   :  { %3075 = vmatprep.subr.bf16.mxu1 %v3074_v22  ;;  %v3086_v40 = vpack.c.bf16 %v207_v38, %v199_v37  ;;  %v215_v43 = vld [vmem:[#allocation6 + $0x388] sm:$0xff]  ;;  %v3088_v45 = vpack.c.bf16 %v206_v42, %v198_v41  ;;  %v214_v47 = vld [vmem:[#allocation6 + $0x380] sm:$0xff]  ;;  %v161_v7 = vld [vmem:[#allocation6 + $0x1d8] sm:$0xff] }
  0x4a   :  { %v223_v44 = vld [vmem:[#allocation6 + $0x3c8] sm:$0xff]  ;;  %v222_v48 = vld [vmem:[#allocation6 + $0x3c0] sm:$0xff]  ;;  %v4017_v8 = vld [vmem:[#allocation3 + $0x10] sm:$0xff]  ;;  %v3106_v10 = vpack.c.bf16 %v161_v7, %v153_v6 }
  0x4b   :  { %v3090_v46 = vpack.c.bf16 %v223_v44, %v215_v43  ;;  %v3092_v51 = vpack.c.bf16 %v222_v48, %v214_v47  ;;  %v4009_v57 = vld [vmem:[#allocation3] sm:$0xff]  ;;  %v4013_v0 = vld [vmem:[#allocation3 + $0x8] sm:$0xff]  ;;  %v152_v11 = vld [vmem:[#allocation6 + $0x190] sm:$0xff] }
  0x4c   :  { %3077 = vmatpush1.bf16.msra.mxu1 %v3076_v27  ;;  %v160_v12 = vld [vmem:[#allocation6 + $0x1d0] sm:$0xff]  ;;  %v169_v13 = vld [vmem:[#allocation6 + $0x218] sm:$0xff]  ;;  %v4025_v22 = vld [vmem:[#allocation3 + $0x20] sm:$0xff] }
  0x4d   :  { %3079 = vmatprep.subr.bf16.mxu1 %v3078_v28  ;;  %v177_v14 = vld [vmem:[#allocation6 + $0x258] sm:$0xff]  ;;  %v3108_v16 = vpack.c.bf16 %v160_v12, %v152_v11  ;;  %v168_v18 = vld [vmem:[#allocation6 + $0x210] sm:$0xff]  ;;  %v4029_v29 = vld [vmem:[#allocation3 + $0x28] sm:$0xff] }
  0x4e   :  { %v4021_v15 = vld [vmem:[#allocation3 + $0x18] sm:$0xff]  ;;  %v3110_v17 = vpack.c.bf16 %v177_v14, %v169_v13  ;;  %v176_v19 = vld [vmem:[#allocation6 + $0x250] sm:$0xff]  ;;  %v4041_v43 = vld [vmem:[#allocation3 + $0x40] sm:$0xff] }
  0x4f   :  { %v185_v20 = vld [vmem:[#allocation6 + $0x298] sm:$0xff]  ;;  %v3112_v23 = vpack.c.bf16 %v176_v19, %v168_v18  ;;  %v184_v25 = vld [vmem:[#allocation6 + $0x290] sm:$0xff]  ;;  %v4045_v44 = vld [vmem:[#allocation3 + $0x48] sm:$0xff] }
  0x50   :  { %3081 = vmatpush1.bf16.msra.mxu1 %v3080_v33  ;;  %v193_v21 = vld [vmem:[#allocation6 + $0x2d8] sm:$0xff]  ;;  %v192_v26 = vld [vmem:[#allocation6 + $0x2d0] sm:$0xff]  ;;  %v4057_v47 = vld [vmem:[#allocation3 + $0x60] sm:$0xff] }
  0x51   :  { %3083 = vmatprep.subr.bf16.mxu1 %v3082_v34  ;;  %v3114_v24 = vpack.c.bf16 %v193_v21, %v185_v20  ;;  %v201_v27 = vld [vmem:[#allocation6 + $0x318] sm:$0xff]  ;;  %v3116_v30 = vpack.c.bf16 %v192_v26, %v184_v25  ;;  %v200_v32 = vld [vmem:[#allocation6 + $0x310] sm:$0xff]  ;;  %v4061_v48 = vld [vmem:[#allocation3 + $0x68] sm:$0xff] }
  0x52   :  { %v209_v28 = vld [vmem:[#allocation6 + $0x358] sm:$0xff]  ;;  %v208_v33 = vld [vmem:[#allocation6 + $0x350] sm:$0xff]  ;;  %v107_v50 = vld [vmem:[#allocation6 + $0x28] sm:$0xff] }
  0x53   :  { %v3118_v31 = vpack.c.bf16 %v209_v28, %v201_v27  ;;  %v217_v34 = vld [vmem:[#allocation6 + $0x398] sm:$0xff]  ;;  %v4033_v36 = vld [vmem:[#allocation3 + $0x30] sm:$0xff]  ;;  %v3120_v37 = vpack.c.bf16 %v208_v33, %v200_v32  ;;  %v106_v53 = vld [vmem:[#allocation6 + $0x20] sm:$0xff] }
  0x54   :  { %3085 = vmatpush1.bf16.msra.mxu1 %v3084_v39  ;;  %v225_v35 = vld [vmem:[#allocation6 + $0x3d8] sm:$0xff]  ;;  %v216_v39 = vld [vmem:[#allocation6 + $0x390] sm:$0xff]  ;;  %v114_v54 = vld [vmem:[#allocation6 + $0x60] sm:$0xff] }
  0x55   :  { %3087 = vmatprep.subr.bf16.mxu1 %v3086_v40  ;;  %v3122_v38 = vpack.c.bf16 %v225_v35, %v217_v34  ;;  %v224_v40 = vld [vmem:[#allocation6 + $0x3d0] sm:$0xff]  ;;  %v4037_v41 = vld [vmem:[#allocation3 + $0x38] sm:$0xff]  ;;  %v3128_v55 = vpack.c.bf16 %v114_v54, %v106_v53  ;;  %v122_v61 = vld [vmem:[#allocation6 + $0xa0] sm:$0xff] }
  0x56   :  { %v3124_v42 = vpack.c.bf16 %v224_v40, %v216_v39  ;;  %v4065_v49 = vld [vmem:[#allocation3 + $0x70] sm:$0xff]  ;;  %v4069_v56 = vld [vmem:[#allocation3 + $0x78] sm:$0xff]  ;;  %v130_v62 = vld [vmem:[#allocation6 + $0xe0] sm:$0xff] }
  0x57   :  { %v3132_v63 = vpack.c.bf16 %v130_v62, %v122_v61  ;;  %v147_v4 = vld [vmem:[#allocation6 + $0x168] sm:$0xff]  ;;  %v138_v6 = vld [vmem:[#allocation6 + $0x120] sm:$0xff]  ;;  %v4081_v18 = vld [vmem:[#allocation3 + $0x90] sm:$0xff] }
  0x58   :  { %3089 = vmatpush1.bf16.msra.mxu1 %v3088_v45  ;;  %v4049_v45 = vld [vmem:[#allocation3 + $0x50] sm:$0xff]  ;;  %v146_v7 = vld [vmem:[#allocation6 + $0x160] sm:$0xff]  ;;  %v155_v11 = vld [vmem:[#allocation6 + $0x1a8] sm:$0xff] }
  0x59   :  { %3091 = vmatprep.subr.bf16.mxu1 %v3090_v46  ;;  %v4053_v46 = vld [vmem:[#allocation3 + $0x58] sm:$0xff]  ;;  %v163_v12 = vld [vmem:[#allocation6 + $0x1e8] sm:$0xff]  ;;  %v154_v14 = vld [vmem:[#allocation6 + $0x1a0] sm:$0xff] }
  0x5a   :  { %v3138_v13 = vpack.c.bf16 %v163_v12, %v155_v11  ;;  %v171_v19 = vld [vmem:[#allocation6 + $0x228] sm:$0xff]  ;;  %v4085_v26 = vld [vmem:[#allocation3 + $0x98] sm:$0xff]  ;;  %v194_v32 = vld [vmem:[#allocation6 + $0x2e0] sm:$0xff] }
  0x5b   :  { %v179_v20 = vld [vmem:[#allocation6 + $0x268] sm:$0xff]  ;;  %v4089_v34 = vld [vmem:[#allocation3 + $0xa0] sm:$0xff]  ;;  %v1623_v62 = vld [vmem:[#allocation8 + $0x218] sm:$0xff] }
  0x5c   :  { %3093 = vmatpush1.bf16.msra.mxu1 %v3092_v51  ;;  %v115_v51 = vld [vmem:[#allocation6 + $0x68] sm:$0xff]  ;;  %v3142_v21 = vpack.c.bf16 %v179_v20, %v171_v19  ;;  %v202_v39 = vld [vmem:[#allocation6 + $0x320] sm:$0xff]  ;;  %v1626_v20 = vld [vmem:[#allocation8 + $0x230] sm:$0xff] }
  0x5d   :  { %3095 = vmatprep.subr.bf16.mxu1 %v3094_v52  ;;  %v3126_v52 = vpack.c.bf16 %v115_v51, %v107_v50  ;;  %v187_v27 = vld [vmem:[#allocation6 + $0x2a8] sm:$0xff]  ;;  %v210_v40 = vld [vmem:[#allocation6 + $0x360] sm:$0xff] }
  0x5e   :  { %v195_v28 = vld [vmem:[#allocation6 + $0x2e8] sm:$0xff]  ;;  %v218_v54 = vld [vmem:[#allocation6 + $0x3a0] sm:$0xff] }
  0x5f   :  { %337 = vmatmul.mubr.f32.vlgmr.msra.gmra.mrb[0].mxu1 %v4009_v57  ;;  %3127 = vmatprep.subr.bf16.mxu0 %v3126_v52  ;;  %v203_v35 = vld [vmem:[#allocation6 + $0x328] sm:$0xff]  ;;  %v1624_v19 = vld [vmem:[#allocation8 + $0x220] sm:$0xff] }
  0x60   :  { %3097 = vmatpush1.bf16.msra.mxu1 %v3096_v58  ;;  %342 = vmatprep.mubr.f32.mxu1 %v5476_v1  ;;  %v123_v58 = vld [vmem:[#allocation6 + $0xa8] sm:$0xff] }
  0x61   :  { %3099 = vmatprep.subr.bf16.mxu1 %v3098_v59  ;;  %3129 = vmatpush1.bf16.msra.mxu0 %v3128_v55  ;;  %v131_v59 = vld [vmem:[#allocation6 + $0xe8] sm:$0xff]  ;;  %v226_v55 = vld [vmem:[#allocation6 + $0x3e0] sm:$0xff] }
  0x62   :  { %v3130_v60 = vpack.c.bf16 %v131_v59, %v123_v58  ;;  %v4093_v50 = vld [vmem:[#allocation3 + $0xa8] sm:$0xff]  ;;  %v3156_v58 = vpack.c.bf16 %v226_v55, %v218_v54  ;;  %v4097_v59 = vld [vmem:[#allocation3 + $0xb0] sm:$0xff]  ;;  %v125_v55 = vld [vmem:[#allocation6 + $0xb8] sm:$0xff] }
  0x63   :  { %343 = vmatmul.mubr.f32.gmra.mrb[2].mxu1 %v4013_v0  ;;  %v219_v51 = vld [vmem:[#allocation6 + $0x3a8] sm:$0xff]  ;;  %v116_v54 = vld [vmem:[#allocation6 + $0x70] sm:$0xff] }
  0x64   :  { %348 = vmatprep.mubr.f32.mxu1 %v5476_v1  ;;  %3101 = vmatpush1.bf16.msra.mxu1 %v3100_v2  ;;  %v4073_v2 = vld [vmem:[#allocation3 + $0x80] sm:$0xff]  ;;  %v227_v52 = vld [vmem:[#allocation6 + $0x3e8] sm:$0xff] }
  0x65   :  { %3103 = vmatprep.subr.bf16.mxu1 %v3102_v3  ;;  %3131 = vmatprep.subr.bf16.mxu0 %v3130_v60  ;;  %v139_v3 = vld [vmem:[#allocation6 + $0x128] sm:$0xff]  ;;  %v3154_v53 = vpack.c.bf16 %v227_v52, %v219_v51  ;;  %v4101_v60 = vld [vmem:[#allocation3 + $0xb8] sm:$0xff] }
  0x66   :  { %3133 = vmatpush1.bf16.msra.mxu0 %v3132_v63  ;;  %v3134_v5 = vpack.c.bf16 %v147_v4, %v139_v3  ;;  %v1621_v61 = vld [vmem:[#allocation8 + $0x208] sm:$0xff]  ;;  %v4107_v3 = vld [vmem:[#allocation3 + $0xc0] sm:$0xff]  ;;  %v109_v4 = vld [vmem:[#allocation6 + $0x38] sm:$0xff] }
  0x67   :  { %349 = vmatmul.mubr.f32.gmra.mrb[4].mxu1 %v4017_v8  ;;  %v3254_v63 = vpack.c.bf16 %v1623_v62, %v1621_v61  ;;  %v4113_v12 = vld [vmem:[#allocation3 + $0xc8] sm:$0xff]  ;;  %v4149_v52 = vld [vmem:[#allocation3 + $0xf8] sm:$0xff] }
  0x68   :  { %354 = vmatprep.mubr.f32.mxu1 %v5476_v1  ;;  %3105 = vmatpush1.bf16.msra.mxu1 %v3104_v9  ;;  %v3136_v9 = vpack.c.bf16 %v146_v7, %v138_v6  ;;  %v1620_v6 = vld [vmem:[#allocation8 + $0x200] sm:$0xff]  ;;  %v1622_v7 = vld [vmem:[#allocation8 + $0x210] sm:$0xff]  ;;  %v1637_v61 = vld [vmem:[#allocation8 + $0x288] sm:$0xff] }
  0x69   :  { %3107 = vmatprep.subr.bf16.mxu1 %v3106_v10  ;;  %v4077_v10 = vld [vmem:[#allocation3 + $0x88] sm:$0xff]  ;;  %3135 = vmatprep.subr.bf16.mxu0 %v3134_v5  ;;  %v117_v5 = vld [vmem:[#allocation6 + $0x78] sm:$0xff]  ;;  %v3256_v11 = vpack.c.bf16 %v1622_v7, %v1620_v6  ;;  %v132_v7 = vld [vmem:[#allocation6 + $0xf0] sm:$0xff] }
  0x6a   :  { %3137 = vmatpush1.bf16.msra.mxu0 %v3136_v9  ;;  %v3158_v9 = vpack.c.bf16 %v117_v5, %v109_v4  ;;  %v1639_v62 = vld [vmem:[#allocation8 + $0x298] sm:$0xff]  ;;  %v124_v5 = vld [vmem:[#allocation6 + $0xb0] sm:$0xff] }
  0x6b   :  { %355 = vmatmul.mubr.f32.gmra.mrb[6].mxu1 %v4021_v15  ;;  %3139 = vmatprep.subr.bf16.mxu0 %v3138_v13  ;;  %v1625_v13 = vld [vmem:[#allocation8 + $0x228] sm:$0xff] }
  0x6c   :  { %360 = vmatprep.mubr.f32.mxu1 %v5476_v1  ;;  %3109 = vmatpush1.bf16.msra.mxu1 %v3108_v16  ;;  %v162_v16 = vld [vmem:[#allocation6 + $0x1e0] sm:$0xff] }
  0x6d   :  { %3111 = vmatprep.subr.bf16.mxu1 %v3110_v17  ;;  %v3140_v17 = vpack.c.bf16 %v162_v16, %v154_v14  ;;  %v1627_v14 = vld [vmem:[#allocation8 + $0x238] sm:$0xff] }
  0x6e   :  { %v3258_v16 = vpack.c.bf16 %v1627_v14, %v1625_v13  ;;  %v141_v13 = vld [vmem:[#allocation6 + $0x138] sm:$0xff] }
  0x6f   :  { %361 = vmatmul.mubr.f32.gmra.mrb[8].mxu1 %v4025_v22  ;;  %3141 = vmatpush1.bf16.msra.mxu0 %v3140_v17  ;;  %v4119_v17 = vld [vmem:[#allocation3 + $0xd0] sm:$0xff]  ;;  %v149_v14 = vld [vmem:[#allocation6 + $0x178] sm:$0xff] }
  0x70   :  { %366 = vmatprep.mubr.f32.mxu1 %v5476_v1  ;;  %3113 = vmatpush1.bf16.msra.mxu1 %v3112_v23  ;;  %v170_v23 = vld [vmem:[#allocation6 + $0x220] sm:$0xff] }
  0x71   :  { %3115 = vmatprep.subr.bf16.mxu1 %v3114_v24  ;;  %v178_v24 = vld [vmem:[#allocation6 + $0x260] sm:$0xff]  ;;  %3143 = vmatprep.subr.bf16.mxu0 %v3142_v21  ;;  %v3260_v21 = vpack.c.bf16 %v1626_v20, %v1624_v19  ;;  %v3164_v19 = vpack.c.bf16 %v132_v7, %v124_v5  ;;  %v3166_v20 = vpack.c.bf16 %v149_v14, %v141_v13  ;;  %v1647_v5 = vld [vmem:[#allocation8 + $0x2d8] sm:$0xff]  ;;  %v188_v7 = vld [vmem:[#allocation6 + $0x2b0] sm:$0xff] }
  0x72   :  { %v3144_v25 = vpack.c.bf16 %v178_v24, %v170_v23  ;;  %v4125_v23 = vld [vmem:[#allocation3 + $0xd8] sm:$0xff]  ;;  %v1629_v24 = vld [vmem:[#allocation8 + $0x248] sm:$0xff]  ;;  %v1644_v13 = vld [vmem:[#allocation8 + $0x2c0] sm:$0xff] }
  0x73   :  { %367 = vmatmul.mubr.f32.gmra.mrb[10].mxu1 %v4029_v29  ;;  %v1646_v14 = vld [vmem:[#allocation8 + $0x2d0] sm:$0xff] }
  0x74   :  { %372 = vmatprep.mubr.f32.mxu1 %v5476_v1  ;;  %3117 = vmatpush1.bf16.msra.mxu1 %v3116_v30  ;;  %v3146_v30 = vpack.c.bf16 %v195_v28, %v187_v27  ;;  %v4131_v28 = vld [vmem:[#allocation3 + $0xe0] sm:$0xff] }
  0x75   :  { %3119 = vmatprep.subr.bf16.mxu1 %v3118_v31  ;;  %3145 = vmatpush1.bf16.msra.mxu0 %v3144_v25  ;;  %v186_v31 = vld [vmem:[#allocation6 + $0x2a0] sm:$0xff]  ;;  %v1631_v25 = vld [vmem:[#allocation8 + $0x258] sm:$0xff] }
  0x76   :  { %v3148_v33 = vpack.c.bf16 %v194_v32, %v186_v31  ;;  %3147 = vmatprep.subr.bf16.mxu0 %v3146_v30  ;;  %v3262_v27 = vpack.c.bf16 %v1631_v25, %v1629_v24  ;;  %v1628_v30 = vld [vmem:[#allocation8 + $0x240] sm:$0xff]  ;;  %v1630_v31 = vld [vmem:[#allocation8 + $0x250] sm:$0xff]  ;;  %v157_v25 = vld [vmem:[#allocation6 + $0x1b8] sm:$0xff] }
  0x77   :  { %373 = vmatmul.mubr.f32.gmra.mrb[12].mxu1 %v4033_v36  ;;  %v3264_v32 = vpack.c.bf16 %v1630_v31, %v1628_v30  ;;  %v148_v24 = vld [vmem:[#allocation6 + $0x170] sm:$0xff]  ;;  %v1641_v30 = vld [vmem:[#allocation8 + $0x2a8] sm:$0xff]  ;;  %v1643_v31 = vld [vmem:[#allocation8 + $0x2b8] sm:$0xff] }
  0x78   :  { %378 = vmatprep.mubr.f32.mxu1 %v5476_v1  ;;  %3121 = vmatpush1.bf16.msra.mxu1 %v3120_v37  ;;  %v211_v37 = vld [vmem:[#allocation6 + $0x368] sm:$0xff] }
  0x79   :  { %3123 = vmatprep.subr.bf16.mxu1 %v3122_v38  ;;  %3149 = vmatpush1.bf16.msra.mxu0 %v3148_v33  ;;  %v3150_v38 = vpack.c.bf16 %v211_v37, %v203_v35  ;;  %v4137_v33 = vld [vmem:[#allocation3 + $0xe8] sm:$0xff]  ;;  %v1635_v37 = vld [vmem:[#allocation8 + $0x278] sm:$0xff] }
  0x7a   :  { %v1633_v35 = vld [vmem:[#allocation8 + $0x268] sm:$0xff] }
  0x7b   :  { %379 = vmatmul.mubr.f32.gmra.mrb[14].mxu1 %v4037_v41  ;;  %3151 = vmatprep.subr.bf16.mxu0 %v3150_v38  ;;  %v3266_v38 = vpack.c.bf16 %v1635_v37, %v1633_v35  ;;  %v156_v35 = vld [vmem:[#allocation6 + $0x1b0] sm:$0xff] }
  0x7c   :  { %384 = vmatprep.mubr.f32.mxu1 %v5476_v1  ;;  %3125 = vmatpush1.bf16.msra.mxu1 %v3124_v42  ;;  %v3152_v42 = vpack.c.bf16 %v210_v40, %v202_v39  ;;  %v4143_v39 = vld [vmem:[#allocation3 + $0xf0] sm:$0xff]  ;;  %v1632_v40 = vld [vmem:[#allocation8 + $0x260] sm:$0xff] }
  0x7d   :  { %3159 = vmatprep.subr.bf16.mxu1 %v3158_v9  ;;  %v1636_v9 = vld [vmem:[#allocation8 + $0x280] sm:$0xff] }
  0x7e   :  { %3153 = vmatpush1.bf16.msra.mxu0 %v3152_v42  ;;  %v1634_v42 = vld [vmem:[#allocation8 + $0x270] sm:$0xff] }
  0x7f   :  { %385 = vmatmul.mubr.f32.gmra.mrb[16].mxu1 %v4041_v43  ;;  %3155 = vmatprep.subr.bf16.mxu0 %v3154_v53  ;;  %v3268_v51 = vpack.c.bf16 %v1634_v42, %v1632_v40  ;;  %v108_v53 = vld [vmem:[#allocation6 + $0x30] sm:$0xff]  ;;  %v1640_v40 = vld [vmem:[#allocation8 + $0x2a0] sm:$0xff] }
  0x80   :  { %390 = vmatprep.mubr.f32.mxu1 %v5476_v1  ;;  %v3160_v4 = vpack.c.bf16 %v116_v54, %v108_v53  ;;  %v1642_v42 = vld [vmem:[#allocation8 + $0x2b0] sm:$0xff]  ;;  %v181_v53 = vld [vmem:[#allocation6 + $0x278] sm:$0xff] }
  0x81   :  { %v3276_v54 = vpack.c.bf16 %v1642_v42, %v1640_v40  ;;  %v1648_v40 = vld [vmem:[#allocation8 + $0x2e0] sm:$0xff]  ;;  %v1650_v42 = vld [vmem:[#allocation8 + $0x2f0] sm:$0xff] }
  0x82   :  { %3157 = vmatpush1.bf16.msra.mxu0 %v3156_v58  ;;  %v133_v58 = vld [vmem:[#allocation6 + $0xf8] sm:$0xff] }
  0x83   :  { %391 = vmatmul.mubr.f32.gmra.mrb[18].mxu1 %v4045_v44  ;;  %3255 = vmatprep.subr.bf16.mxu0 %v3254_v63  ;;  %v3270_v63 = vpack.c.bf16 %v1639_v62, %v1637_v61  ;;  %v3162_v6 = vpack.c.bf16 %v133_v58, %v125_v55  ;;  %v172_v58 = vld [vmem:[#allocation6 + $0x230] sm:$0xff]  ;;  %v189_v62 = vld [vmem:[#allocation6 + $0x2b8] sm:$0xff] }
  0x84   :  { %396 = vmatprep.mubr.f32.mxu1 %v5476_v1  ;;  %v180_v61 = vld [vmem:[#allocation6 + $0x270] sm:$0xff] }
  0x85   :  { %851 = vmatmul.mubr.f32.vlgmr.msra.gmra.mrb[0].mxu0 %v4009_v57 }
  0x86   :  { %856 = vmatprep.mubr.f32.mxu0 %v5476_v1  ;;  %3257 = vmatpush1.bf16.msra.mxu0 %v3256_v11  ;;  %v1638_v11 = vld [vmem:[#allocation8 + $0x290] sm:$0xff] }
  0x87   :  { %397 = vmatmul.mubr.f32.gmra.mrb[20].mxu1 %v4049_v45  ;;  %3259 = vmatprep.subr.bf16.mxu0 %v3258_v16  ;;  %v3272_v16 = vpack.c.bf16 %v1638_v11, %v1636_v9  ;;  %v196_v11 = vld [vmem:[#allocation6 + $0x2f0] sm:$0xff] }
  0x88   :  { %402 = vmatprep.mubr.f32.mxu1 %v5476_v1 }
  0x89   :  { %857 = vmatmul.mubr.f32.gmra.mrb[2].mxu0 %v4013_v0 }
  0x8a   :  { %862 = vmatprep.mubr.f32.mxu0 %v5476_v1  ;;  %3261 = vmatpush1.bf16.msra.mxu0 %v3260_v21  ;;  %v140_v21 = vld [vmem:[#allocation6 + $0x130] sm:$0xff] }
  0x8b   :  { %403 = vmatmul.mubr.f32.gmra.mrb[22].mxu1 %v4053_v46  ;;  %3263 = vmatprep.subr.bf16.mxu0 %v3262_v27  ;;  %v165_v27 = vld [vmem:[#allocation6 + $0x1f8] sm:$0xff] }
  0x8c   :  { %408 = vmatprep.mubr.f32.mxu1 %v5476_v1  ;;  %v3170_v37 = vpack.c.bf16 %v165_v27, %v157_v25  ;;  %v212_v25 = vld [vmem:[#allocation6 + $0x370] sm:$0xff]  ;;  %v221_v27 = vld [vmem:[#allocation6 + $0x3b8] sm:$0xff] }
  0x8d   :  { %863 = vmatmul.mubr.f32.gmra.mrb[4].mxu0 %v4017_v8 }
  0x8e   :  { %868 = vmatprep.mubr.f32.mxu0 %v5476_v1  ;;  %3265 = vmatpush1.bf16.msra.mxu0 %v3264_v32  ;;  %v3274_v32 = vpack.c.bf16 %v1643_v31, %v1641_v30  ;;  %v229_v30 = vld [vmem:[#allocation6 + $0x3f8] sm:$0xff]  ;;  %v1649_v31 = vld [vmem:[#allocation8 + $0x2e8] sm:$0xff] }
  0x8f   :  { %409 = vmatmul.mubr.f32.gmra.mrb[24].mxu1 %v4057_v47  ;;  %3267 = vmatprep.subr.bf16.mxu0 %v3266_v38  ;;  %v164_v38 = vld [vmem:[#allocation6 + $0x1f0] sm:$0xff] }
  0x90   :  { %414 = vmatprep.mubr.f32.mxu1 %v5476_v1 }
  0x91   :  { %869 = vmatmul.mubr.f32.gmra.mrb[6].mxu0 %v4021_v15 }
  0x92   :  { %874 = vmatprep.mubr.f32.mxu0 %v5476_v1  ;;  %3269 = vmatpush1.bf16.msra.mxu0 %v3268_v51  ;;  %v173_v51 = vld [vmem:[#allocation6 + $0x238] sm:$0xff] }
  0x93   :  { %415 = vmatmul.mubr.f32.gmra.mrb[26].mxu1 %v4061_v48  ;;  %3271 = vmatprep.subr.bf16.mxu0 %v3270_v63  ;;  %v3174_v55 = vpack.c.bf16 %v181_v53, %v173_v51  ;;  %v197_v63 = vld [vmem:[#allocation6 + $0x2f8] sm:$0xff]  ;;  %v3284_v51 = vpack.c.bf16 %v1650_v42, %v1648_v40  ;;  %v1653_v53 = vld [vmem:[#allocation8 + $0x308] sm:$0xff] }
  0x94   :  { %420 = vmatprep.mubr.f32.mxu1 %v5476_v1  ;;  %v3178_v9 = vpack.c.bf16 %v197_v63, %v189_v62  ;;  %v1656_v63 = vld [vmem:[#allocation8 + $0x320] sm:$0xff]  ;;  %v1683_v40 = vld [vmem:[#allocation8 + $0x3f8] sm:$0xff] }
  0x95   :  { %875 = vmatmul.mubr.f32.gmra.mrb[8].mxu0 %v4025_v22 }
  0x96   :  { %880 = vmatprep.mubr.f32.mxu0 %v5476_v1  ;;  %3273 = vmatpush1.bf16.msra.mxu0 %v3272_v16  ;;  %v205_v16 = vld [vmem:[#allocation6 + $0x338] sm:$0xff] }
  0x97   :  { %421 = vmatmul.mubr.f32.gmra.mrb[28].mxu1 %v4065_v49  ;;  %3275 = vmatprep.subr.bf16.mxu0 %v3274_v32  ;;  %v1651_v32 = vld [vmem:[#allocation8 + $0x2f8] sm:$0xff] }
  0x98   :  { %426 = vmatprep.mubr.f32.mxu1 %v5476_v1 }
  0x99   :  { %881 = vmatmul.mubr.f32.gmra.mrb[10].mxu0 %v4029_v29 }
  0x9a   :  { %886 = vmatprep.mubr.f32.mxu0 %v5476_v1  ;;  %3277 = vmatpush1.bf16.msra.mxu0 %v3276_v54  ;;  %v1655_v54 = vld [vmem:[#allocation8 + $0x318] sm:$0xff] }
  0x9b   :  { %427 = vmatmul.mubr.f32.gmra.mrb[30].mxu1 %v4069_v56 }
  0x9c   :  { %432 = vmatprep.mubr.f32.mxu1 %v5476_v1 }
  0x9d   :  { %887 = vmatmul.mubr.f32.gmra.mrb[12].mxu0 %v4033_v36 }
  0x9e   :  { %892 = vmatprep.mubr.f32.mxu0 %v5476_v1 }
  0x9f   :  { %433 = vmatmul.mubr.f32.gmra.mrb[32].mxu1 %v4073_v2 }
  0xa0   :  { %438 = vmatprep.mubr.f32.mxu1 %v5476_v1 }
  0xa1   :  { %893 = vmatmul.mubr.f32.gmra.mrb[14].mxu0 %v4037_v41 }
  0xa2   :  { %898 = vmatprep.mubr.f32.mxu0 %v5476_v1 }
  0xa3   :  { %439 = vmatmul.mubr.f32.gmra.mrb[34].mxu1 %v4077_v10 }
  0xa4   :  { %444 = vmatprep.mubr.f32.mxu1 %v5476_v1 }
  0xa5   :  { %899 = vmatmul.mubr.f32.gmra.mrb[16].mxu0 %v4041_v43 }
  0xa6   :  { %904 = vmatprep.mubr.f32.mxu0 %v5476_v1 }
  0xa7   :  { %445 = vmatmul.mubr.f32.gmra.mrb[36].mxu1 %v4081_v18 }
  0xa8   :  { %450 = vmatprep.mubr.f32.mxu1 %v5476_v1 }
  0xa9   :  { %905 = vmatmul.mubr.f32.gmra.mrb[18].mxu0 %v4045_v44 }
  0xaa   :  { %910 = vmatprep.mubr.f32.mxu0 %v5476_v1 }
  0xab   :  { %451 = vmatmul.mubr.f32.gmra.mrb[38].mxu1 %v4085_v26 }
  0xac   :  { %456 = vmatprep.mubr.f32.mxu1 %v5476_v1 }
  0xad   :  { %911 = vmatmul.mubr.f32.gmra.mrb[20].mxu0 %v4049_v45 }
  0xae   :  { %916 = vmatprep.mubr.f32.mxu0 %v5476_v1 }
  0xaf   :  { %457 = vmatmul.mubr.f32.gmra.mrb[40].mxu1 %v4089_v34 }
  0xb0   :  { %462 = vmatprep.mubr.f32.mxu1 %v5476_v1 }
  0xb1   :  { %917 = vmatmul.mubr.f32.gmra.mrb[22].mxu0 %v4053_v46 }
  0xb2   :  { %922 = vmatprep.mubr.f32.mxu0 %v5476_v1 }
  0xb3   :  { %463 = vmatmul.mubr.f32.gmra.mrb[42].mxu1 %v4093_v50 }
  0xb4   :  { %468 = vmatprep.mubr.f32.mxu1 %v5476_v1 }
  0xb5   :  { %923 = vmatmul.mubr.f32.gmra.mrb[24].mxu0 %v4057_v47 }
  0xb6   :  { %928 = vmatprep.mubr.f32.mxu0 %v5476_v1 }
  0xb7   :  { %469 = vmatmul.mubr.f32.gmra.mrb[44].mxu1 %v4097_v59 }
  0xb8   :  { %474 = vmatprep.mubr.f32.mxu1 %v5476_v1 }
  0xb9   :  { %929 = vmatmul.mubr.f32.gmra.mrb[26].mxu0 %v4061_v48 }
  0xba   :  { %934 = vmatprep.mubr.f32.mxu0 %v5476_v1 }
  0xbb   :  { %475 = vmatmul.mubr.f32.gmra.mrb[46].mxu1 %v4101_v60 }
  0xbc   :  { %480 = vmatprep.mubr.f32.mxu1 %v5476_v1 }
  0xbd   :  { %935 = vmatmul.mubr.f32.gmra.mrb[28].mxu0 %v4065_v49 }
  0xbe   :  { %940 = vmatprep.mubr.f32.mxu0 %v5476_v1 }
  0xbf   :  { %481 = vmatmul.mubr.f32.gmra.mrb[48].mxu1 %v4107_v3 }
  0xc0   :  { %486 = vmatprep.mubr.f32.mxu1 %v5476_v1 }
  0xc1   :  { %941 = vmatmul.mubr.f32.gmra.mrb[30].mxu0 %v4069_v56 }
  0xc2   :  { %946 = vmatprep.mubr.f32.mxu0 %v5476_v1 }
  0xc3   :  { %487 = vmatmul.mubr.f32.gmra.mrb[50].mxu1 %v4113_v12 }
  0xc4   :  { %492 = vmatprep.mubr.f32.mxu1 %v5476_v1 }
  0xc5   :  { %947 = vmatmul.mubr.f32.gmra.mrb[32].mxu0 %v4073_v2 }
  0xc6   :  { %952 = vmatprep.mubr.f32.mxu0 %v5476_v1 }
  0xc7   :  { %493 = vmatmul.mubr.f32.gmra.mrb[52].mxu1 %v4119_v17 }
  0xc8   :  { %498 = vmatprep.mubr.f32.mxu1 %v5476_v1 }
  0xc9   :  { %953 = vmatmul.mubr.f32.gmra.mrb[34].mxu0 %v4077_v10 }
  0xca   :  { %958 = vmatprep.mubr.f32.mxu0 %v5476_v1 }
  0xcb   :  { %499 = vmatmul.mubr.f32.gmra.mrb[54].mxu1 %v4125_v23 }
  0xcc   :  { %504 = vmatprep.mubr.f32.mxu1 %v5476_v1 }
  0xcd   :  { %959 = vmatmul.mubr.f32.gmra.mrb[36].mxu0 %v4081_v18 }
  0xce   :  { %964 = vmatprep.mubr.f32.mxu0 %v5476_v1 }
  0xcf   :  { %505 = vmatmul.mubr.f32.gmra.mrb[56].mxu1 %v4131_v28 }
  0xd0   :  { %510 = vmatprep.mubr.f32.mxu1 %v5476_v1 }
  0xd1   :  { %965 = vmatmul.mubr.f32.gmra.mrb[38].mxu0 %v4085_v26 }
  0xd2   :  { %970 = vmatprep.mubr.f32.mxu0 %v5476_v1 }
  0xd3   :  { %511 = vmatmul.mubr.f32.gmra.mrb[58].mxu1 %v4137_v33 }
  0xd4   :  { %516 = vmatprep.mubr.f32.mxu1 %v5476_v1 }
  0xd5   :  { %971 = vmatmul.mubr.f32.gmra.mrb[40].mxu0 %v4089_v34 }
  0xd6   :  { %976 = vmatprep.mubr.f32.mxu0 %v5476_v1 }
  0xd7   :  { %517 = vmatmul.mubr.f32.gmra.mrb[60].mxu1 %v4143_v39 }
  0xd8   :  { %522 = vmatprep.mubr.f32.mxu1 %v5476_v1 }
  0xd9   :  { %977 = vmatmul.mubr.f32.gmra.mrb[42].mxu0 %v4093_v50 }
  0xda   :  { %982 = vmatprep.mubr.f32.mxu0 %v5476_v1 }
  0xdb   :  { %523 = vmatmul.mubr.f32.gmra.mrb[62].mxu1 %v4149_v52 }
  0xdc   :  { %593 = vmatprep.mubr.f32.mxu1 %v5476_v1 }
  0xdd   :  { %983 = vmatmul.mubr.f32.gmra.mrb[44].mxu0 %v4097_v59 }
  0xde   :  { %988 = vmatprep.mubr.f32.mxu0 %v5476_v1 }
  0xdf   :  { %594 = vmatmul.mubr.f32.vlgmr.msra.gmra.mrb[64].mxu1 %v4009_v57  ;;  %v3168_v57 = vpack.c.bf16 %v148_v24, %v140_v21  ;;  %v204_v24 = vld [vmem:[#allocation6 + $0x330] sm:$0xff] }
  0xe0   :  { %599 = vmatprep.mubr.f32.mxu1 %v5476_v1  ;;  %3161 = vmatpush1.bf16.msra.mxu1 %v3160_v4  ;;  %v1645_v4 = vld [vmem:[#allocation8 + $0x2c8] sm:$0xff] }
  0xe1   :  { %3163 = vmatprep.subr.bf16.mxu1 %v3162_v6  ;;  %v3176_v6 = vpack.c.bf16 %v180_v61, %v172_v58  ;;  %v1659_v61 = vld [vmem:[#allocation8 + $0x338] sm:$0xff]  ;;  %989 = vmatmul.mubr.f32.gmra.mrb[46].mxu0 %v4101_v60 }
  0xe2   :  { %994 = vmatprep.mubr.f32.mxu0 %v5476_v1 }
  0xe3   :  { %600 = vmatmul.mubr.f32.gmra.mrb[66].mxu1 %v4013_v0  ;;  %v3172_v0 = vpack.c.bf16 %v164_v38, %v156_v35  ;;  %v220_v35 = vld [vmem:[#allocation6 + $0x3b0] sm:$0xff] }
  0xe4   :  { %605 = vmatprep.mubr.f32.mxu1 %v5476_v1  ;;  %3165 = vmatpush1.bf16.msra.mxu1 %v3164_v19  ;;  %v213_v19 = vld [vmem:[#allocation6 + $0x378] sm:$0xff]  ;;  %v228_v38 = vld [vmem:[#allocation6 + $0x3f0] sm:$0xff] }
  0xe5   :  { %3167 = vmatprep.subr.bf16.mxu1 %v3166_v20  ;;  %v3280_v20 = vpack.c.bf16 %v1646_v14, %v1644_v13  ;;  %v3182_v21 = vpack.c.bf16 %v213_v19, %v205_v16  ;;  %v1664_v13 = vld [vmem:[#allocation8 + $0x360] sm:$0xff]  ;;  %v1666_v14 = vld [vmem:[#allocation8 + $0x370] sm:$0xff]  ;;  %995 = vmatmul.mubr.f32.gmra.mrb[48].mxu0 %v4107_v3  ;;  %v1671_v16 = vld [vmem:[#allocation8 + $0x398] sm:$0xff] }
  0xe6   :  { %1000 = vmatprep.mubr.f32.mxu0 %v5476_v1 }
  0xe7   :  { %606 = vmatmul.mubr.f32.gmra.mrb[68].mxu1 %v4017_v8  ;;  %v3278_v8 = vpack.c.bf16 %v1647_v5, %v1645_v4  ;;  %v1658_v4 = vld [vmem:[#allocation8 + $0x330] sm:$0xff]  ;;  %v1663_v5 = vld [vmem:[#allocation8 + $0x358] sm:$0xff] }
  0xe8   :  { %611 = vmatprep.mubr.f32.mxu1 %v5476_v1  ;;  %3169 = vmatpush1.bf16.msra.mxu1 %v3168_v57  ;;  %v3184_v57 = vpack.c.bf16 %v212_v25, %v204_v24 }
  0xe9   :  { %3171 = vmatprep.subr.bf16.mxu1 %v3170_v37  ;;  %3279 = vmatprep.subr.bf16.mxu0 %v3278_v8  ;;  %v3186_v37 = vpack.c.bf16 %v229_v30, %v221_v27  ;;  %v1675_v27 = vld [vmem:[#allocation8 + $0x3b8] sm:$0xff] }
  0xea   :  { %3281 = vmatpush1.bf16.msra.mxu0 %v3280_v20  ;;  %v1557_v20 = vld [vmem:[#allocation8 + $0x8] sm:$0xff] }
  0xeb   :  { %612 = vmatmul.mubr.f32.gmra.mrb[70].mxu1 %v4021_v15  ;;  %v3180_v15 = vpack.c.bf16 %v196_v11, %v188_v7  ;;  %v1662_v7 = vld [vmem:[#allocation8 + $0x350] sm:$0xff]  ;;  %1001 = vmatmul.mubr.f32.gmra.mrb[50].mxu0 %v4113_v12 }
  0xec   :  { %617 = vmatprep.mubr.f32.mxu1 %v5476_v1  ;;  %3173 = vmatpush1.bf16.msra.mxu1 %v3172_v0  ;;  %v3286_v0 = vpack.c.bf16 %v1655_v54, %v1653_v53  ;;  %v1682_v53 = vld [vmem:[#allocation8 + $0x3f0] sm:$0xff] }
  0xed   :  { %3175 = vmatprep.subr.bf16.mxu1 %v3174_v55  ;;  %v1654_v55 = vld [vmem:[#allocation8 + $0x310] sm:$0xff]  ;;  %1006 = vmatprep.mubr.f32.mxu0 %v5476_v1 }
  0xef   :  { %618 = vmatmul.mubr.f32.gmra.mrb[72].mxu1 %v4025_v22  ;;  %v3282_v22 = vpack.c.bf16 %v1651_v32, %v1649_v31  ;;  %1007 = vmatmul.mubr.f32.gmra.mrb[52].mxu0 %v4119_v17  ;;  %v1672_v31 = vld [vmem:[#allocation8 + $0x3a0] sm:$0xff] }
  0xf0   :  { %623 = vmatprep.mubr.f32.mxu1 %v5476_v1  ;;  %3177 = vmatpush1.bf16.msra.mxu1 %v3176_v6  ;;  %v1660_v6 = vld [vmem:[#allocation8 + $0x340] sm:$0xff] }
  0xf1   :  { %3179 = vmatprep.subr.bf16.mxu1 %v3178_v9  ;;  %3283 = vmatprep.subr.bf16.mxu0 %v3282_v22  ;;  %v1667_v9 = vld [vmem:[#allocation8 + $0x378] sm:$0xff] }
  0xf2   :  { %3285 = vmatpush1.bf16.msra.mxu0 %v3284_v51  ;;  %1012 = vmatprep.mubr.f32.mxu0 %v5476_v1  ;;  %v1679_v22 = vld [vmem:[#allocation8 + $0x3d8] sm:$0xff] }
  0xf3   :  { %624 = vmatmul.mubr.f32.gmra.mrb[74].mxu1 %v4029_v29  ;;  %v3188_v29 = vpack.c.bf16 %v228_v38, %v220_v35  ;;  %3287 = vmatprep.subr.bf16.mxu0 %v3286_v0  ;;  %v1676_v35 = vld [vmem:[#allocation8 + $0x3c0] sm:$0xff] }
  0xf4   :  { %629 = vmatprep.mubr.f32.mxu1 %v5476_v1  ;;  %3181 = vmatpush1.bf16.msra.mxu1 %v3180_v15  ;;  %v1559_v15 = vld [vmem:[#allocation8 + $0x18] sm:$0xff] }
  0xf5   :  { %3183 = vmatprep.subr.bf16.mxu1 %v3182_v21  ;;  %v1670_v21 = vld [vmem:[#allocation8 + $0x390] sm:$0xff]  ;;  %v3190_v24 = vpack.c.bf16 %v1559_v15, %v1557_v20  ;;  %1013 = vmatmul.mubr.f32.gmra.mrb[54].mxu0 %v4125_v23  ;;  %v1564_v15 = vld [vmem:[#allocation8 + $0x40] sm:$0xff] }
  0xf6   :  { %1018 = vmatprep.mubr.f32.mxu0 %v5476_v1 }
  0xf7   :  { %630 = vmatmul.mubr.f32.gmra.mrb[76].mxu1 %v4033_v36  ;;  %v1652_v36 = vld [vmem:[#allocation8 + $0x300] sm:$0xff] }
  0xf8   :  { %635 = vmatprep.mubr.f32.mxu1 %v5476_v1  ;;  %3185 = vmatpush1.bf16.msra.mxu1 %v3184_v57  ;;  %v3288_v58 = vpack.c.bf16 %v1654_v55, %v1652_v36  ;;  %v1685_v36 = vld [vmem:[#allocation8 + $0x408] sm:$0xff]  ;;  %v1687_v55 = vld [vmem:[#allocation8 + $0x418] sm:$0xff] }
  0xf9   :  { %3187 = vmatprep.subr.bf16.mxu1 %v3186_v37  ;;  %1019 = vmatmul.mubr.f32.gmra.mrb[56].mxu0 %v4131_v28  ;;  %v1678_v37 = vld [vmem:[#allocation8 + $0x3d0] sm:$0xff] }
  0xfa   :  { %3289 = vmatpush1.bf16.msra.mxu0 %v3288_v58  ;;  %1024 = vmatprep.mubr.f32.mxu0 %v5476_v1 }
  0xfb   :  { %636 = vmatmul.mubr.f32.gmra.mrb[78].mxu1 %v4037_v41  ;;  %v1657_v41 = vld [vmem:[#allocation8 + $0x328] sm:$0xff] }
  0xfc   :  { %641 = vmatprep.mubr.f32.mxu1 %v5476_v1  ;;  %3189 = vmatpush1.bf16.msra.mxu1 %v3188_v29  ;;  %v3290_v62 = vpack.c.bf16 %v1659_v61, %v1657_v41  ;;  %v1680_v29 = vld [vmem:[#allocation8 + $0x3e0] sm:$0xff]  ;;  %v3318_v41 = vpack.c.bf16 %v1687_v55, %v1685_v36  ;;  %v3791_v55 = vld [vmem:[#allocation3 + $0x18] sm:$0xff] }
  0xfd   :  { %3191 = vmatprep.subr.bf16.mxu1 %v3190_v24  ;;  %1025 = vmatmul.mubr.f32.gmra.mrb[58].mxu0 %v4137_v33  ;;  %v1569_v24 = vld [vmem:[#allocation8 + $0x68] sm:$0xff] }
  0xfe   :  { %3291 = vmatprep.subr.bf16.mxu0 %v3290_v62  ;;  %1030 = vmatprep.mubr.f32.mxu0 %v5476_v1 }
  0xff   :  { %642 = vmatmul.mubr.f32.gmra.mrb[80].mxu1 %v4041_v43  ;;  %v3292_v43 = vpack.c.bf16 %v1658_v4, %v1656_v63 }
 0x100   :  { %647 = vmatprep.mubr.f32.mxu1 %v5476_v1 }
 0x101   :  { %3293 = vmatpush1.bf16.msra.mxu0 %v3292_v43 }
 0x102   :  { %1031 = vmatmul.mubr.f32.gmra.mrb[60].mxu0 %v4143_v39 }
 0x103   :  { %648 = vmatmul.mubr.f32.gmra.mrb[82].mxu1 %v4045_v44  ;;  %v1661_v44 = vld [vmem:[#allocation8 + $0x348] sm:$0xff]  ;;  %1036 = vmatprep.mubr.f32.mxu0 %v5476_v1 }
 0x104   :  { %653 = vmatprep.mubr.f32.mxu1 %v5476_v1  ;;  %v3294_v8 = vpack.c.bf16 %v1663_v5, %v1661_v44 }
 0x106   :  { %3295 = vmatprep.subr.bf16.mxu0 %v3294_v8  ;;  %1037 = vmatmul.mubr.f32.gmra.mrb[62].mxu0 %v4149_v52 }
 0x107   :  { %654 = vmatmul.mubr.f32.gmra.mrb[84].mxu1 %v4049_v45  ;;  %v3296_v45 = vpack.c.bf16 %v1662_v7, %v1660_v6  ;;  %v1556_v6 = vld [vmem:[#allocation8] sm:$0xff] }
 0x108   :  { %659 = vmatprep.mubr.f32.mxu1 %v5476_v1 }
 0x109   :  { %3297 = vmatpush1.bf16.msra.mxu0 %v3296_v45  ;;  %v1561_v45 = vld [vmem:[#allocation8 + $0x28] sm:$0xff] }
 0x10b   :  { %660 = vmatmul.mubr.f32.gmra.mrb[86].mxu1 %v4053_v46  ;;  %v1665_v46 = vld [vmem:[#allocation8 + $0x368] sm:$0xff] }
 0x10c   :  { %665 = vmatprep.mubr.f32.mxu1 %v5476_v1  ;;  %v3298_v11 = vpack.c.bf16 %v1667_v9, %v1665_v46  ;;  %v1563_v46 = vld [vmem:[#allocation8 + $0x38] sm:$0xff] }
 0x10e   :  { %3299 = vmatprep.subr.bf16.mxu0 %v3298_v11  ;;  %v3194_v11 = vpack.c.bf16 %v1563_v46, %v1561_v45  ;;  %v1578_v45 = vld [vmem:[#allocation8 + $0xb0] sm:$0xff] }
 0x10f   :  { %666 = vmatmul.mubr.f32.gmra.mrb[88].mxu1 %v4057_v47  ;;  %v3300_v47 = vpack.c.bf16 %v1666_v14, %v1664_v13  ;;  %v1560_v13 = vld [vmem:[#allocation8 + $0x20] sm:$0xff]  ;;  %v1562_v14 = vld [vmem:[#allocation8 + $0x30] sm:$0xff] }
 0x110   :  { %671 = vmatprep.mubr.f32.mxu1 %v5476_v1  ;;  %v3196_v20 = vpack.c.bf16 %v1562_v14, %v1560_v13  ;;  %v3792_v14 = vld [vmem:[#allocation3 + $0x20] sm:$0xff] }
 0x111   :  { %3301 = vmatpush1.bf16.msra.mxu0 %v3300_v47 }
 0x113   :  { %672 = vmatmul.mubr.f32.gmra.mrb[90].mxu1 %v4061_v48  ;;  %v1669_v48 = vld [vmem:[#allocation8 + $0x388] sm:$0xff] }
 0x114   :  { %677 = vmatprep.mubr.f32.mxu1 %v5476_v1  ;;  %v3302_v19 = vpack.c.bf16 %v1671_v16, %v1669_v48  ;;  %v1567_v48 = vld [vmem:[#allocation8 + $0x58] sm:$0xff] }
 0x116   :  { %3303 = vmatprep.subr.bf16.mxu0 %v3302_v19  ;;  %v3788_v19 = vld [vmem:[#allocation3] sm:$0xff] }
 0x117   :  { %678 = vmatmul.mubr.f32.gmra.mrb[92].mxu1 %v4065_v49  ;;  %v1668_v49 = vld [vmem:[#allocation8 + $0x380] sm:$0xff] }
 0x118   :  { %683 = vmatprep.mubr.f32.mxu1 %v5476_v1  ;;  %v3304_v25 = vpack.c.bf16 %v1670_v21, %v1668_v49  ;;  %v1566_v49 = vld [vmem:[#allocation8 + $0x50] sm:$0xff] }
 0x11a   :  { %3305 = vmatpush1.bf16.msra.mxu0 %v3304_v25  ;;  %v1571_v25 = vld [vmem:[#allocation8 + $0x78] sm:$0xff] }
 0x11b   :  { %684 = vmatmul.mubr.f32.gmra.mrb[94].mxu1 %v4069_v56  ;;  %v1673_v56 = vld [vmem:[#allocation8 + $0x3a8] sm:$0xff] }
 0x11c   :  { %689 = vmatprep.mubr.f32.mxu1 %v5476_v1  ;;  %v3306_v30 = vpack.c.bf16 %v1675_v27, %v1673_v56  ;;  %v3789_v27 = vld [vmem:[#allocation3 + $0x8] sm:$0xff] }
 0x11e   :  { %3307 = vmatprep.subr.bf16.mxu0 %v3306_v30  ;;  %v3200_v30 = vpack.c.bf16 %v1566_v49, %v1564_v15  ;;  %v1585_v15 = vld [vmem:[#allocation8 + $0xe8] sm:$0xff]  ;;  %v1587_v49 = vld [vmem:[#allocation8 + $0xf8] sm:$0xff] }
 0x11f   :  { %690 = vmatmul.mubr.f32.gmra.mrb[96].mxu1 %v4073_v2  ;;  %v1674_v2 = vld [vmem:[#allocation8 + $0x3b0] sm:$0xff] }
 0x120   :  { %695 = vmatprep.mubr.f32.mxu1 %v5476_v1  ;;  %v3308_v32 = vpack.c.bf16 %v1674_v2, %v1672_v31  ;;  %v3202_v31 = vpack.c.bf16 %v1571_v25, %v1569_v24  ;;  %v1568_v2 = vld [vmem:[#allocation8 + $0x60] sm:$0xff]  ;;  %v3793_v25 = vld [vmem:[#allocation3 + $0x28] sm:$0xff] }
 0x122   :  { %3309 = vmatpush1.bf16.msra.mxu0 %v3308_v32  ;;  %v1570_v32 = vld [vmem:[#allocation8 + $0x70] sm:$0xff] }
 0x123   :  { %696 = vmatmul.mubr.f32.gmra.mrb[98].mxu1 %v4077_v10  ;;  %v1677_v10 = vld [vmem:[#allocation8 + $0x3c8] sm:$0xff] }
 0x124   :  { %701 = vmatprep.mubr.f32.mxu1 %v5476_v1  ;;  %v3310_v57 = vpack.c.bf16 %v1679_v22, %v1677_v10  ;;  %v1573_v22 = vld [vmem:[#allocation8 + $0x88] sm:$0xff] }
 0x126   :  { %3311 = vmatprep.subr.bf16.mxu0 %v3310_v57  ;;  %v1575_v57 = vld [vmem:[#allocation8 + $0x98] sm:$0xff] }
 0x127   :  { %702 = vmatmul.mubr.f32.gmra.mrb[100].mxu1 %v4081_v18  ;;  %v3312_v18 = vpack.c.bf16 %v1678_v37, %v1676_v35  ;;  %v3790_v37 = vld [vmem:[#allocation3 + $0x10] sm:$0xff] }
 0x128   :  { %707 = vmatprep.mubr.f32.mxu1 %v5476_v1 }
 0x129   :  { %3313 = vmatpush1.bf16.msra.mxu0 %v3312_v18  ;;  %v3204_v18 = vpack.c.bf16 %v1570_v32, %v1568_v2  ;;  %v1586_v2 = vld [vmem:[#allocation8 + $0xf0] sm:$0xff] }
 0x12b   :  { %708 = vmatmul.mubr.f32.gmra.mrb[102].mxu1 %v4085_v26  ;;  %v1681_v26 = vld [vmem:[#allocation8 + $0x3e8] sm:$0xff] }
 0x12c   :  { %713 = vmatprep.mubr.f32.mxu1 %v5476_v1  ;;  %v3314_v51 = vpack.c.bf16 %v1683_v40, %v1681_v26  ;;  %v3206_v26 = vpack.c.bf16 %v1575_v57, %v1573_v22  ;;  %v1572_v40 = vld [vmem:[#allocation8 + $0x80] sm:$0xff]  ;;  %v1589_v22 = vld [vmem:[#allocation8 + $0x108] sm:$0xff]  ;;  %v1591_v57 = vld [vmem:[#allocation8 + $0x118] sm:$0xff] }
 0x12e   :  { %3315 = vmatprep.subr.bf16.mxu0 %v3314_v51  ;;  %v1574_v51 = vld [vmem:[#allocation8 + $0x90] sm:$0xff] }
 0x12f   :  { %714 = vmatmul.mubr.f32.gmra.mrb[104].mxu1 %v4089_v34  ;;  %v3316_v34 = vpack.c.bf16 %v1682_v53, %v1680_v29  ;;  %v1577_v53 = vld [vmem:[#allocation8 + $0xa8] sm:$0xff] }
 0x130   :  { %719 = vmatprep.mubr.f32.mxu1 %v5476_v1 }
 0x131   :  { %3317 = vmatpush1.bf16.msra.mxu0 %v3316_v34  ;;  %v1579_v34 = vld [vmem:[#allocation8 + $0xb8] sm:$0xff] }
 0x132   :  { %v4239_v38 = vpop.f32.mrb[0].mxu1  ;;  %3319 = vmatprep.subr.bf16.mxu0 %v3318_v41  ;;  %v3208_v41 = vpack.c.bf16 %v1574_v51, %v1572_v40  ;;  %v3222_v40 = vpack.c.bf16 %v1591_v57, %v1589_v22  ;;  %v1588_v51 = vld [vmem:[#allocation8 + $0x100] sm:$0xff]  ;;  %v1603_v22 = vld [vmem:[#allocation8 + $0x178] sm:$0xff] }
 0x133   :  { %v4242_v42 = vpop.f32.mrb[1].mxu1  ;;  %720 = vmatmul.mubr.f32.gmra.mrb[106].mxu1 %v4093_v50 }
 0x134   :  { %725 = vmatprep.mubr.f32.mxu1 %v5476_v1 }
 0x136   :  { %v4247_v54 = vpop.f32.mrb[2].mxu1 }
 0x137   :  { %v4249_v0 = vpop.f32.mrb[3].mxu1  ;;  %726 = vmatmul.mubr.f32.gmra.mrb[108].mxu1 %v4097_v59 }
 0x138   :  { %731 = vmatprep.mubr.f32.mxu1 %v5476_v1 }
 0x13a   :  { %v4254_v50 = vpop.f32.mrb[4].mxu1 }
 0x13b   :  { %v4256_v58 = vpop.f32.mrb[5].mxu1  ;;  %732 = vmatmul.mubr.f32.gmra.mrb[110].mxu1 %v4101_v60 }
 0x13c   :  { %737 = vmatprep.mubr.f32.mxu1 %v5476_v1 }
 0x13e   :  { %v4260_v61 = vpop.f32.mrb[6].mxu1 }
 0x13f   :  { %v4262_v62 = vpop.f32.mrb[7].mxu1  ;;  %738 = vmatmul.mubr.f32.gmra.mrb[112].mxu1 %v4107_v3 }
 0x140   :  { %743 = vmatprep.mubr.f32.mxu1 %v5476_v1 }
 0x142   :  { %v4266_v59 = vpop.f32.mrb[8].mxu1 }
 0x143   :  { %v4268_v63 = vpop.f32.mrb[9].mxu1  ;;  %744 = vmatmul.mubr.f32.gmra.mrb[114].mxu1 %v4113_v12 }
 0x144   :  { %749 = vmatprep.mubr.f32.mxu1 %v5476_v1 }
 0x146   :  { %v4272_v60 = vpop.f32.mrb[10].mxu1 }
 0x147   :  { %v4274_v4 = vpop.f32.mrb[11].mxu1  ;;  %750 = vmatmul.mubr.f32.gmra.mrb[116].mxu1 %v4119_v17 }
 0x148   :  { %755 = vmatprep.mubr.f32.mxu1 %v5476_v1 }
 0x14a   :  { %v4278_v43 = vpop.f32.mrb[12].mxu1 }
 0x14b   :  { %v4280_v3 = vpop.f32.mrb[13].mxu1  ;;  %756 = vmatmul.mubr.f32.gmra.mrb[118].mxu1 %v4125_v23 }
 0x14c   :  { %761 = vmatprep.mubr.f32.mxu1 %v5476_v1 }
 0x14e   :  { %v4284_v44 = vpop.f32.mrb[14].mxu1 }
 0x14f   :  { %v4286_v12 = vpop.f32.mrb[15].mxu1  ;;  %762 = vmatmul.mubr.f32.gmra.mrb[120].mxu1 %v4131_v28  ;;  %v1558_v28 = vld [vmem:[#allocation8 + $0x10] sm:$0xff] }
 0x150   :  { %767 = vmatprep.mubr.f32.mxu1 %v5476_v1 }
 0x152   :  { %v4290_v5 = vpop.f32.mrb[16].mxu1 }
 0x153   :  { %v4292_v17 = vpop.f32.mrb[17].mxu1  ;;  %768 = vmatmul.mubr.f32.gmra.mrb[122].mxu1 %v4137_v33  ;;  %v3192_v33 = vpack.c.bf16 %v1558_v28, %v1556_v6  ;;  %v3210_v6 = vpack.c.bf16 %v1579_v34, %v1577_v53  ;;  %v1576_v28 = vld [vmem:[#allocation8 + $0xa0] sm:$0xff]  ;;  %v1590_v53 = vld [vmem:[#allocation8 + $0x110] sm:$0xff] }
 0x154   :  { %773 = vmatprep.mubr.f32.mxu1 %v5476_v1 }
 0x156   :  { %v4296_v8 = vpop.f32.mrb[18].mxu1 }
 0x157   :  { %v4298_v23 = vpop.f32.mrb[19].mxu1  ;;  %774 = vmatmul.mubr.f32.gmra.mrb[124].mxu1 %v4143_v39  ;;  %v1565_v39 = vld [vmem:[#allocation8 + $0x48] sm:$0xff] }
 0x158   :  { %779 = vmatprep.mubr.f32.mxu1 %v5476_v1 }
 0x15a   :  { %v4302_v7 = vpop.f32.mrb[20].mxu1 }
 0x15b   :  { %v4304_v9 = vpop.f32.mrb[21].mxu1  ;;  %780 = vmatmul.mubr.f32.gmra.mrb[126].mxu1 %v4149_v52  ;;  %v3198_v52 = vpack.c.bf16 %v1567_v48, %v1565_v39  ;;  %v3212_v39 = vpack.c.bf16 %v1578_v45, %v1576_v28  ;;  %v3795_v28 = vld [vmem:[#allocation3 + $0x38] sm:$0xff]  ;;  %v3224_v45 = vpack.c.bf16 %v1590_v53, %v1588_v51  ;;  %v1600_v51 = vld [vmem:[#allocation8 + $0x160] sm:$0xff]  ;;  %v1602_v53 = vld [vmem:[#allocation8 + $0x170] sm:$0xff] }
 0x15c   :  { %1107 = vmatprep.mubr.f32.mxu1 %v5476_v1 }
 0x15e   :  { %v4308_v47 = vpop.f32.mrb[22].mxu1 }
 0x15f   :  { %v4310_v16 = vpop.f32.mrb[23].mxu1  ;;  %1108 = vmatmul.mubr.f32.vlgmr.msra.gmra.mrb[128].mxu1 %v3788_v19  ;;  %v1580_v19 = vld [vmem:[#allocation8 + $0xc0] sm:$0xff] }
 0x160   :  { %1113 = vmatprep.mubr.f32.mxu1 %v5476_v1  ;;  %3193 = vmatpush1.bf16.msra.mxu1 %v3192_v33  ;;  %v1581_v33 = vld [vmem:[#allocation8 + $0xc8] sm:$0xff] }
 0x161   :  { %3195 = vmatprep.subr.bf16.mxu1 %v3194_v11  ;;  %v1583_v11 = vld [vmem:[#allocation8 + $0xd8] sm:$0xff] }
 0x162   :  { %v4313_v21 = vpop.f32.mrb[24].mxu1  ;;  %v3214_v48 = vpack.c.bf16 %v1583_v11, %v1581_v33  ;;  %v1592_v11 = vld [vmem:[#allocation8 + $0x120] sm:$0xff] }
 0x163   :  { %v4315_v56 = vpop.f32.mrb[25].mxu1  ;;  %1114 = vmatmul.mubr.f32.gmra.mrb[130].mxu1 %v3789_v27 }
 0x164   :  { %1119 = vmatprep.mubr.f32.mxu1 %v5476_v1  ;;  %3197 = vmatpush1.bf16.msra.mxu1 %v3196_v20  ;;  %v1582_v20 = vld [vmem:[#allocation8 + $0xd0] sm:$0xff] }
 0x165   :  { %3199 = vmatprep.subr.bf16.mxu1 %v3198_v52  ;;  %v3216_v27 = vpack.c.bf16 %v1582_v20, %v1580_v19  ;;  %v1599_v19 = vld [vmem:[#allocation8 + $0x158] sm:$0xff] }
 0x166   :  { %v4318_v10 = vpop.f32.mrb[26].mxu1 }
 0x167   :  { %v4320_v35 = vpop.f32.mrb[27].mxu1  ;;  %1120 = vmatmul.mubr.f32.gmra.mrb[132].mxu1 %v3790_v37 }
 0x168   :  { %1125 = vmatprep.mubr.f32.mxu1 %v5476_v1  ;;  %3201 = vmatpush1.bf16.msra.mxu1 %v3200_v30  ;;  %v3218_v30 = vpack.c.bf16 %v1587_v49, %v1585_v15  ;;  %v3796_v15 = vld [vmem:[#allocation3 + $0x40] sm:$0xff] }
 0x169   :  { %3203 = vmatprep.subr.bf16.mxu1 %v3202_v31  ;;  %v1584_v31 = vld [vmem:[#allocation8 + $0xe0] sm:$0xff] }
 0x16a   :  { %v4323_v29 = vpop.f32.mrb[28].mxu1 }
 0x16b   :  { %v4325_v36 = vpop.f32.mrb[29].mxu1  ;;  %1126 = vmatmul.mubr.f32.gmra.mrb[134].mxu1 %v3791_v55  ;;  %v1593_v55 = vld [vmem:[#allocation8 + $0x128] sm:$0xff] }
 0x16c   :  { %1131 = vmatprep.mubr.f32.mxu1 %v5476_v1  ;;  %3205 = vmatpush1.bf16.msra.mxu1 %v3204_v18  ;;  %v3794_v18 = vld [vmem:[#allocation3 + $0x30] sm:$0xff] }
 0x16d   :  { %3207 = vmatprep.subr.bf16.mxu1 %v3206_v26  ;;  %v3220_v26 = vpack.c.bf16 %v1586_v2, %v1584_v31  ;;  %v1601_v2 = vld [vmem:[#allocation8 + $0x168] sm:$0xff] }
 0x16e   :  { %v4328_v46 = vpop.f32.mrb[30].mxu1 }
 0x16f   :  { %v4330_v13 = vpop.f32.mrb[31].mxu1  ;;  %1132 = vmatmul.mubr.f32.gmra.mrb[136].mxu1 %v3792_v14  ;;  %v1594_v14 = vld [vmem:[#allocation8 + $0x130] sm:$0xff] }
 0x170   :  { %1137 = vmatprep.mubr.f32.mxu1 %v5476_v1  ;;  %3209 = vmatpush1.bf16.msra.mxu1 %v3208_v41  ;;  %v1595_v41 = vld [vmem:[#allocation8 + $0x138] sm:$0xff]  ;;  %v3228_v49 = vpack.c.bf16 %v1594_v14, %v1592_v11  ;;  %v3236_v11 = vpack.c.bf16 %v1602_v53, %v1600_v51  ;;  %v1610_v51 = vld [vmem:[#allocation8 + $0x1b0] sm:$0xff] }
 0x171   :  { %3211 = vmatprep.subr.bf16.mxu1 %v3210_v6  ;;  %v3226_v33 = vpack.c.bf16 %v1595_v41, %v1593_v55  ;;  %v1605_v41 = vld [vmem:[#allocation8 + $0x188] sm:$0xff] }
 0x172   :  { %v4333_v52 = vpop.f32.mrb[32].mxu1 }
 0x173   :  { %v4335_v24 = vpop.f32.mrb[33].mxu1  ;;  %1138 = vmatmul.mubr.f32.gmra.mrb[138].mxu1 %v3793_v25 }
 0x174   :  { %1143 = vmatprep.mubr.f32.mxu1 %v5476_v1  ;;  %3213 = vmatpush1.bf16.msra.mxu1 %v3212_v39 }
 0x175   :  { %3215 = vmatprep.subr.bf16.mxu1 %v3214_v48  ;;  %v1597_v48 = vld [vmem:[#allocation8 + $0x148] sm:$0xff] }
 0x176   :  { %v4338_v32 = vpop.f32.mrb[34].mxu1  ;;  %v3230_v25 = vpack.c.bf16 %v1599_v19, %v1597_v48  ;;  %v1604_v48 = vld [vmem:[#allocation8 + $0x180] sm:$0xff]  ;;  %v1606_v19 = vld [vmem:[#allocation8 + $0x190] sm:$0xff] }
 0x177   :  { %v4340_v37 = vpop.f32.mrb[35].mxu1  ;;  %1144 = vmatmul.mubr.f32.gmra.mrb[140].mxu1 %v3794_v18  ;;  %v3797_v18 = vld [vmem:[#allocation3 + $0x48] sm:$0xff] }
 0x178   :  { %1149 = vmatprep.mubr.f32.mxu1 %v5476_v1  ;;  %3217 = vmatpush1.bf16.msra.mxu1 %v3216_v27  ;;  %v1596_v27 = vld [vmem:[#allocation8 + $0x140] sm:$0xff] }
 0x179   :  { %3219 = vmatprep.subr.bf16.mxu1 %v3218_v30  ;;  %v1598_v30 = vld [vmem:[#allocation8 + $0x150] sm:$0xff] }
 0x17a   :  { %v4343_v34 = vpop.f32.mrb[36].mxu1 }
 0x17b   :  { %5486 = vst [vmem:[#allocation13_spill] sm:$0xff] %v4343_v34  ;;  %v4345_v6 = vpop.f32.mrb[37].mxu1  ;;  %1150 = vmatmul.mubr.f32.gmra.mrb[142].mxu1 %v3795_v28  ;;  %v1607_v28 = vld [vmem:[#allocation8 + $0x198] sm:$0xff] }
 0x17c   :  { %1155 = vmatprep.mubr.f32.mxu1 %v5476_v1  ;;  %3221 = vmatpush1.bf16.msra.mxu1 %v3220_v26  ;;  %v3232_v26 = vpack.c.bf16 %v1598_v30, %v1596_v27  ;;  %v3238_v14 = vpack.c.bf16 %v1607_v28, %v1605_v41  ;;  %v3799_v30 = vld [vmem:[#allocation3 + $0x58] sm:$0xff]  ;;  %v1613_v41 = vld [vmem:[#allocation8 + $0x1c8] sm:$0xff] }
 0x17d   :  { %3223 = vmatprep.subr.bf16.mxu1 %v3222_v40  ;;  %v3234_v40 = vpack.c.bf16 %v1603_v22, %v1601_v2  ;;  %v4367_v2 = vpop.f32.mrb[0].mxu0  ;;  %v3240_v22 = vpack.c.bf16 %v1606_v19, %v1604_v48  ;;  %v1615_v28 = vld [vmem:[#allocation8 + $0x1d8] sm:$0xff]  ;;  %v1612_v19 = vld [vmem:[#allocation8 + $0x1c0] sm:$0xff] }
 0x17e   :  { %v4348_v39 = vpop.f32.mrb[38].mxu1  ;;  %5495 = vst [vmem:[#allocation22_spill] sm:$0xff] %v4367_v2  ;;  %v1619_v2 = vld [vmem:[#allocation8 + $0x1f8] sm:$0xff] }
 0x17f   :  { %5487 = vst [vmem:[#allocation14_spill] sm:$0xff] %v4348_v39  ;;  %v4350_v20 = vpop.f32.mrb[39].mxu1  ;;  %1156 = vmatmul.mubr.f32.gmra.mrb[144].mxu1 %v3796_v15  ;;  %v3811_v39 = vld [vmem:[#allocation3 + $0xb8] sm:$0xff] }
 0x180   :  { %5488 = vst [vmem:[#allocation15_spill] sm:$0xff] %v4350_v20  ;;  %1161 = vmatprep.mubr.f32.mxu1 %v5476_v1  ;;  %3225 = vmatpush1.bf16.msra.mxu1 %v3224_v45  ;;  %v1694_v20 = vld [vmem:[#allocation8 + $0x450] sm:$0xff] }
 0x181   :  { %3227 = vmatprep.subr.bf16.mxu1 %v3226_v33  ;;  %v3798_v33 = vld [vmem:[#allocation3 + $0x50] sm:$0xff] }
 0x182   :  { %v4353_v31 = vpop.f32.mrb[40].mxu1 }
 0x183   :  { %5489 = vst [vmem:[#allocation16_spill] sm:$0xff] %v4353_v31  ;;  %v4355_v57 = vpop.f32.mrb[41].mxu1  ;;  %1162 = vmatmul.mubr.f32.gmra.mrb[146].mxu1 %v3797_v18  ;;  %v4370_v18 = vpop.f32.mrb[1].mxu0  ;;  %v1688_v31 = vld [vmem:[#allocation8 + $0x420] sm:$0xff] }
 0x184   :  { %5490 = vst [vmem:[#allocation17_spill] sm:$0xff] %v4355_v57  ;;  %1167 = vmatprep.mubr.f32.mxu1 %v5476_v1  ;;  %3229 = vmatpush1.bf16.msra.mxu1 %v3228_v49  ;;  %v1609_v49 = vld [vmem:[#allocation8 + $0x1a8] sm:$0xff]  ;;  %5496 = vst [vmem:[#allocation23_spill] sm:$0xff] %v4370_v18  ;;  %v5536_v57 = vmov 0.0  }
 0x185   :  { %3231 = vmatprep.subr.bf16.mxu1 %v3230_v25  ;;  %v1611_v25 = vld [vmem:[#allocation8 + $0x1b8] sm:$0xff] }
 0x186   :  { %v4358_v55 = vpop.f32.mrb[42].mxu1 }
 0x187   :  { %5491 = vst [vmem:[#allocation18_spill] sm:$0xff] %v4358_v55  ;;  %v4360_v45 = vpop.f32.mrb[43].mxu1  ;;  %1168 = vmatmul.mubr.f32.gmra.mrb[148].mxu1 %v3798_v33 }
 0x188   :  { %5492 = vst [vmem:[#allocation19_spill] sm:$0xff] %v4360_v45  ;;  %1173 = vmatprep.mubr.f32.mxu1 %v5476_v1  ;;  %3233 = vmatpush1.bf16.msra.mxu1 %v3232_v26  ;;  %v3242_v26 = vpack.c.bf16 %v1611_v25, %v1609_v49  ;;  %v1614_v49 = vld [vmem:[#allocation8 + $0x1d0] sm:$0xff] }
 0x189   :  { %3235 = vmatprep.subr.bf16.mxu1 %v3234_v40  ;;  %v1608_v40 = vld [vmem:[#allocation8 + $0x1a0] sm:$0xff] }
 0x18a   :  { %v4363_v15 = vpop.f32.mrb[44].mxu1 }
 0x18b   :  { %5493 = vst [vmem:[#allocation20_spill] sm:$0xff] %v4363_v15  ;;  %v4365_v27 = vpop.f32.mrb[45].mxu1  ;;  %1174 = vmatmul.mubr.f32.gmra.mrb[150].mxu1 %v3799_v30  ;;  %v3800_v15 = vld [vmem:[#allocation3 + $0x60] sm:$0xff]  ;;  %v4376_v30 = vpop.f32.mrb[2].mxu0 }
 0x18c   :  { %5494 = vst [vmem:[#allocation21_spill] sm:$0xff] %v4365_v27  ;;  %1179 = vmatprep.mubr.f32.mxu1 %v5476_v1  ;;  %3237 = vmatpush1.bf16.msra.mxu1 %v3236_v11  ;;  %5499 = vst [vmem:[#allocation26_spill] sm:$0xff] %v4376_v30  ;;  %v3244_v11 = vpack.c.bf16 %v1610_v51, %v1608_v40  ;;  %v4379_v48 = vpop.f32.mrb[3].mxu0  ;;  %v1618_v51 = vld [vmem:[#allocation8 + $0x1f0] sm:$0xff] }
 0x18d   :  { %3239 = vmatprep.subr.bf16.mxu1 %v3238_v14  ;;  %5500 = vst [vmem:[#allocation27_spill] sm:$0xff] %v4379_v48  ;;  %v3246_v14 = vpack.c.bf16 %v1615_v28, %v1613_v41  ;;  %v3802_v30 = vld [vmem:[#allocation3 + $0x70] sm:$0xff] }
 0x18e   :  { %v4372_v53 = vpop.f32.mrb[46].mxu1 }
 0x18f   :  { %5497 = vst [vmem:[#allocation24_spill] sm:$0xff] %v4372_v53  ;;  %v4374_v33 = vpop.f32.mrb[47].mxu1  ;;  %1180 = vmatmul.mubr.f32.gmra.mrb[152].mxu1 %v3800_v15  ;;  %v1617_v53 = vld [vmem:[#allocation8 + $0x1e8] sm:$0xff]  ;;  %v3248_v15 = vpack.c.bf16 %v1614_v49, %v1612_v19 }
 0x190   :  { %5498 = vst [vmem:[#allocation25_spill] sm:$0xff] %v4374_v33  ;;  %1185 = vmatprep.mubr.f32.mxu1 %v5476_v1  ;;  %3241 = vmatpush1.bf16.msra.mxu1 %v3240_v22  ;;  %v3801_v33 = vld [vmem:[#allocation3 + $0x68] sm:$0xff]  ;;  %v4386_v22 = vpop.f32.mrb[4].mxu0  ;;  %v3250_v40 = vpack.c.bf16 %v1619_v2, %v1617_v53 }
 0x191   :  { %3243 = vmatprep.subr.bf16.mxu1 %v3242_v26  ;;  %5503 = vst [vmem:[#allocation30_spill] sm:$0xff] %v4386_v22  ;;  %v1616_v26 = vld [vmem:[#allocation8 + $0x1e0] sm:$0xff]  ;;  %v4388_v41 = vpop.f32.mrb[5].mxu0  ;;  %v3809_v22 = vld [vmem:[#allocation3 + $0xa8] sm:$0xff] }
 0x192   :  { %v4381_v25 = vpop.f32.mrb[48].mxu1  ;;  %5504 = vst [vmem:[#allocation31_spill] sm:$0xff] %v4388_v41  ;;  %v1691_v41 = vld [vmem:[#allocation8 + $0x438] sm:$0xff] }
 0x193   :  { %5501 = vst [vmem:[#allocation28_spill] sm:$0xff] %v4381_v25  ;;  %v4383_v18 = vpop.f32.mrb[49].mxu1  ;;  %1186 = vmatmul.mubr.f32.gmra.mrb[154].mxu1 %v3801_v33  ;;  %v3252_v33 = vpack.c.bf16 %v1618_v51, %v1616_v26 }
 0x194   :  { %5502 = vst [vmem:[#allocation29_spill] sm:$0xff] %v4383_v18  ;;  %1191 = vmatprep.mubr.f32.mxu1 %v5476_v1  ;;  %3245 = vmatpush1.bf16.msra.mxu1 %v3244_v11  ;;  %v4395_v11 = vpop.f32.mrb[6].mxu0 }
 0x195   :  { %3247 = vmatprep.subr.bf16.mxu1 %v3246_v14  ;;  %5507 = vst [vmem:[#allocation34_spill] sm:$0xff] %v4395_v11  ;;  %v4397_v19 = vpop.f32.mrb[7].mxu0  ;;  %v3803_v14 = vld [vmem:[#allocation3 + $0x78] sm:$0xff] }
 0x196   :  { %v4390_v28 = vpop.f32.mrb[50].mxu1  ;;  %5508 = vst [vmem:[#allocation35_spill] sm:$0xff] %v4397_v19  ;;  %v4404_v49 = vpop.f32.mrb[8].mxu0 }
 0x197   :  { %5505 = vst [vmem:[#allocation32_spill] sm:$0xff] %v4390_v28  ;;  %v4392_v25 = vpop.f32.mrb[51].mxu1  ;;  %1192 = vmatmul.mubr.f32.gmra.mrb[156].mxu1 %v3802_v30  ;;  %5511 = vst [vmem:[#allocation38_spill] sm:$0xff] %v4404_v49  ;;  %v4406_v30 = vpop.f32.mrb[9].mxu0 }
 0x198   :  { %5506 = vst [vmem:[#allocation33_spill] sm:$0xff] %v4392_v25  ;;  %1197 = vmatprep.mubr.f32.mxu1 %v5476_v1  ;;  %3249 = vmatpush1.bf16.msra.mxu1 %v3248_v15  ;;  %5512 = vst [vmem:[#allocation39_spill] sm:$0xff] %v4406_v30  ;;  %v4413_v51 = vpop.f32.mrb[10].mxu0  ;;  %v1689_v25 = vld [vmem:[#allocation8 + $0x428] sm:$0xff] }
 0x199   :  { %3251 = vmatprep.subr.bf16.mxu1 %v3250_v40  ;;  %v3804_v40 = vld [vmem:[#allocation3 + $0x80] sm:$0xff]  ;;  %5515 = vst [vmem:[#allocation42_spill] sm:$0xff] %v4413_v51  ;;  %v3806_v51 = vld [vmem:[#allocation3 + $0x90] sm:$0xff]  ;;  %v3322_v45 = vpack.c.bf16 %v1691_v41, %v1689_v25 }
 0x19a   :  { %v4399_v2 = vpop.f32.mrb[52].mxu1 }
 0x19b   :  { %5509 = vst [vmem:[#allocation36_spill] sm:$0xff] %v4399_v2  ;;  %v4401_v53 = vpop.f32.mrb[53].mxu1  ;;  %1198 = vmatmul.mubr.f32.gmra.mrb[158].mxu1 %v3803_v14  ;;  %v4415_v2 = vpop.f32.mrb[11].mxu0 }
 0x19c   :  { %5510 = vst [vmem:[#allocation37_spill] sm:$0xff] %v4401_v53  ;;  %1203 = vmatprep.mubr.f32.mxu1 %v5476_v1  ;;  %3253 = vmatpush1.bf16.msra.mxu1 %v3252_v33  ;;  %5516 = vst [vmem:[#allocation43_spill] sm:$0xff] %v4415_v2  ;;  %v3805_v33 = vld [vmem:[#allocation3 + $0x88] sm:$0xff]  ;;  %v4422_v49 = vpop.f32.mrb[12].mxu0 }
 0x19d   :  { %5519 = vst [vmem:[#allocation46_spill] sm:$0xff] %v4422_v49 }
 0x19e   :  { %v4408_v15 = vpop.f32.mrb[54].mxu1 }
 0x19f   :  { %5513 = vst [vmem:[#allocation40_spill] sm:$0xff] %v4408_v15  ;;  %v4410_v26 = vpop.f32.mrb[55].mxu1  ;;  %1204 = vmatmul.mubr.f32.gmra.mrb[160].mxu1 %v3804_v40  ;;  %v5475_v15 = vlaneseq }
 0x1a0   :  { %5514 = vst [vmem:[#allocation41_spill] sm:$0xff] %v4410_v26  ;;  %1209 = vmatprep.mubr.f32.mxu1 %v5476_v1  ;;  %v4424_v26 = vpop.f32.mrb[13].mxu0 }
 0x1a1   :  { %5520 = vst [vmem:[#allocation47_spill] sm:$0xff] %v4424_v26  ;;  %v3807_v26 = vld [vmem:[#allocation3 + $0x98] sm:$0xff] }
 0x1a2   :  { %v4417_v14 = vpop.f32.mrb[56].mxu1 }
 0x1a3   :  { %5517 = vst [vmem:[#allocation44_spill] sm:$0xff] %v4417_v14  ;;  %v4419_v11 = vpop.f32.mrb[57].mxu1  ;;  %1210 = vmatmul.mubr.f32.gmra.mrb[162].mxu1 %v3805_v33  ;;  %v4431_v14 = vpop.f32.mrb[14].mxu0 }
 0x1a4   :  { %5518 = vst [vmem:[#allocation45_spill] sm:$0xff] %v4419_v11  ;;  %1215 = vmatprep.mubr.f32.mxu1 %v5476_v1  ;;  %5523 = vst [vmem:[#allocation50_spill] sm:$0xff] %v4431_v14  ;;  %v4434_v11 = vshrl.u32 %v5475_v15, 7  ;;  %v4436_v33 = vpop.f32.mrb[15].mxu0  ;;  %v4452_v15 = vld [vmem:[%s5469_s2] sm:$0xff] }
 0x1a5   :  { %5525 = vst [vmem:[#allocation52_spill] sm:$0xff] %v4436_v33 }
 0x1a6   :  { %v4426_v40 = vpop.f32.mrb[58].mxu1  ;;  %5524 = vst [vmem:[#allocation51_spill] sm:$0xff] %v4434_v11 }
 0x1a7   :  { %5521 = vst [vmem:[#allocation48_spill] sm:$0xff] %v4426_v40  ;;  %v4428_v30 = vpop.f32.mrb[59].mxu1  ;;  %1216 = vmatmul.mubr.f32.gmra.mrb[164].mxu1 %v3806_v51  ;;  %v242_v40 = vsub.s32 2, %v4434_v11  ;;  %v246_v51 = vsub.s32 3, %v4434_v11 }
 0x1a8   :  { %5522 = vst [vmem:[#allocation49_spill] sm:$0xff] %v4428_v30  ;;  %1221 = vmatprep.mubr.f32.mxu1 %v5476_v1  ;;  %v4445_v30 = vpop.f32.mrb[16].mxu0 }
 0x1a9   :  { %5528 = vst [vmem:[#allocation55_spill] sm:$0xff] %v4445_v30  ;;  %v4447_v14 = vpop.f32.mrb[17].mxu0  ;;  %v4459_v33 = vrot.slane %v4452_v15, %v242_v40  ;;  %v4463_v30 = vrot.slane %v4452_v15, %v246_v51 }
 0x1aa   :  { %v4438_v2 = vpop.f32.mrb[60].mxu1  ;;  %5529 = vst [vmem:[#allocation56_spill] sm:$0xff] %v4447_v14  ;;  %v4465_v14 = vpop.f32.mrb[18].mxu0 }
 0x1ab   :  { %5526 = vst [vmem:[#allocation53_spill] sm:$0xff] %v4438_v2  ;;  %v4440_v49 = vpop.f32.mrb[61].mxu1  ;;  %1222 = vmatmul.mubr.f32.gmra.mrb[166].mxu1 %v3807_v26  ;;  %v3808_v26 = vld [vmem:[#allocation3 + $0xa0] sm:$0xff]  ;;  %5532 = vst [vmem:[#allocation59_spill] sm:$0xff] %v4465_v14  ;;  %v4467_v53 = vpop.f32.mrb[19].mxu0 }
 0x1ac   :  { %5527 = vst [vmem:[#allocation54_spill] sm:$0xff] %v4440_v49  ;;  %1227 = vmatprep.mubr.f32.mxu1 %v5476_v1  ;;  %5533 = vst [vmem:[#allocation60_spill] sm:$0xff] %v4467_v53  ;;  %v4472_v51 = vpop.f32.mrb[20].mxu0 }
 0x1ad   :  { %5534 = vst [vmem:[#allocation61_spill] sm:$0xff] %v4472_v51  ;;  %v4474_v53 = vpop.f32.mrb[21].mxu0  ;;  %v1693_v51 = vld [vmem:[#allocation8 + $0x448] sm:$0xff] }
 0x1ae   :  { %v4454_v2 = vpop.f32.mrb[62].mxu1  ;;  %5535 = vst [vmem:[#allocation62_spill] sm:$0xff] %v4474_v53 }
 0x1af   :  { %5530 = vst [vmem:[#allocation57_spill] sm:$0xff] %v4454_v2  ;;  %v4456_v49 = vpop.f32.mrb[63].mxu1  ;;  %1228 = vmatmul.mubr.f32.gmra.mrb[168].mxu1 %v3808_v26  ;;  %v1686_v26 = vld [vmem:[#allocation8 + $0x410] sm:$0xff] }
 0x1b0   :  { %5531 = vst [vmem:[#allocation58_spill] sm:$0xff] %v4456_v49  ;;  %1233 = vmatprep.mubr.f32.mxu1 %v5476_v1  ;;  %v1684_v49 = vld [vmem:[#allocation8 + $0x400] sm:$0xff] }
 0x1b1   :  { %v3320_v48 = vpack.c.bf16 %v1686_v26, %v1684_v49  ;;  %v4479_v49 = vpop.f32.mrb[22].mxu0 }
 0x1b2   :  { %v595_v28 = vpop.f32.mrb[64].mxu1  ;;  %5537 = vst [vmem:[#allocation63_spill] sm:$0xff] %v4479_v49  ;;  %v4481_v53 = vpop.f32.mrb[23].mxu0 }
 0x1b3   :  { %v596_v19 = vadd.f32 %v595_v28, %v4459_v33  ;;  %v597_v2 = vpop.f32.mrb[65].mxu1  ;;  %1234 = vmatmul.mubr.f32.gmra.mrb[170].mxu1 %v3809_v22  ;;  %v3810_v22 = vld [vmem:[#allocation3 + $0xb0] sm:$0xff]  ;;  %5538 = vst [vmem:[#allocation64_spill] sm:$0xff] %v4481_v53 }
 0x1b4   :  { %v598_v40 = vadd.f32 %v597_v2, %v4463_v30  ;;  %1239 = vmatprep.mubr.f32.mxu1 %v5476_v1  ;;  %v1690_v2 = vld [vmem:[#allocation8 + $0x430] sm:$0xff] }
 0x1b5   :  { %v1302_v27 = vmax.f32 %v596_v19, 0.0  ;;  %v1698_v53 = vld [vmem:[#allocation8 + $0x470] sm:$0xff] }
 0x1b6   :  { %v1303_v18 = vmax.f32 %v598_v40, 0.0  ;;  %v601_v14 = vpop.f32.mrb[66].mxu1  ;;  %v1695_v40 = vld [vmem:[#allocation8 + $0x458] sm:$0xff] }
 0x1b7   :  { %v602_v28 = vadd.f32 %v601_v14, %v4459_v33  ;;  %v603_v55 = vpop.f32.mrb[67].mxu1  ;;  %1240 = vmatmul.mubr.f32.gmra.mrb[172].mxu1 %v3810_v22  ;;  %v3324_v14 = vpack.c.bf16 %v1690_v2, %v1688_v31  ;;  %v4486_v31 = vpop.f32.mrb[24].mxu0 }
 0x1b8   :  { %v604_v1 = vadd.f32 %v603_v55, %v4463_v30  ;;  %2145 = vmatprep.mubr.f32.mxu0 %v1303_v18  ;;  %1245 = vmatprep.mubr.f32.mxu1 %v5536_v57  ;;  %v3326_v55 = vpack.c.bf16 %v1695_v40, %v1693_v51  ;;  %v1692_v18 = vld [vmem:[#allocation8 + $0x440] sm:$0xff]  ;;  %5539 = vst [vmem:[#allocation65_spill] sm:$0xff] %v4486_v31  ;;  %v4488_v49 = vpop.f32.mrb[25].mxu0 }
 0x1b9   :  { %2146 = vmatmul.mubr.f32.vlgmr.msra.gmra.mrb[64].mxu0 %v1302_v27  ;;  %v1310_v22 = vmax.f32 %v602_v28, 0.0  ;;  %5540 = vst [vmem:[#allocation66_spill] sm:$0xff] %v4488_v49  ;;  %v3812_v40 = vld [vmem:[#allocation3 + $0xc0] sm:$0xff]  ;;  %v1702_v49 = vld [vmem:[#allocation8 + $0x490] sm:$0xff] }
 0x1ba   :  { %v1311_v26 = vmax.f32 %v604_v1, 0.0  ;;  %v607_v19 = vpop.f32.mrb[68].mxu1  ;;  %3321 = vmatpush1.bf16.msra.mxu0 %v3320_v48  ;;  %v1697_v1 = vld [vmem:[#allocation8 + $0x468] sm:$0xff]  ;;  %v1699_v48 = vld [vmem:[#allocation8 + $0x478] sm:$0xff] }
 0x1bb   :  { %v608_v25 = vadd.f32 %v607_v19, %v4459_v33  ;;  %v609_v41 = vpop.f32.mrb[69].mxu1  ;;  %1246 = vmatmul.mubr.f32.gmra.mrb[174].mxu1 %v3811_v39  ;;  %3323 = vmatprep.subr.bf16.mxu0 %v3322_v45  ;;  %v3328_v19 = vpack.c.bf16 %v1694_v20, %v1692_v18  ;;  %v4493_v20 = vpop.f32.mrb[26].mxu0 }
 0x1bc   :  { %v610_v27 = vadd.f32 %v609_v41, %v4463_v30  ;;  %2151 = vmatprep.mubr.f32.mxu0 %v1311_v26  ;;  %1251 = vmatprep.mubr.f32.mxu1 %v5536_v57  ;;  %v3330_v26 = vpack.c.bf16 %v1699_v48, %v1697_v1  ;;  %v1696_v41 = vld [vmem:[#allocation8 + $0x460] sm:$0xff]  ;;  %5541 = vst [vmem:[#allocation67_spill] sm:$0xff] %v4493_v20  ;;  %v4495_v31 = vpop.f32.mrb[27].mxu0 }
 0x1bd   :  { %2152 = vmatmul.mubr.f32.gmra.mrb[66].mxu0 %v1310_v22  ;;  %v1318_v39 = vmax.f32 %v608_v25, 0.0  ;;  %5542 = vst [vmem:[#allocation68_spill] sm:$0xff] %v4495_v31  ;;  %v1706_v31 = vld [vmem:[#allocation8 + $0x4b0] sm:$0xff] }
 0x1be   :  { %v1319_v28 = vmax.f32 %v610_v27, 0.0  ;;  %v613_v2 = vpop.f32.mrb[70].mxu1  ;;  %3325 = vmatpush1.bf16.msra.mxu0 %v3324_v14  ;;  %v1701_v27 = vld [vmem:[#allocation8 + $0x488] sm:$0xff]  ;;  %v1703_v14 = vld [vmem:[#allocation8 + $0x498] sm:$0xff] }
 0x1bf   :  { %v614_v45 = vadd.f32 %v613_v2, %v4459_v33  ;;  %v615_v51 = vpop.f32.mrb[71].mxu1  ;;  %1252 = vmatmul.mubr.f32.gmra.mrb[176].mxu1 %v3812_v40  ;;  %3327 = vmatprep.subr.bf16.mxu0 %v3326_v55  ;;  %v3332_v2 = vpack.c.bf16 %v1698_v53, %v1696_v41  ;;  %v3813_v40 = vld [vmem:[#allocation3 + $0xc8] sm:$0xff]  ;;  %v4500_v53 = vpop.f32.mrb[28].mxu0 }
 0x1c0   :  { %v616_v22 = vadd.f32 %v615_v51, %v4463_v30  ;;  %2157 = vmatprep.mubr.f32.mxu0 %v1319_v28  ;;  %1257 = vmatprep.mubr.f32.mxu1 %v5536_v57  ;;  %v3334_v28 = vpack.c.bf16 %v1703_v14, %v1701_v27  ;;  %v1700_v51 = vld [vmem:[#allocation8 + $0x480] sm:$0xff]  ;;  %5543 = vst [vmem:[#allocation69_spill] sm:$0xff] %v4500_v53  ;;  %v4502_v20 = vpop.f32.mrb[29].mxu0 }
 0x1c1   :  { %2158 = vmatmul.mubr.f32.gmra.mrb[68].mxu0 %v1318_v39  ;;  %v1326_v55 = vmax.f32 %v614_v45, 0.0  ;;  %5544 = vst [vmem:[#allocation70_spill] sm:$0xff] %v4502_v20  ;;  %v1710_v20 = vld [vmem:[#allocation8 + $0x4d0] sm:$0xff] }
 0x1c2   :  { %v1327_v25 = vmax.f32 %v616_v22, 0.0  ;;  %v619_v18 = vpop.f32.mrb[72].mxu1  ;;  %3329 = vmatpush1.bf16.msra.mxu0 %v3328_v19  ;;  %v1705_v22 = vld [vmem:[#allocation8 + $0x4a8] sm:$0xff]  ;;  %v1707_v19 = vld [vmem:[#allocation8 + $0x4b8] sm:$0xff] }
 0x1c3   :  { %v620_v1 = vadd.f32 %v619_v18, %v4459_v33  ;;  %v621_v48 = vpop.f32.mrb[73].mxu1  ;;  %1258 = vmatmul.mubr.f32.gmra.mrb[178].mxu1 %v3813_v40  ;;  %3331 = vmatprep.subr.bf16.mxu0 %v3330_v26  ;;  %v3336_v18 = vpack.c.bf16 %v1702_v49, %v1700_v51  ;;  %v3814_v40 = vld [vmem:[#allocation3 + $0xd0] sm:$0xff]  ;;  %v4507_v49 = vpop.f32.mrb[30].mxu0 }
 0x1c4   :  { %v622_v39 = vadd.f32 %v621_v48, %v4463_v30  ;;  %2163 = vmatprep.mubr.f32.mxu0 %v1327_v25  ;;  %1263 = vmatprep.mubr.f32.mxu1 %v5536_v57  ;;  %v3338_v25 = vpack.c.bf16 %v1707_v19, %v1705_v22  ;;  %v1704_v48 = vld [vmem:[#allocation8 + $0x4a0] sm:$0xff]  ;;  %5545 = vst [vmem:[#allocation71_spill] sm:$0xff] %v4507_v49  ;;  %v4509_v53 = vpop.f32.mrb[31].mxu0 }
 0x1c5   :  { %2164 = vmatmul.mubr.f32.gmra.mrb[70].mxu0 %v1326_v55  ;;  %v1334_v26 = vmax.f32 %v620_v1, 0.0  ;;  %5546 = vst [vmem:[#allocation72_spill] sm:$0xff] %v4509_v53  ;;  %v1714_v53 = vld [vmem:[#allocation8 + $0x4f0] sm:$0xff] }
 0x1c6   :  { %v1335_v45 = vmax.f32 %v622_v39, 0.0  ;;  %v625_v41 = vpop.f32.mrb[74].mxu1  ;;  %3333 = vmatpush1.bf16.msra.mxu0 %v3332_v2  ;;  %v1709_v39 = vld [vmem:[#allocation8 + $0x4c8] sm:$0xff]  ;;  %v1711_v2 = vld [vmem:[#allocation8 + $0x4d8] sm:$0xff] }
 0x1c7   :  { %v626_v27 = vadd.f32 %v625_v41, %v4459_v33  ;;  %v627_v14 = vpop.f32.mrb[75].mxu1  ;;  %1264 = vmatmul.mubr.f32.gmra.mrb[180].mxu1 %v3814_v40  ;;  %3335 = vmatprep.subr.bf16.mxu0 %v3334_v28  ;;  %v3340_v41 = vpack.c.bf16 %v1706_v31, %v1704_v48  ;;  %v3815_v40 = vld [vmem:[#allocation3 + $0xd8] sm:$0xff]  ;;  %v4514_v31 = vpop.f32.mrb[32].mxu0 }
 0x1c8   :  { %v628_v55 = vadd.f32 %v627_v14, %v4463_v30  ;;  %2169 = vmatprep.mubr.f32.mxu0 %v1335_v45  ;;  %1269 = vmatprep.mubr.f32.mxu1 %v5536_v57  ;;  %v3342_v45 = vpack.c.bf16 %v1711_v2, %v1709_v39  ;;  %v1708_v14 = vld [vmem:[#allocation8 + $0x4c0] sm:$0xff]  ;;  %5547 = vst [vmem:[#allocation73_spill] sm:$0xff] %v4514_v31  ;;  %v4519_v39 = vpop.f32.mrb[33].mxu0 }
 0x1c9   :  { %2170 = vmatmul.mubr.f32.gmra.mrb[72].mxu0 %v1334_v26  ;;  %v1342_v28 = vmax.f32 %v626_v27, 0.0  ;;  %v4517_v27 = vsub.s32 1, %v4434_v11  ;;  %5549 = vst [vmem:[#allocation75_spill] sm:$0xff] %v4519_v39  ;;  %v3817_v39 = vld [vmem:[#allocation3 + $0xe8] sm:$0xff] }
 0x1ca   :  { %v1343_v1 = vmax.f32 %v628_v55, 0.0  ;;  %v631_v51 = vpop.f32.mrb[76].mxu1  ;;  %3337 = vmatpush1.bf16.msra.mxu0 %v3336_v18  ;;  %v1713_v55 = vld [vmem:[#allocation8 + $0x4e8] sm:$0xff]  ;;  %v1715_v18 = vld [vmem:[#allocation8 + $0x4f8] sm:$0xff] }
 0x1cb   :  { %v632_v22 = vadd.f32 %v631_v51, %v4459_v33  ;;  %v633_v19 = vpop.f32.mrb[77].mxu1  ;;  %1270 = vmatmul.mubr.f32.gmra.mrb[182].mxu1 %v3815_v40  ;;  %3339 = vmatprep.subr.bf16.mxu0 %v3338_v25  ;;  %5548 = vst [vmem:[#allocation74_spill] sm:$0xff] %v4517_v27  ;;  %v3344_v25 = vpack.c.bf16 %v1710_v20, %v1708_v14  ;;  %v3816_v40 = vld [vmem:[#allocation3 + $0xe0] sm:$0xff]  ;;  %v4525_v20 = vsub.s32 0, %v4434_v11 }
 0x1cc   :  { %v634_v26 = vadd.f32 %v633_v19, %v4463_v30  ;;  %2175 = vmatprep.mubr.f32.mxu0 %v1343_v1  ;;  %1275 = vmatprep.mubr.f32.mxu1 %v5536_v57  ;;  %v3346_v49 = vpack.c.bf16 %v1715_v18, %v1713_v55  ;;  %v4531_v14 = vrot.slane %v4452_v15, %v4517_v27  ;;  %v1716_v11 = vld [vmem:[#allocation8 + $0x500] sm:$0xff]  ;;  %v3818_v27 = vld [vmem:[#allocation3 + $0xf0] sm:$0xff] }
 0x1cd   :  { %2176 = vmatmul.mubr.f32.gmra.mrb[74].mxu0 %v1342_v28  ;;  %v1350_v2 = vmax.f32 %v632_v22, 0.0  ;;  %v1712_v28 = vld [vmem:[#allocation8 + $0x4e0] sm:$0xff]  ;;  %5550 = vst [vmem:[#allocation76_spill] sm:$0xff] %v4525_v20  ;;  %v4527_v22 = vpop.f32.mrb[34].mxu0 }
 0x1ce   :  { %v1351_v48 = vmax.f32 %v634_v26, 0.0  ;;  %v637_v51 = vpop.f32.mrb[78].mxu1  ;;  %3341 = vmatpush1.bf16.msra.mxu0 %v3340_v41  ;;  %v1717_v26 = vld [vmem:[#allocation8 + $0x508] sm:$0xff]  ;;  %v1719_v41 = vld [vmem:[#allocation8 + $0x518] sm:$0xff]  ;;  %5551 = vst [vmem:[#allocation77_spill] sm:$0xff] %v4527_v22  ;;  %v3348_v18 = vpack.c.bf16 %v1714_v53, %v1712_v28  ;;  %v1718_v22 = vld [vmem:[#allocation8 + $0x510] sm:$0xff]  ;;  %v4540_v53 = vrot.slane %v4452_v15, %v4525_v20 }
 0x1cf   :  { %v638_v19 = vadd.f32 %v637_v51, %v4459_v33  ;;  %v639_v1 = vpop.f32.mrb[79].mxu1  ;;  %1276 = vmatmul.mubr.f32.gmra.mrb[184].mxu1 %v3816_v40  ;;  %3343 = vmatprep.subr.bf16.mxu0 %v3342_v45  ;;  %v4533_v51 = vpop.f32.mrb[35].mxu0  ;;  %v1722_v20 = vld [vmem:[#allocation8 + $0x530] sm:$0xff] }
 0x1d0   :  { %v640_v31 = vadd.f32 %v639_v1, %v4463_v30  ;;  %2181 = vmatprep.mubr.f32.mxu0 %v1351_v48  ;;  %1281 = vmatprep.mubr.f32.mxu1 %v5536_v57 }
 0x1d1   :  { %2182 = vmatmul.mubr.f32.gmra.mrb[76].mxu0 %v1350_v2  ;;  %v1358_v48 = vmax.f32 %v638_v19, 0.0  ;;  %v3350_v2 = vpack.c.bf16 %v1719_v41, %v1717_v26  ;;  %v4542_v19 = vpop.f32.mrb[36].mxu0  ;;  %v3352_v26 = vpack.c.bf16 %v1718_v22, %v1716_v11  ;;  %v339_v11 = vadd.f32 %v4239_v38, %v4540_v53 }
 0x1d2   :  { %v1359_v45 = vmax.f32 %v640_v31, 0.0  ;;  %v643_v55 = vpop.f32.mrb[80].mxu1  ;;  %3345 = vmatpush1.bf16.msra.mxu0 %v3344_v25  ;;  %v1721_v31 = vld [vmem:[#allocation8 + $0x528] sm:$0xff]  ;;  %v1723_v25 = vld [vmem:[#allocation8 + $0x538] sm:$0xff]  ;;  %5552 = vst [vmem:[#allocation78_spill] sm:$0xff] %v4542_v19  ;;  %v4546_v41 = vpop.f32.mrb[37].mxu0 }
 0x1d3   :  { %v644_v1 = vadd.f32 %v643_v55, %v4459_v33  ;;  %v645_v40 = vpop.f32.mrb[81].mxu1  ;;  %1282 = vmatmul.mubr.f32.gmra.mrb[186].mxu1 %v3817_v39  ;;  %3347 = vmatprep.subr.bf16.mxu0 %v3346_v49  ;;  %v341_v49 = vadd.f32 %v4242_v42, %v4531_v14  ;;  %5553 = vst [vmem:[#allocation79_spill] sm:$0xff] %v4546_v41  ;;  %v1725_v42 = vld [vmem:[#allocation8 + $0x548] sm:$0xff]  ;;  %v4553_v22 = vpop.f32.mrb[38].mxu0 }
 0x1d4   :  { %v646_v34 = vadd.f32 %v645_v40, %v4463_v30  ;;  %2187 = vmatprep.mubr.f32.mxu0 %v1359_v45  ;;  %1287 = vmatprep.mubr.f32.mxu1 %v5536_v57  ;;  %v3354_v15 = vpack.c.bf16 %v1723_v25, %v1721_v31  ;;  %5554 = vst [vmem:[#allocation80_spill] sm:$0xff] %v4553_v22  ;;  %v4557_v25 = vpop.f32.mrb[39].mxu0  ;;  %v1726_v22 = vld [vmem:[#allocation8 + $0x550] sm:$0xff] }
 0x1d5   :  { %2188 = vmatmul.mubr.f32.gmra.mrb[78].mxu0 %v1358_v48  ;;  %v1366_v45 = vmax.f32 %v644_v1, 0.0  ;;  %v1720_v48 = vld [vmem:[#allocation8 + $0x520] sm:$0xff] }
 0x1d6   :  { %v1367_v39 = vmax.f32 %v646_v34, 0.0  ;;  %v649_v28 = vpop.f32.mrb[82].mxu1  ;;  %3349 = vmatpush1.bf16.msra.mxu0 %v3348_v18  ;;  %v1727_v34 = vld [vmem:[#allocation8 + $0x558] sm:$0xff]  ;;  %v3356_v31 = vpack.c.bf16 %v1722_v20, %v1720_v48  ;;  %v345_v20 = vadd.f32 %v4247_v54, %v4540_v53 }
 0x1d7   :  { %v650_v55 = vadd.f32 %v649_v28, %v4459_v33  ;;  %v651_v40 = vpop.f32.mrb[83].mxu1  ;;  %1288 = vmatmul.mubr.f32.gmra.mrb[188].mxu1 %v3818_v27  ;;  %3351 = vmatprep.subr.bf16.mxu0 %v3350_v2  ;;  %v347_v27 = vadd.f32 %v4249_v0, %v4531_v14  ;;  %v1301_v2 = vmax.f32 %v341_v49, 0.0  ;;  %v3358_v38 = vpack.c.bf16 %v1727_v34, %v1725_v42  ;;  %v1729_v0 = vld [vmem:[#allocation8 + $0x568] sm:$0xff] }
 0x1d8   :  { %v652_v19 = vadd.f32 %v651_v40, %v4463_v30  ;;  %2193 = vmatprep.mubr.f32.mxu0 %v1367_v39  ;;  %1293 = vmatprep.mubr.f32.mxu1 %v5536_v57  ;;  %v3819_v40 = vld [vmem:[#allocation3 + $0xf8] sm:$0xff]  ;;  %v1300_v49 = vmax.f32 %v339_v11, 0.0 }
 0x1d9   :  { %2194 = vmatmul.mubr.f32.gmra.mrb[80].mxu0 %v1366_v45  ;;  %v1374_v39 = vmax.f32 %v650_v55, 0.0  ;;  %v1724_v45 = vld [vmem:[#allocation8 + $0x540] sm:$0xff]  ;;  %v1309_v55 = vmax.f32 %v347_v27, 0.0 }
 0x1da   :  { %v1375_v18 = vmax.f32 %v652_v19, 0.0  ;;  %v655_v1 = vpop.f32.mrb[84].mxu1  ;;  %3353 = vmatpush1.bf16.msra.mxu0 %v3352_v26  ;;  %v1731_v19 = vld [vmem:[#allocation8 + $0x578] sm:$0xff]  ;;  %v4563_v26 = vpop.f32.mrb[40].mxu0  ;;  %v3360_v34 = vpack.c.bf16 %v1726_v22, %v1724_v45  ;;  %v351_v22 = vadd.f32 %v4254_v50, %v4540_v53 }
 0x1db   :  { %v656_v57 = vadd.f32 %v655_v1, %v4459_v33  ;;  %v657_v28 = vpop.f32.mrb[85].mxu1  ;;  %1294 = vmatmul.mubr.f32.gmra.mrb[190].mxu1 %v3819_v40  ;;  %3355 = vmatprep.subr.bf16.mxu0 %v3354_v15  ;;  %v353_v15 = vadd.f32 %v4256_v58, %v4531_v14  ;;  %v4567_v1 = vpop.f32.mrb[41].mxu0  ;;  %v3362_v54 = vpack.c.bf16 %v1731_v19, %v1729_v0  ;;  %v1733_v58 = vld [vmem:[#allocation8 + $0x588] sm:$0xff]  ;;  %v1308_v40 = vmax.f32 %v345_v20, 0.0 }
 0x1dc   :  { %v658_v41 = vadd.f32 %v657_v28, %v4463_v30  ;;  %1888 = vmatprep.mubr.f32.mxu1 %v1301_v2  ;;  %2199 = vmatprep.mubr.f32.mxu0 %v1375_v18  ;;  %v1730_v28 = vld [vmem:[#allocation8 + $0x570] sm:$0xff] }
 0x1dd   :  { %2200 = vmatmul.mubr.f32.gmra.mrb[82].mxu0 %v1374_v39  ;;  %v1382_v18 = vmax.f32 %v656_v57, 0.0  ;;  %v1728_v39 = vld [vmem:[#allocation8 + $0x560] sm:$0xff]  ;;  %v1317_v57 = vmax.f32 %v353_v15, 0.0 }
 0x1de   :  { %v1383_v48 = vmax.f32 %v658_v41, 0.0  ;;  %v661_v42 = vpop.f32.mrb[86].mxu1  ;;  %3357 = vmatpush1.bf16.msra.mxu0 %v3356_v31  ;;  %v1735_v41 = vld [vmem:[#allocation8 + $0x598] sm:$0xff]  ;;  %v4573_v31 = vpop.f32.mrb[42].mxu0  ;;  %v3364_v19 = vpack.c.bf16 %v1730_v28, %v1728_v39 }
 0x1df   :  { %v662_v2 = vadd.f32 %v661_v42, %v4459_v33  ;;  %v663_v11 = vpop.f32.mrb[87].mxu1  ;;  %1889 = vmatmul.mubr.f32.vlgmr.msra.gmra.mrb[192].mxu1 %v1300_v49  ;;  %3359 = vmatprep.subr.bf16.mxu0 %v3358_v38  ;;  %v359_v38 = vadd.f32 %v4262_v62, %v4531_v14  ;;  %v4577_v49 = vpop.f32.mrb[43].mxu0  ;;  %v3366_v50 = vpack.c.bf16 %v1735_v41, %v1733_v58  ;;  %v1732_v42 = vld [vmem:[#allocation8 + $0x580] sm:$0xff]  ;;  %v1737_v62 = vld [vmem:[#allocation8 + $0x5a8] sm:$0xff] }
 0x1e0   :  { %v664_v27 = vadd.f32 %v663_v11, %v4463_v30  ;;  %1894 = vmatprep.mubr.f32.mxu1 %v1309_v55  ;;  %2205 = vmatprep.mubr.f32.mxu0 %v1383_v48  ;;  %v1739_v11 = vld [vmem:[#allocation8 + $0x5b8] sm:$0xff] }
 0x1e1   :  { %2206 = vmatmul.mubr.f32.gmra.mrb[84].mxu0 %v1382_v18  ;;  %v1390_v55 = vmax.f32 %v662_v2, 0.0  ;;  %v1734_v18 = vld [vmem:[#allocation8 + $0x590] sm:$0xff]  ;;  %v4583_v2 = vpop.f32.mrb[44].mxu0  ;;  %v1325_v39 = vmax.f32 %v359_v38, 0.0 }
 0x1e2   :  { %v1391_v45 = vmax.f32 %v664_v27, 0.0  ;;  %v667_v0 = vpop.f32.mrb[88].mxu1  ;;  %3361 = vmatpush1.bf16.msra.mxu0 %v3360_v34  ;;  %v1316_v27 = vmax.f32 %v351_v22, 0.0  ;;  %v357_v34 = vadd.f32 %v4260_v61, %v4540_v53  ;;  %v3368_v41 = vpack.c.bf16 %v1734_v18, %v1732_v42 }
 0x1e3   :  { %v668_v48 = vadd.f32 %v667_v0, %v4459_v33  ;;  %v669_v20 = vpop.f32.mrb[89].mxu1  ;;  %1895 = vmatmul.mubr.f32.gmra.mrb[194].mxu1 %v1308_v40  ;;  %3363 = vmatprep.subr.bf16.mxu0 %v3362_v54  ;;  %v365_v54 = vadd.f32 %v4268_v63, %v4531_v14  ;;  %v4587_v40 = vpop.f32.mrb[45].mxu0  ;;  %v3370_v61 = vpack.c.bf16 %v1739_v11, %v1737_v62  ;;  %v1736_v0 = vld [vmem:[#allocation8 + $0x5a0] sm:$0xff]  ;;  %v1741_v63 = vld [vmem:[#allocation8 + $0x5c8] sm:$0xff] }
 0x1e4   :  { %v670_v15 = vadd.f32 %v669_v20, %v4463_v30  ;;  %1900 = vmatprep.mubr.f32.mxu1 %v1317_v57  ;;  %2211 = vmatprep.mubr.f32.mxu0 %v1391_v45  ;;  %v1743_v20 = vld [vmem:[#allocation8 + $0x5d8] sm:$0xff] }
 0x1e5   :  { %2212 = vmatmul.mubr.f32.gmra.mrb[86].mxu0 %v1390_v55  ;;  %v1398_v57 = vmax.f32 %v668_v48, 0.0  ;;  %v1738_v55 = vld [vmem:[#allocation8 + $0x5b0] sm:$0xff]  ;;  %v4593_v48 = vpop.f32.mrb[46].mxu0  ;;  %v1333_v42 = vmax.f32 %v365_v54, 0.0 }
 0x1e6   :  { %v1399_v28 = vmax.f32 %v670_v15, 0.0  ;;  %v673_v58 = vpop.f32.mrb[90].mxu1  ;;  %3365 = vmatpush1.bf16.msra.mxu0 %v3364_v19  ;;  %v1324_v15 = vmax.f32 %v357_v34, 0.0  ;;  %v363_v19 = vadd.f32 %v4266_v59, %v4540_v53  ;;  %v3372_v11 = vpack.c.bf16 %v1738_v55, %v1736_v0 }
 0x1e7   :  { %v674_v45 = vadd.f32 %v673_v58, %v4459_v33  ;;  %v675_v22 = vpop.f32.mrb[91].mxu1  ;;  %1901 = vmatmul.mubr.f32.gmra.mrb[196].mxu1 %v1316_v27  ;;  %3367 = vmatprep.subr.bf16.mxu0 %v3366_v50  ;;  %v371_v50 = vadd.f32 %v4274_v4, %v4531_v14  ;;  %v4597_v27 = vpop.f32.mrb[47].mxu0  ;;  %v3374_v59 = vpack.c.bf16 %v1743_v20, %v1741_v63  ;;  %v1740_v58 = vld [vmem:[#allocation8 + $0x5c0] sm:$0xff]  ;;  %v1745_v4 = vld [vmem:[#allocation8 + $0x5e8] sm:$0xff] }
 0x1e8   :  { %v676_v38 = vadd.f32 %v675_v22, %v4463_v30  ;;  %1906 = vmatprep.mubr.f32.mxu1 %v1325_v39  ;;  %2217 = vmatprep.mubr.f32.mxu0 %v1399_v28  ;;  %v1747_v22 = vld [vmem:[#allocation8 + $0x5f8] sm:$0xff] }
 0x1e9   :  { %2218 = vmatmul.mubr.f32.gmra.mrb[88].mxu0 %v1398_v57  ;;  %v1406_v39 = vmax.f32 %v674_v45, 0.0  ;;  %v1742_v57 = vld [vmem:[#allocation8 + $0x5d0] sm:$0xff]  ;;  %v4603_v45 = vpop.f32.mrb[48].mxu0  ;;  %v1341_v0 = vmax.f32 %v371_v50, 0.0 }
 0x1ea   :  { %v1407_v18 = vmax.f32 %v676_v38, 0.0  ;;  %v679_v62 = vpop.f32.mrb[92].mxu1  ;;  %3369 = vmatpush1.bf16.msra.mxu0 %v3368_v41  ;;  %v1332_v38 = vmax.f32 %v363_v19, 0.0  ;;  %v369_v41 = vadd.f32 %v4272_v60, %v4540_v53  ;;  %v3376_v20 = vpack.c.bf16 %v1742_v57, %v1740_v58 }
 0x1eb   :  { %v680_v28 = vadd.f32 %v679_v62, %v4459_v33  ;;  %v681_v34 = vpop.f32.mrb[93].mxu1  ;;  %1907 = vmatmul.mubr.f32.gmra.mrb[198].mxu1 %v1324_v15  ;;  %3371 = vmatprep.subr.bf16.mxu0 %v3370_v61  ;;  %v377_v61 = vadd.f32 %v4280_v3, %v4531_v14  ;;  %v4607_v15 = vpop.f32.mrb[49].mxu0  ;;  %v3378_v60 = vpack.c.bf16 %v1747_v22, %v1745_v4  ;;  %v1744_v62 = vld [vmem:[#allocation8 + $0x5e0] sm:$0xff]  ;;  %v1749_v3 = vld [vmem:[#allocation8 + $0x608] sm:$0xff] }
 0x1ec   :  { %v682_v54 = vadd.f32 %v681_v34, %v4463_v30  ;;  %1912 = vmatprep.mubr.f32.mxu1 %v1333_v42  ;;  %2223 = vmatprep.mubr.f32.mxu0 %v1407_v18  ;;  %v1751_v34 = vld [vmem:[#allocation8 + $0x618] sm:$0xff] }
 0x1ed   :  { %2224 = vmatmul.mubr.f32.gmra.mrb[90].mxu0 %v1406_v39  ;;  %v1414_v42 = vmax.f32 %v680_v28, 0.0  ;;  %v1746_v39 = vld [vmem:[#allocation8 + $0x5f0] sm:$0xff]  ;;  %v4613_v28 = vpop.f32.mrb[50].mxu0  ;;  %v1349_v58 = vmax.f32 %v377_v61, 0.0 }
 0x1ee   :  { %v1415_v55 = vmax.f32 %v682_v54, 0.0  ;;  %v685_v63 = vpop.f32.mrb[94].mxu1  ;;  %3373 = vmatpush1.bf16.msra.mxu0 %v3372_v11  ;;  %v1340_v54 = vmax.f32 %v369_v41, 0.0  ;;  %v375_v11 = vadd.f32 %v4278_v43, %v4540_v53  ;;  %v3380_v22 = vpack.c.bf16 %v1746_v39, %v1744_v62 }
 0x1ef   :  { %v686_v18 = vadd.f32 %v685_v63, %v4459_v33  ;;  %v687_v19 = vpop.f32.mrb[95].mxu1  ;;  %1913 = vmatmul.mubr.f32.gmra.mrb[200].mxu1 %v1332_v38  ;;  %3375 = vmatprep.subr.bf16.mxu0 %v3374_v59  ;;  %v383_v59 = vadd.f32 %v4286_v12, %v4531_v14  ;;  %v4617_v38 = vpop.f32.mrb[51].mxu0  ;;  %v3382_v43 = vpack.c.bf16 %v1751_v34, %v1749_v3 }
 0x1f0   :  { %v688_v50 = vadd.f32 %v687_v19, %v4463_v30  ;;  %1918 = vmatprep.mubr.f32.mxu1 %v1341_v0  ;;  %2229 = vmatprep.mubr.f32.mxu0 %v1415_v55  ;;  %v1348_v61 = vmax.f32 %v375_v11, 0.0  ;;  %v381_v12 = vadd.f32 %v4284_v44, %v4540_v53 }
 0x1f1   :  { %2230 = vmatmul.mubr.f32.gmra.mrb[92].mxu0 %v1414_v42  ;;  %v1422_v0 = vmax.f32 %v686_v18, 0.0  ;;  %v1357_v42 = vmax.f32 %v383_v59, 0.0  ;;  %v389_v18 = vadd.f32 %v4292_v17, %v4531_v14 }
 0x1f2   :  { %v1423_v57 = vmax.f32 %v688_v50, 0.0  ;;  %v691_v4 = vpop.f32.mrb[96].mxu1  ;;  %3377 = vmatpush1.bf16.msra.mxu0 %v3376_v20  ;;  %v4623_v20 = vpop.f32.mrb[52].mxu0  ;;  %v1356_v34 = vmax.f32 %v381_v12, 0.0 }
 0x1f3   :  { %v692_v55 = vadd.f32 %v691_v4, %v4459_v33  ;;  %v693_v41 = vpop.f32.mrb[97].mxu1  ;;  %1919 = vmatmul.mubr.f32.gmra.mrb[202].mxu1 %v1340_v54  ;;  %3379 = vmatprep.subr.bf16.mxu0 %v3378_v60  ;;  %v4627_v60 = vpop.f32.mrb[53].mxu0  ;;  %v387_v54 = vadd.f32 %v4290_v5, %v4540_v53  ;;  %v1365_v11 = vmax.f32 %v389_v18, 0.0 }
 0x1f4   :  { %v694_v63 = vadd.f32 %v693_v41, %v4463_v30  ;;  %1924 = vmatprep.mubr.f32.mxu1 %v1349_v58  ;;  %2235 = vmatprep.mubr.f32.mxu0 %v1423_v57  ;;  %v4633_v17 = vpop.f32.mrb[54].mxu0  ;;  %v395_v58 = vadd.f32 %v4298_v23, %v4531_v14 }
 0x1f5   :  { %2236 = vmatmul.mubr.f32.gmra.mrb[94].mxu0 %v1422_v0  ;;  %v1430_v39 = vmax.f32 %v692_v55, 0.0  ;;  %v4637_v4 = vpop.f32.mrb[55].mxu0  ;;  %v1364_v5 = vmax.f32 %v387_v54, 0.0 }
 0x1f6   :  { %v1431_v19 = vmax.f32 %v694_v63, 0.0  ;;  %v697_v62 = vpop.f32.mrb[98].mxu1  ;;  %3381 = vmatpush1.bf16.msra.mxu0 %v3380_v22  ;;  %v4643_v63 = vpop.f32.mrb[56].mxu0  ;;  %v1373_v23 = vmax.f32 %v395_v58, 0.0 }
 0x1f7   :  { %v698_v50 = vadd.f32 %v697_v62, %v4459_v33  ;;  %v699_v3 = vpop.f32.mrb[99].mxu1  ;;  %1925 = vmatmul.mubr.f32.gmra.mrb[204].mxu1 %v1348_v61  ;;  %3383 = vmatprep.subr.bf16.mxu0 %v3382_v43  ;;  %v393_v43 = vadd.f32 %v4296_v8, %v4540_v53  ;;  %v401_v61 = vadd.f32 %v4304_v9, %v4531_v14  ;;  %v4647_v18 = vpop.f32.mrb[57].mxu0 }
 0x1f8   :  { %v700_v44 = vadd.f32 %v699_v3, %v4463_v30  ;;  %1930 = vmatprep.mubr.f32.mxu1 %v1357_v42  ;;  %2241 = vmatprep.mubr.f32.mxu0 %v1431_v19  ;;  %v399_v3 = vadd.f32 %v4302_v7, %v4540_v53 }
 0x1f9   :  { %2242 = vmatmul.mubr.f32.gmra.mrb[96].mxu0 %v1430_v39  ;;  %v1438_v22 = vmax.f32 %v698_v50, 0.0  ;;  %v1372_v8 = vmax.f32 %v393_v43, 0.0  ;;  %v1381_v9 = vmax.f32 %v401_v61, 0.0 }
 0x1fa   :  { %v1439_v59 = vmax.f32 %v700_v44, 0.0  ;;  %v703_v57 = vpop.f32.mrb[100].mxu1  ;;  %v4653_v44 = vpop.f32.mrb[58].mxu0  ;;  %v1380_v7 = vmax.f32 %v399_v3, 0.0 }
 0x1fb   :  { %v704_v0 = vadd.f32 %v703_v57, %v4459_v33  ;;  %v705_v55 = vpop.f32.mrb[101].mxu1  ;;  %1931 = vmatmul.mubr.f32.gmra.mrb[206].mxu1 %v1356_v34  ;;  %v407_v34 = vadd.f32 %v4310_v16, %v4531_v14  ;;  %v4657_v58 = vpop.f32.mrb[59].mxu0 }
 0x1fc   :  { %v706_v41 = vadd.f32 %v705_v55, %v4463_v30  ;;  %1936 = vmatprep.mubr.f32.mxu1 %v1365_v11  ;;  %2247 = vmatprep.mubr.f32.mxu0 %v1439_v59  ;;  %v405_v55 = vadd.f32 %v4308_v47, %v4540_v53 }
 0x1fd   :  { %2248 = vmatmul.mubr.f32.gmra.mrb[98].mxu0 %v1438_v22  ;;  %v1446_v19 = vmax.f32 %v704_v0, 0.0  ;;  %v1389_v16 = vmax.f32 %v407_v34, 0.0 }
 0x1fe   :  { %v1447_v12 = vmax.f32 %v706_v41, 0.0  ;;  %v709_v42 = vpop.f32.mrb[102].mxu1  ;;  %v4663_v41 = vpop.f32.mrb[60].mxu0  ;;  %v1388_v47 = vmax.f32 %v405_v55, 0.0 }
 0x1ff   :  { %v710_v62 = vadd.f32 %v709_v42, %v4459_v33  ;;  %v711_v39 = vpop.f32.mrb[103].mxu1  ;;  %1937 = vmatmul.mubr.f32.gmra.mrb[208].mxu1 %v1364_v5  ;;  %v413_v5 = vadd.f32 %v4315_v56, %v4531_v14  ;;  %v4667_v61 = vpop.f32.mrb[61].mxu0  ;;  %v419_v56 = vadd.f32 %v4320_v35, %v4531_v14 }
 0x200   :  { %v712_v50 = vadd.f32 %v711_v39, %v4463_v30  ;;  %1942 = vmatprep.mubr.f32.mxu1 %v1373_v23  ;;  %2253 = vmatprep.mubr.f32.mxu0 %v1447_v12  ;;  %v411_v39 = vadd.f32 %v4313_v21, %v4540_v53 }
 0x201   :  { %2254 = vmatmul.mubr.f32.gmra.mrb[100].mxu0 %v1446_v19  ;;  %v1454_v59 = vmax.f32 %v710_v62, 0.0  ;;  %v1405_v35 = vmax.f32 %v419_v56, 0.0 }
 0x202   :  { %v1455_v54 = vmax.f32 %v712_v50, 0.0  ;;  %v715_v11 = vpop.f32.mrb[104].mxu1  ;;  %v1397_v50 = vmax.f32 %v413_v5, 0.0  ;;  %v1396_v21 = vmax.f32 %v411_v39, 0.0 }
 0x203   :  { %v716_v57 = vadd.f32 %v715_v11, %v4459_v33  ;;  %v717_v22 = vpop.f32.mrb[105].mxu1  ;;  %1943 = vmatmul.mubr.f32.gmra.mrb[210].mxu1 %v1372_v8 }
 0x204   :  { %v718_v0 = vadd.f32 %v717_v22, %v4463_v30  ;;  %1948 = vmatprep.mubr.f32.mxu1 %v1381_v9  ;;  %2259 = vmatprep.mubr.f32.mxu0 %v1455_v54  ;;  %v4675_v9 = vpop.f32.mrb[62].mxu0  ;;  %v417_v22 = vadd.f32 %v4318_v10, %v4540_v53  ;;  %v423_v10 = vadd.f32 %v4323_v29, %v4540_v53 }
 0x205   :  { %2260 = vmatmul.mubr.f32.gmra.mrb[102].mxu0 %v1454_v59  ;;  %v1462_v12 = vmax.f32 %v716_v57, 0.0  ;;  %v4678_v59 = vpop.f32.mrb[63].mxu0  ;;  %v429_v29 = vadd.f32 %v4328_v46, %v4540_v53  ;;  %v435_v46 = vadd.f32 %v4333_v52, %v4540_v53  ;;  %v441_v52 = vadd.f32 %v4338_v32, %v4540_v53 }
 0x206   :  { %v1463_v43 = vmax.f32 %v718_v0, 0.0  ;;  %v721_v23 = vpop.f32.mrb[106].mxu1  ;;  %v425_v0 = vadd.f32 %v4325_v36, %v4531_v14  ;;  %v431_v36 = vadd.f32 %v4330_v13, %v4531_v14  ;;  %v437_v13 = vadd.f32 %v4335_v24, %v4531_v14 }
 0x207   :  { %v722_v42 = vadd.f32 %v721_v23, %v4459_v33  ;;  %v723_v19 = vpop.f32.mrb[107].mxu1  ;;  %1949 = vmatmul.mubr.f32.gmra.mrb[212].mxu1 %v1380_v7  ;;  %v443_v24 = vadd.f32 %v4340_v37, %v4531_v14  ;;  %v449_v37 = vadd.f32 %v4345_v6, %v4531_v14 }
 0x208   :  { %v724_v62 = vadd.f32 %v723_v19, %v4463_v30  ;;  %1954 = vmatprep.mubr.f32.mxu1 %v1389_v16  ;;  %2265 = vmatprep.mubr.f32.mxu0 %v1463_v43 }
 0x209   :  { %2266 = vmatmul.mubr.f32.gmra.mrb[104].mxu0 %v1462_v12  ;;  %v1470_v34 = vmax.f32 %v722_v42, 0.0  ;;  %v1404_v12 = vmax.f32 %v417_v22, 0.0  ;;  %v1413_v42 = vmax.f32 %v425_v0, 0.0  ;;  %v1429_v0 = vmax.f32 %v437_v13, 0.0 }
 0x20a   :  { %v1471_v8 = vmax.f32 %v724_v62, 0.0  ;;  %v727_v3 = vpop.f32.mrb[108].mxu1 }
 0x20b   :  { %v728_v54 = vadd.f32 %v727_v3, %v4459_v33  ;;  %v729_v11 = vpop.f32.mrb[109].mxu1  ;;  %1955 = vmatmul.mubr.f32.gmra.mrb[214].mxu1 %v1388_v47  ;;  %v1421_v3 = vmax.f32 %v431_v36, 0.0 }
 0x20c   :  { %v730_v57 = vadd.f32 %v729_v11, %v4463_v30  ;;  %1960 = vmatprep.mubr.f32.mxu1 %v1397_v50  ;;  %2271 = vmatprep.mubr.f32.mxu0 %v1471_v8  ;;  %v1412_v8 = vmax.f32 %v423_v10, 0.0  ;;  %v1437_v10 = vmax.f32 %v443_v24, 0.0 }
 0x20d   :  { %2272 = vmatmul.mubr.f32.gmra.mrb[106].mxu0 %v1470_v34  ;;  %v1478_v16 = vmax.f32 %v728_v54, 0.0 }
 0x20e   :  { %v1479_v7 = vmax.f32 %v730_v57, 0.0  ;;  %v733_v55 = vpop.f32.mrb[110].mxu1 }
 0x20f   :  { %v734_v5 = vadd.f32 %v733_v55, %v4459_v33  ;;  %v735_v43 = vpop.f32.mrb[111].mxu1  ;;  %1961 = vmatmul.mubr.f32.gmra.mrb[216].mxu1 %v1396_v21 }
 0x210   :  { %v736_v23 = vadd.f32 %v735_v43, %v4463_v30  ;;  %1966 = vmatprep.mubr.f32.mxu1 %v1405_v35  ;;  %2277 = vmatprep.mubr.f32.mxu0 %v1479_v7  ;;  %v1420_v35 = vmax.f32 %v429_v29, 0.0  ;;  %v5556_v29 = vld [vmem:[#allocation15_spill] sm:$0xff] }
 0x211   :  { %2278 = vmatmul.mubr.f32.gmra.mrb[108].mxu0 %v1478_v16  ;;  %v1486_v47 = vmax.f32 %v734_v5, 0.0  ;;  %v455_v6 = vadd.f32 %v5556_v29, %v4531_v14  ;;  %v4733_v29 = vld [vmem:[%s5469_s2] sm:$0xff] }
 0x212   :  { %v1487_v19 = vmax.f32 %v736_v23, 0.0  ;;  %v739_v62 = vpop.f32.mrb[112].mxu1 }
 0x213   :  { %v740_v39 = vadd.f32 %v739_v62, %v4459_v33  ;;  %v741_v50 = vpop.f32.mrb[113].mxu1  ;;  %1967 = vmatmul.mubr.f32.gmra.mrb[218].mxu1 %v1404_v12  ;;  %v1428_v12 = vmax.f32 %v435_v46, 0.0  ;;  %v1453_v46 = vmax.f32 %v455_v6, 0.0 }
 0x214   :  { %v742_v56 = vadd.f32 %v741_v50, %v4463_v30  ;;  %1972 = vmatprep.mubr.f32.mxu1 %v1413_v42  ;;  %2283 = vmatprep.mubr.f32.mxu0 %v1487_v19  ;;  %v1436_v50 = vmax.f32 %v441_v52, 0.0 }
 0x215   :  { %2284 = vmatmul.mubr.f32.gmra.mrb[110].mxu0 %v1486_v47  ;;  %v1494_v11 = vmax.f32 %v740_v39, 0.0 }
 0x216   :  { %v1495_v34 = vmax.f32 %v742_v56, 0.0  ;;  %v745_v54 = vpop.f32.mrb[114].mxu1  ;;  %v5555_v56 = vld [vmem:[#allocation13_spill] sm:$0xff] }
 0x217   :  { %v746_v57 = vadd.f32 %v745_v54, %v4459_v33  ;;  %v747_v21 = vpop.f32.mrb[115].mxu1  ;;  %1973 = vmatmul.mubr.f32.gmra.mrb[220].mxu1 %v1412_v8  ;;  %v447_v32 = vadd.f32 %v5555_v56, %v4540_v53  ;;  %v1445_v8 = vmax.f32 %v449_v37, 0.0  ;;  %v5560_v37 = vld [vmem:[#allocation16_spill] sm:$0xff] }
 0x218   :  { %v748_v22 = vadd.f32 %v747_v21, %v4463_v30  ;;  %1978 = vmatprep.mubr.f32.mxu1 %v1421_v3  ;;  %2289 = vmatprep.mubr.f32.mxu0 %v1495_v34 }
 0x219   :  { %2290 = vmatmul.mubr.f32.gmra.mrb[112].mxu0 %v1494_v11  ;;  %v1502_v16 = vmax.f32 %v746_v57, 0.0  ;;  %v1444_v21 = vmax.f32 %v447_v32, 0.0 }
 0x21a   :  { %v1503_v7 = vmax.f32 %v748_v22, 0.0  ;;  %v751_v55 = vpop.f32.mrb[116].mxu1  ;;  %v5557_v22 = vld [vmem:[#allocation14_spill] sm:$0xff] }
 0x21b   :  { %v752_v5 = vadd.f32 %v751_v55, %v4459_v33  ;;  %v753_v43 = vpop.f32.mrb[117].mxu1  ;;  %1979 = vmatmul.mubr.f32.gmra.mrb[222].mxu1 %v1420_v35  ;;  %v453_v35 = vadd.f32 %v5557_v22, %v4540_v53 }
 0x21c   :  { %v754_v23 = vadd.f32 %v753_v43, %v4463_v30  ;;  %1984 = vmatprep.mubr.f32.mxu1 %v1429_v0  ;;  %2295 = vmatprep.mubr.f32.mxu0 %v1503_v7  ;;  %v5558_v0 = vld [vmem:[#allocation17_spill] sm:$0xff] }
 0x21d   :  { %2296 = vmatmul.mubr.f32.gmra.mrb[114].mxu0 %v1502_v16  ;;  %v1510_v19 = vmax.f32 %v752_v5, 0.0  ;;  %v461_v24 = vadd.f32 %v5558_v0, %v4531_v14 }
 0x21e   :  { %v1511_v42 = vmax.f32 %v754_v23, 0.0  ;;  %v757_v36 = vpop.f32.mrb[118].mxu1  ;;  %v5559_v23 = vld [vmem:[#allocation51_spill] sm:$0xff] }
 0x21f   :  { %v758_v62 = vadd.f32 %v757_v36, %v4459_v33  ;;  %v759_v47 = vpop.f32.mrb[119].mxu1  ;;  %1985 = vmatmul.mubr.f32.gmra.mrb[224].mxu1 %v1428_v12  ;;  %v254_v12 = vsub.s32 5, %v5559_v23  ;;  %v1461_v36 = vmax.f32 %v461_v24, 0.0 }
 0x220   :  { %v760_v39 = vadd.f32 %v759_v47, %v4463_v30  ;;  %1990 = vmatprep.mubr.f32.mxu1 %v1437_v10  ;;  %2301 = vmatprep.mubr.f32.mxu0 %v1511_v42  ;;  %v1452_v10 = vmax.f32 %v453_v35, 0.0  ;;  %v459_v42 = vadd.f32 %v5560_v37, %v4540_v53  ;;  %v5566_v37 = vld [vmem:[#allocation25_spill] sm:$0xff] }
 0x221   :  { %2302 = vmatmul.mubr.f32.gmra.mrb[116].mxu0 %v1510_v19  ;;  %v1518_v34 = vmax.f32 %v758_v62, 0.0  ;;  %v5561_v19 = vld [vmem:[#allocation19_spill] sm:$0xff]  ;;  %v4736_v6 = vrot.slane %v4733_v29, %v254_v12  ;;  %v5565_v12 = vld [vmem:[#allocation20_spill] sm:$0xff] }
 0x222   :  { %v1519_v3 = vmax.f32 %v760_v39, 0.0  ;;  %v763_v13 = vpop.f32.mrb[120].mxu1  ;;  %v467_v62 = vadd.f32 %v5561_v19, %v4531_v14  ;;  %v5567_v19 = vld [vmem:[#allocation22_spill] sm:$0xff] }
 0x223   :  { %v764_v54 = vadd.f32 %v763_v13, %v4459_v33  ;;  %v765_v11 = vpop.f32.mrb[121].mxu1  ;;  %1991 = vmatmul.mubr.f32.gmra.mrb[226].mxu1 %v1436_v50  ;;  %v250_v50 = vsub.s32 4, %v5559_v23  ;;  %v1460_v13 = vmax.f32 %v459_v42, 0.0  ;;  %v479_v42 = vadd.f32 %v5566_v37, %v4531_v14 }
 0x224   :  { %v766_v57 = vadd.f32 %v765_v11, %v4463_v30  ;;  %1996 = vmatprep.mubr.f32.mxu1 %v1445_v8  ;;  %2307 = vmatprep.mubr.f32.mxu0 %v1519_v3  ;;  %v1469_v11 = vmax.f32 %v467_v62, 0.0 }
 0x225   :  { %2308 = vmatmul.mubr.f32.gmra.mrb[118].mxu0 %v1518_v34  ;;  %v1526_v16 = vmax.f32 %v764_v54, 0.0  ;;  %v5562_v34 = vld [vmem:[#allocation18_spill] sm:$0xff] }
 0x226   :  { %v1527_v7 = vmax.f32 %v766_v57, 0.0  ;;  %v769_v55 = vpop.f32.mrb[122].mxu1  ;;  %v465_v54 = vadd.f32 %v5562_v34, %v4540_v53  ;;  %v5563_v57 = vld [vmem:[#allocation21_spill] sm:$0xff] }
 0x227   :  { %v770_v5 = vadd.f32 %v769_v55, %v4459_v33  ;;  %v771_v43 = vpop.f32.mrb[123].mxu1  ;;  %1997 = vmatmul.mubr.f32.gmra.mrb[228].mxu1 %v1444_v21  ;;  %v473_v21 = vadd.f32 %v5563_v57, %v4531_v14  ;;  %v5564_v55 = vld [vmem:[#allocation23_spill] sm:$0xff]  ;;  %v1485_v57 = vmax.f32 %v479_v42, 0.0  ;;  %v1757_v42 = vld [vmem:[#allocation8 + $0x648] sm:$0xff] }
 0x228   :  { %v772_v52 = vadd.f32 %v771_v43, %v4463_v30  ;;  %2002 = vmatprep.mubr.f32.mxu1 %v1453_v46  ;;  %2313 = vmatprep.mubr.f32.mxu0 %v1527_v7  ;;  %v4744_v46 = vrot.slane %v4733_v29, %v250_v50  ;;  %v1468_v43 = vmax.f32 %v465_v54, 0.0  ;;  %v5569_v54 = vld [vmem:[#allocation24_spill] sm:$0xff] }
 0x229   :  { %2314 = vmatmul.mubr.f32.gmra.mrb[120].mxu0 %v1526_v16  ;;  %v1534_v56 = vmax.f32 %v770_v5, 0.0  ;;  %v855_v16 = vadd.f32 %v5564_v55, %v4736_v6 }
 0x22a   :  { %v1535_v47 = vmax.f32 %v772_v52, 0.0  ;;  %v775_v39 = vpop.f32.mrb[124].mxu1  ;;  %v471_v52 = vadd.f32 %v5565_v12, %v4540_v53  ;;  %v853_v62 = vadd.f32 %v5567_v19, %v4744_v46 }
 0x22b   :  { %v776_v32 = vadd.f32 %v775_v39, %v4459_v33  ;;  %v777_v8 = vpop.f32.mrb[125].mxu1  ;;  %2003 = vmatmul.mubr.f32.gmra.mrb[230].mxu1 %v1452_v10  ;;  %v1477_v10 = vmax.f32 %v473_v21, 0.0  ;;  %v1750_v39 = vld [vmem:[#allocation8 + $0x610] sm:$0xff]  ;;  %v5570_v21 = vld [vmem:[#allocation29_spill] sm:$0xff] }
 0x22c   :  { %v778_v3 = vadd.f32 %v777_v8, %v4463_v30  ;;  %2008 = vmatprep.mubr.f32.mxu1 %v1461_v36  ;;  %2319 = vmatprep.mubr.f32.mxu0 %v1535_v47  ;;  %v1476_v34 = vmax.f32 %v471_v52, 0.0 }
 0x22d   :  { %2320 = vmatmul.mubr.f32.gmra.mrb[122].mxu0 %v1534_v56  ;;  %v1542_v0 = vmax.f32 %v776_v32, 0.0  ;;  %v1305_v56 = vmax.f32 %v855_v16, 0.0  ;;  %v5568_v32 = vld [vmem:[#allocation27_spill] sm:$0xff] }
 0x22e   :  { %v1543_v22 = vmax.f32 %v778_v3, 0.0  ;;  %v781_v35 = vpop.f32.mrb[126].mxu1  ;;  %v861_v8 = vadd.f32 %v5568_v32, %v4736_v6  ;;  %v1753_v3 = vld [vmem:[#allocation8 + $0x628] sm:$0xff] }
 0x22f   :  { %v782_v24 = vadd.f32 %v781_v35, %v4459_v33  ;;  %v783_v7 = vpop.f32.mrb[127].mxu1  ;;  %2009 = vmatmul.mubr.f32.gmra.mrb[232].mxu1 %v1460_v13  ;;  %v1755_v13 = vld [vmem:[#allocation8 + $0x638] sm:$0xff] }
 0x230   :  { %v784_v5 = vadd.f32 %v783_v7, %v4463_v30  ;;  %2014 = vmatprep.mubr.f32.mxu1 %v1469_v11  ;;  %2325 = vmatprep.mubr.f32.mxu0 %v1543_v22  ;;  %v1748_v30 = vld [vmem:[#allocation8 + $0x600] sm:$0xff]  ;;  %v477_v11 = vadd.f32 %v5569_v54, %v4540_v53  ;;  %v485_v22 = vadd.f32 %v5570_v21, %v4531_v14  ;;  %v5571_v7 = vld [vmem:[#allocation26_spill] sm:$0xff]  ;;  %v1313_v52 = vmax.f32 %v861_v8, 0.0 }
 0x231   :  { %2326 = vmatmul.mubr.f32.gmra.mrb[124].mxu0 %v1542_v0  ;;  %v1550_v47 = vmax.f32 %v782_v24, 0.0  ;;  %v3384_v35 = vpack.c.bf16 %v1750_v39, %v1748_v30  ;;  %v1304_v24 = vmax.f32 %v853_v62, 0.0  ;;  %v859_v55 = vadd.f32 %v5571_v7, %v4744_v46  ;;  %v5574_v39 = vld [vmem:[#allocation33_spill] sm:$0xff] }
 0x232   :  { %v1551_v36 = vmax.f32 %v784_v5, 0.0  ;;  %v4754_v33 = vpop.f32.mrb[128].mxu1  ;;  %v3386_v16 = vpack.c.bf16 %v1755_v13, %v1753_v3  ;;  %v1752_v5 = vld [vmem:[#allocation8 + $0x620] sm:$0xff]  ;;  %v1484_v19 = vmax.f32 %v477_v11, 0.0  ;;  %v1493_v30 = vmax.f32 %v485_v22, 0.0  ;;  %v5575_v13 = vld [vmem:[#allocation30_spill] sm:$0xff] }
 0x233   :  { %2015 = vmatmul.mubr.f32.gmra.mrb[234].mxu1 %v1468_v43  ;;  %v4758_v50 = vpop.f32.mrb[129].mxu1  ;;  %v1754_v43 = vld [vmem:[#allocation8 + $0x630] sm:$0xff]  ;;  %v1312_v8 = vmax.f32 %v859_v55, 0.0  ;;  %v1756_v11 = vld [vmem:[#allocation8 + $0x640] sm:$0xff] }
 0x234   :  { %2020 = vmatprep.mubr.f32.mxu1 %v1477_v10  ;;  %2331 = vmatprep.mubr.f32.mxu0 %v1551_v36  ;;  %v5572_v10 = vld [vmem:[#allocation31_spill] sm:$0xff]  ;;  %v3388_v32 = vpack.c.bf16 %v1754_v43, %v1752_v5  ;;  %v5577_v55 = vld [vmem:[#allocation32_spill] sm:$0xff] }
 0x235   :  { %2332 = vmatmul.mubr.f32.gmra.mrb[126].mxu0 %v1550_v47  ;;  %v867_v37 = vadd.f32 %v5572_v10, %v4736_v6  ;;  %v1759_v36 = vld [vmem:[#allocation8 + $0x658] sm:$0xff] }
 0x236   :  { %2402 = vmatprep.mubr.f32.mxu0 %v1305_v56  ;;  %v4766_v0 = vpop.f32.mrb[130].mxu1  ;;  %v5573_v47 = vld [vmem:[#allocation28_spill] sm:$0xff]  ;;  %v491_v56 = vadd.f32 %v5574_v39, %v4531_v14  ;;  %v3390_v54 = vpack.c.bf16 %v1759_v36, %v1757_v42 }
 0x237   :  { %2021 = vmatmul.mubr.f32.gmra.mrb[236].mxu1 %v1476_v34  ;;  %v4770_v12 = vpop.f32.mrb[131].mxu1  ;;  %v483_v62 = vadd.f32 %v5573_v47, %v4540_v53  ;;  %v865_v34 = vadd.f32 %v5575_v13, %v4744_v46  ;;  %v1321_v22 = vmax.f32 %v867_v37, 0.0  ;;  %v1763_v5 = vld [vmem:[#allocation8 + $0x678] sm:$0xff]  ;;  %v5580_v47 = vld [vmem:[#allocation34_spill] sm:$0xff]  ;;  %v1760_v39 = vld [vmem:[#allocation8 + $0x660] sm:$0xff] }
 0x238   :  { %2026 = vmatprep.mubr.f32.mxu1 %v1485_v57  ;;  %v1758_v57 = vld [vmem:[#allocation8 + $0x650] sm:$0xff]  ;;  %v1501_v10 = vmax.f32 %v491_v56, 0.0 }
 0x239   :  { %2403 = vmatmul.mubr.f32.vlgmr.msra.gmra.mrb[64].mxu0 %v1304_v24  ;;  %v5576_v24 = vld [vmem:[#allocation35_spill] sm:$0xff]  ;;  %v1492_v43 = vmax.f32 %v483_v62, 0.0  ;;  %v3392_v36 = vpack.c.bf16 %v1758_v57, %v1756_v11  ;;  %v1320_v37 = vmax.f32 %v865_v34, 0.0  ;;  %v5582_v34 = vld [vmem:[#allocation36_spill] sm:$0xff] }
 0x23a   :  { %2408 = vmatprep.mubr.f32.mxu0 %v1313_v52  ;;  %3385 = vmatpush1.bf16.msra.mxu0 %v3384_v35  ;;  %v4778_v3 = vpop.f32.mrb[132].mxu1  ;;  %v873_v7 = vadd.f32 %v5576_v24, %v4736_v6  ;;  %v1761_v35 = vld [vmem:[#allocation8 + $0x668] sm:$0xff]  ;;  %v489_v52 = vadd.f32 %v5577_v55, %v4540_v53  ;;  %v1762_v13 = vld [vmem:[#allocation8 + $0x670] sm:$0xff]  ;;  %v1767_v11 = vld [vmem:[#allocation8 + $0x698] sm:$0xff] }
 0x23b   :  { %2027 = vmatmul.mubr.f32.gmra.mrb[238].mxu1 %v1484_v19  ;;  %3387 = vmatprep.subr.bf16.mxu0 %v3386_v16  ;;  %v4782_v21 = vpop.f32.mrb[133].mxu1  ;;  %v5578_v16 = vld [vmem:[#allocation37_spill] sm:$0xff]  ;;  %v3394_v62 = vpack.c.bf16 %v1763_v5, %v1761_v35  ;;  %v3396_v5 = vpack.c.bf16 %v1762_v13, %v1760_v39  ;;  %v1771_v39 = vld [vmem:[#allocation8 + $0x6b8] sm:$0xff] }
 0x23c   :  { %2032 = vmatprep.mubr.f32.mxu1 %v1493_v30  ;;  %v497_v42 = vadd.f32 %v5578_v16, %v4531_v14  ;;  %v871_v30 = vadd.f32 %v5580_v47, %v4744_v46  ;;  %v1329_v56 = vmax.f32 %v873_v7, 0.0  ;;  %v1500_v57 = vmax.f32 %v489_v52, 0.0  ;;  %v5585_v47 = vld [vmem:[#allocation38_spill] sm:$0xff] }
 0x23d   :  { %2409 = vmatmul.mubr.f32.gmra.mrb[66].mxu0 %v1312_v8  ;;  %v5581_v8 = vld [vmem:[#allocation39_spill] sm:$0xff] }
 0x23e   :  { %2414 = vmatprep.mubr.f32.mxu0 %v1321_v22  ;;  %3389 = vmatpush1.bf16.msra.mxu0 %v3388_v32  ;;  %v4790_v19 = vpop.f32.mrb[134].mxu1  ;;  %v879_v55 = vadd.f32 %v5581_v8, %v4736_v6  ;;  %v1765_v32 = vld [vmem:[#allocation8 + $0x688] sm:$0xff]  ;;  %v495_v22 = vadd.f32 %v5582_v34, %v4540_v53  ;;  %v1509_v16 = vmax.f32 %v497_v42, 0.0  ;;  %v1328_v7 = vmax.f32 %v871_v30, 0.0  ;;  %v1764_v8 = vld [vmem:[#allocation8 + $0x680] sm:$0xff] }
 0x23f   :  { %5579 = vst [vmem:[#allocation13_spill] sm:$0xff] %v4790_v19  ;;  %2033 = vmatmul.mubr.f32.gmra.mrb[240].mxu1 %v1492_v43  ;;  %3391 = vmatprep.subr.bf16.mxu0 %v3390_v54  ;;  %v4794_v24 = vpop.f32.mrb[135].mxu1  ;;  %v5583_v54 = vld [vmem:[#allocation41_spill] sm:$0xff]  ;;  %v3398_v52 = vpack.c.bf16 %v1767_v11, %v1765_v32  ;;  %v1766_v19 = vld [vmem:[#allocation8 + $0x690] sm:$0xff]  ;;  %v5588_v30 = vld [vmem:[#allocation40_spill] sm:$0xff] }
 0x240   :  { %2038 = vmatprep.mubr.f32.mxu1 %v1501_v10  ;;  %v503_v35 = vadd.f32 %v5583_v54, %v4531_v14  ;;  %v877_v10 = vadd.f32 %v5585_v47, %v4744_v46  ;;  %v1337_v42 = vmax.f32 %v879_v55, 0.0  ;;  %v1508_v13 = vmax.f32 %v495_v22, 0.0 }
 0x241   :  { %2415 = vmatmul.mubr.f32.gmra.mrb[68].mxu0 %v1320_v37  ;;  %v5587_v37 = vld [vmem:[#allocation43_spill] sm:$0xff]  ;;  %v3400_v11 = vpack.c.bf16 %v1766_v19, %v1764_v8 }
 0x242   :  { %2420 = vmatprep.mubr.f32.mxu0 %v1329_v56  ;;  %3393 = vmatpush1.bf16.msra.mxu0 %v3392_v36  ;;  %v4802_v43 = vpop.f32.mrb[136].mxu1  ;;  %v885_v54 = vadd.f32 %v5587_v37, %v4736_v6  ;;  %v1769_v36 = vld [vmem:[#allocation8 + $0x6a8] sm:$0xff]  ;;  %v501_v56 = vadd.f32 %v5588_v30, %v4540_v53  ;;  %v1517_v47 = vmax.f32 %v503_v35, 0.0  ;;  %v1336_v55 = vmax.f32 %v877_v10, 0.0  ;;  %v1775_v19 = vld [vmem:[#allocation8 + $0x6d8] sm:$0xff] }
 0x243   :  { %5584 = vst [vmem:[#allocation15_spill] sm:$0xff] %v4802_v43  ;;  %2039 = vmatmul.mubr.f32.gmra.mrb[242].mxu1 %v1500_v57  ;;  %3395 = vmatprep.subr.bf16.mxu0 %v3394_v62  ;;  %v4806_v34 = vpop.f32.mrb[137].mxu1  ;;  %v5589_v62 = vld [vmem:[#allocation45_spill] sm:$0xff]  ;;  %v5591_v37 = vld [vmem:[#allocation42_spill] sm:$0xff]  ;;  %v3402_v22 = vpack.c.bf16 %v1771_v39, %v1769_v36  ;;  %v5594_v10 = vld [vmem:[#allocation44_spill] sm:$0xff] }
 0x244   :  { %5586 = vst [vmem:[#allocation14_spill] sm:$0xff] %v4806_v34  ;;  %2044 = vmatprep.mubr.f32.mxu1 %v1509_v16  ;;  %v509_v32 = vadd.f32 %v5589_v62, %v4531_v14  ;;  %v883_v16 = vadd.f32 %v5591_v37, %v4744_v46  ;;  %v1768_v43 = vld [vmem:[#allocation8 + $0x6a0] sm:$0xff]  ;;  %v1770_v34 = vld [vmem:[#allocation8 + $0x6b0] sm:$0xff]  ;;  %v1345_v35 = vmax.f32 %v885_v54, 0.0  ;;  %v1516_v8 = vmax.f32 %v501_v56, 0.0 }
 0x245   :  { %2421 = vmatmul.mubr.f32.gmra.mrb[70].mxu0 %v1328_v7  ;;  %v5593_v7 = vld [vmem:[#allocation47_spill] sm:$0xff]  ;;  %v3404_v39 = vpack.c.bf16 %v1770_v34, %v1768_v43 }
 0x246   :  { %2426 = vmatprep.mubr.f32.mxu0 %v1337_v42  ;;  %3397 = vmatpush1.bf16.msra.mxu0 %v3396_v5  ;;  %v4814_v57 = vpop.f32.mrb[138].mxu1  ;;  %v891_v62 = vadd.f32 %v5593_v7, %v4736_v6  ;;  %v1773_v5 = vld [vmem:[#allocation8 + $0x6c8] sm:$0xff]  ;;  %v507_v42 = vadd.f32 %v5594_v10, %v4540_v53  ;;  %v1525_v37 = vmax.f32 %v509_v32, 0.0  ;;  %v1344_v54 = vmax.f32 %v883_v16, 0.0  ;;  %v1779_v43 = vld [vmem:[#allocation8 + $0x6f8] sm:$0xff] }
 0x247   :  { %5590 = vst [vmem:[#allocation17_spill] sm:$0xff] %v4814_v57  ;;  %2045 = vmatmul.mubr.f32.gmra.mrb[244].mxu1 %v1508_v13  ;;  %3399 = vmatprep.subr.bf16.mxu0 %v3398_v52  ;;  %v4818_v30 = vpop.f32.mrb[139].mxu1  ;;  %v5595_v52 = vld [vmem:[#allocation49_spill] sm:$0xff]  ;;  %v5597_v7 = vld [vmem:[#allocation46_spill] sm:$0xff]  ;;  %v3406_v56 = vpack.c.bf16 %v1775_v19, %v1773_v5  ;;  %v5600_v16 = vld [vmem:[#allocation48_spill] sm:$0xff] }
 0x248   :  { %5592 = vst [vmem:[#allocation16_spill] sm:$0xff] %v4818_v30  ;;  %2050 = vmatprep.mubr.f32.mxu1 %v1517_v47  ;;  %v515_v36 = vadd.f32 %v5595_v52, %v4531_v14  ;;  %v889_v47 = vadd.f32 %v5597_v7, %v4744_v46  ;;  %v1772_v57 = vld [vmem:[#allocation8 + $0x6c0] sm:$0xff]  ;;  %v1774_v30 = vld [vmem:[#allocation8 + $0x6d0] sm:$0xff]  ;;  %v1353_v32 = vmax.f32 %v891_v62, 0.0  ;;  %v1524_v34 = vmax.f32 %v507_v42, 0.0 }
 0x249   :  { %2427 = vmatmul.mubr.f32.gmra.mrb[72].mxu0 %v1336_v55  ;;  %v5599_v55 = vld [vmem:[#allocation52_spill] sm:$0xff]  ;;  %v3408_v19 = vpack.c.bf16 %v1774_v30, %v1772_v57 }
 0x24a   :  { %2432 = vmatprep.mubr.f32.mxu0 %v1345_v35  ;;  %3401 = vmatpush1.bf16.msra.mxu0 %v3400_v11  ;;  %v4826_v13 = vpop.f32.mrb[140].mxu1  ;;  %v897_v52 = vadd.f32 %v5599_v55, %v4736_v6  ;;  %v1777_v11 = vld [vmem:[#allocation8 + $0x6e8] sm:$0xff]  ;;  %v513_v35 = vadd.f32 %v5600_v16, %v4540_v53  ;;  %v1533_v7 = vmax.f32 %v515_v36, 0.0  ;;  %v1352_v62 = vmax.f32 %v889_v47, 0.0  ;;  %v1783_v57 = vld [vmem:[#allocation8 + $0x718] sm:$0xff] }
 0x24b   :  { %5596 = vst [vmem:[#allocation19_spill] sm:$0xff] %v4826_v13  ;;  %2051 = vmatmul.mubr.f32.gmra.mrb[246].mxu1 %v1516_v8  ;;  %3403 = vmatprep.subr.bf16.mxu0 %v3402_v22  ;;  %v4830_v10 = vpop.f32.mrb[141].mxu1  ;;  %v5601_v22 = vld [vmem:[#allocation54_spill] sm:$0xff]  ;;  %v3410_v42 = vpack.c.bf16 %v1779_v43, %v1777_v11  ;;  %v1776_v13 = vld [vmem:[#allocation8 + $0x6e0] sm:$0xff] }
 0x24c   :  { %5598 = vst [vmem:[#allocation18_spill] sm:$0xff] %v4830_v10  ;;  %2056 = vmatprep.mubr.f32.mxu1 %v1525_v37  ;;  %v521_v5 = vadd.f32 %v5601_v22, %v4531_v14  ;;  %v5603_v55 = vld [vmem:[#allocation50_spill] sm:$0xff]  ;;  %v1361_v36 = vmax.f32 %v897_v52, 0.0  ;;  %v1532_v30 = vmax.f32 %v513_v35, 0.0  ;;  %v5606_v47 = vld [vmem:[#allocation53_spill] sm:$0xff] }
 0x24d   :  { %2433 = vmatmul.mubr.f32.gmra.mrb[74].mxu0 %v1344_v54  ;;  %v895_v37 = vadd.f32 %v5603_v55, %v4744_v46  ;;  %v1778_v10 = vld [vmem:[#allocation8 + $0x6f0] sm:$0xff]  ;;  %v5605_v54 = vld [vmem:[#allocation56_spill] sm:$0xff] }
 0x24e   :  { %2438 = vmatprep.mubr.f32.mxu0 %v1353_v32  ;;  %3405 = vmatpush1.bf16.msra.mxu0 %v3404_v39  ;;  %v4838_v8 = vpop.f32.mrb[142].mxu1  ;;  %v903_v22 = vadd.f32 %v5605_v54, %v4736_v6  ;;  %v1781_v39 = vld [vmem:[#allocation8 + $0x708] sm:$0xff]  ;;  %v519_v32 = vadd.f32 %v5606_v47, %v4540_v53  ;;  %v1541_v55 = vmax.f32 %v521_v5, 0.0  ;;  %v3412_v43 = vpack.c.bf16 %v1778_v10, %v1776_v13  ;;  %v5609_v54 = vld [vmem:[#allocation55_spill] sm:$0xff] }
 0x24f   :  { %5602 = vst [vmem:[#allocation21_spill] sm:$0xff] %v4838_v8  ;;  %2057 = vmatmul.mubr.f32.gmra.mrb[248].mxu1 %v1524_v34  ;;  %3407 = vmatprep.subr.bf16.mxu0 %v3406_v56  ;;  %v4842_v16 = vpop.f32.mrb[143].mxu1  ;;  %v5607_v56 = vld [vmem:[#allocation58_spill] sm:$0xff]  ;;  %v1360_v52 = vmax.f32 %v895_v37, 0.0  ;;  %v3414_v35 = vpack.c.bf16 %v1783_v57, %v1781_v39  ;;  %v1780_v8 = vld [vmem:[#allocation8 + $0x700] sm:$0xff]  ;;  %v1787_v13 = vld [vmem:[#allocation8 + $0x738] sm:$0xff] }
 0x250   :  { %5604 = vst [vmem:[#allocation23_spill] sm:$0xff] %v4842_v16  ;;  %2062 = vmatprep.mubr.f32.mxu1 %v1533_v7  ;;  %v527_v11 = vadd.f32 %v5607_v56, %v4531_v14  ;;  %v901_v7 = vadd.f32 %v5609_v54, %v4744_v46  ;;  %v1782_v16 = vld [vmem:[#allocation8 + $0x710] sm:$0xff]  ;;  %v1369_v5 = vmax.f32 %v903_v22, 0.0  ;;  %v1540_v10 = vmax.f32 %v519_v32, 0.0  ;;  %v5611_v37 = vld [vmem:[#allocation57_spill] sm:$0xff] }
 0x251   :  { %2439 = vmatmul.mubr.f32.gmra.mrb[76].mxu0 %v1352_v62  ;;  %v5610_v62 = vld [vmem:[#allocation60_spill] sm:$0xff]  ;;  %v5612_v22 = vld [vmem:[#allocation59_spill] sm:$0xff] }
 0x252   :  { %2444 = vmatprep.mubr.f32.mxu0 %v1361_v36  ;;  %3409 = vmatpush1.bf16.msra.mxu0 %v3408_v19  ;;  %v4850_v34 = vpop.f32.mrb[144].mxu1  ;;  %v909_v14 = vadd.f32 %v5610_v62, %v4736_v6  ;;  %v1785_v19 = vld [vmem:[#allocation8 + $0x728] sm:$0xff]  ;;  %v525_v36 = vadd.f32 %v5611_v37, %v4540_v53  ;;  %v1549_v56 = vmax.f32 %v527_v11, 0.0  ;;  %v1368_v57 = vmax.f32 %v901_v7, 0.0  ;;  %v1784_v54 = vld [vmem:[#allocation8 + $0x720] sm:$0xff]  ;;  %v1786_v62 = vld [vmem:[#allocation8 + $0x730] sm:$0xff] }
 0x253   :  { %5608 = vst [vmem:[#allocation20_spill] sm:$0xff] %v4850_v34  ;;  %2063 = vmatmul.mubr.f32.gmra.mrb[250].mxu1 %v1532_v30  ;;  %3411 = vmatprep.subr.bf16.mxu0 %v3410_v42  ;;  %v4854_v47 = vpop.f32.mrb[145].mxu1  ;;  %v3416_v42 = vpack.c.bf16 %v1782_v16, %v1780_v8  ;;  %v907_v30 = vadd.f32 %v5612_v22, %v4744_v46  ;;  %v5613_v53 = vld [vmem:[#allocation62_spill] sm:$0xff]  ;;  %v1791_v8 = vld [vmem:[#allocation8 + $0x758] sm:$0xff] }
 0x254   :  { %2068 = vmatprep.mubr.f32.mxu1 %v1541_v55  ;;  %v3418_v55 = vpack.c.bf16 %v1787_v13, %v1785_v19  ;;  %v1377_v34 = vmax.f32 %v909_v14, 0.0  ;;  %v915_v11 = vadd.f32 %v5613_v53, %v4736_v6  ;;  %v1548_v16 = vmax.f32 %v525_v36, 0.0  ;;  %v1790_v37 = vld [vmem:[#allocation8 + $0x750] sm:$0xff]  ;;  %v5616_v36 = vld [vmem:[#allocation64_spill] sm:$0xff] }
 0x255   :  { %2445 = vmatmul.mubr.f32.gmra.mrb[78].mxu0 %v1360_v52  ;;  %v3420_v52 = vpack.c.bf16 %v1786_v62, %v1784_v54 }
 0x256   :  { %2450 = vmatprep.mubr.f32.mxu0 %v1369_v5  ;;  %3413 = vmatpush1.bf16.msra.mxu0 %v3412_v43  ;;  %v4860_v39 = vpop.f32.mrb[146].mxu1  ;;  %v1789_v43 = vld [vmem:[#allocation8 + $0x748] sm:$0xff] }
 0x257   :  { %2069 = vmatmul.mubr.f32.gmra.mrb[252].mxu1 %v1540_v10  ;;  %3415 = vmatprep.subr.bf16.mxu0 %v3414_v35  ;;  %v4864_v32 = vpop.f32.mrb[147].mxu1  ;;  %v1376_v35 = vmax.f32 %v907_v30, 0.0  ;;  %v5615_v5 = vld [vmem:[#allocation61_spill] sm:$0xff]  ;;  %v3422_v13 = vpack.c.bf16 %v1791_v8, %v1789_v43  ;;  %v1794_v8 = vld [vmem:[#allocation8 + $0x770] sm:$0xff] }
 0x258   :  { %2074 = vmatprep.mubr.f32.mxu1 %v1549_v56  ;;  %v913_v19 = vadd.f32 %v5615_v5, %v4744_v46  ;;  %v1788_v10 = vld [vmem:[#allocation8 + $0x740] sm:$0xff]  ;;  %v1385_v56 = vmax.f32 %v915_v11, 0.0  ;;  %v5619_v5 = vld [vmem:[#allocation66_spill] sm:$0xff] }
 0x259   :  { %2451 = vmatmul.mubr.f32.gmra.mrb[80].mxu0 %v1368_v57  ;;  %v921_v57 = vadd.f32 %v5616_v36, %v4736_v6  ;;  %v3424_v30 = vpack.c.bf16 %v1790_v37, %v1788_v10  ;;  %v1792_v11 = vld [vmem:[#allocation8 + $0x760] sm:$0xff]  ;;  %v927_v36 = vadd.f32 %v5619_v5, %v4736_v6 }
 0x25a   :  { %2456 = vmatprep.mubr.f32.mxu0 %v1377_v34  ;;  %3417 = vmatpush1.bf16.msra.mxu0 %v3416_v42  ;;  %v4868_v7 = vpop.f32.mrb[148].mxu1  ;;  %v1793_v34 = vld [vmem:[#allocation8 + $0x768] sm:$0xff]  ;;  %v1795_v42 = vld [vmem:[#allocation8 + $0x778] sm:$0xff]  ;;  %v1384_v54 = vmax.f32 %v913_v19, 0.0  ;;  %v3428_v19 = vpack.c.bf16 %v1794_v8, %v1792_v11 }
 0x25b   :  { %5614 = vst [vmem:[#allocation25_spill] sm:$0xff] %v4868_v7  ;;  %2075 = vmatmul.mubr.f32.gmra.mrb[254].mxu1 %v1548_v16  ;;  %3419 = vmatprep.subr.bf16.mxu0 %v3418_v55  ;;  %v4872_v14 = vpop.f32.mrb[149].mxu1  ;;  %v5618_v55 = vld [vmem:[#allocation63_spill] sm:$0xff]  ;;  %v3426_v43 = vpack.c.bf16 %v1795_v42, %v1793_v34  ;;  %v1393_v16 = vmax.f32 %v921_v57, 0.0  ;;  %v5621_v37 = vld [vmem:[#allocation65_spill] sm:$0xff]  ;;  %v5623_v5 = vld [vmem:[#allocation68_spill] sm:$0xff] }
 0x25c   :  { %v919_v62 = vadd.f32 %v5618_v55, %v4744_v46  ;;  %v925_v55 = vadd.f32 %v5621_v37, %v4744_v46  ;;  %v1796_v57 = vld [vmem:[#allocation8 + $0x780] sm:$0xff]  ;;  %v1798_v42 = vld [vmem:[#allocation8 + $0x790] sm:$0xff]  ;;  %v933_v7 = vadd.f32 %v5623_v5, %v4736_v6 }
 0x25d   :  { %2457 = vmatmul.mubr.f32.gmra.mrb[82].mxu0 %v1376_v35  ;;  %v1797_v35 = vld [vmem:[#allocation8 + $0x788] sm:$0xff]  ;;  %v5625_v8 = vld [vmem:[#allocation67_spill] sm:$0xff] }
 0x25e   :  { %2462 = vmatprep.mubr.f32.mxu0 %v1385_v56  ;;  %3421 = vmatpush1.bf16.msra.mxu0 %v3420_v52  ;;  %v4876_v22 = vpop.f32.mrb[150].mxu1  ;;  %v1799_v56 = vld [vmem:[#allocation8 + $0x798] sm:$0xff]  ;;  %v1392_v10 = vmax.f32 %v919_v62, 0.0  ;;  %v3432_v62 = vpack.c.bf16 %v1798_v42, %v1796_v57  ;;  %v1400_v11 = vmax.f32 %v925_v55, 0.0  ;;  %v931_v37 = vadd.f32 %v5625_v8, %v4744_v46  ;;  %v5627_v5 = vld [vmem:[#allocation70_spill] sm:$0xff]  ;;  %v5629_v42 = vld [vmem:[#allocation69_spill] sm:$0xff] }
 0x25f   :  { %5617 = vst [vmem:[#allocation22_spill] sm:$0xff] %v4876_v22  ;;  %v4880_v53 = vpop.f32.mrb[151].mxu1  ;;  %3423 = vmatprep.subr.bf16.mxu0 %v3422_v13  ;;  %v3430_v34 = vpack.c.bf16 %v1799_v56, %v1797_v35  ;;  %v1401_v22 = vmax.f32 %v927_v36, 0.0  ;;  %v1800_v36 = vld [vmem:[#allocation8 + $0x7a0] sm:$0xff]  ;;  %v1802_v56 = vld [vmem:[#allocation8 + $0x7b0] sm:$0xff]  ;;  %v937_v8 = vadd.f32 %v5629_v42, %v4744_v46 }
 0x260   :  { %v3436_v55 = vpack.c.bf16 %v1802_v56, %v1800_v36  ;;  %v1408_v57 = vmax.f32 %v931_v37, 0.0  ;;  %v5632_v56 = vld [vmem:[#allocation71_spill] sm:$0xff] }
 0x261   :  { %2463 = vmatmul.mubr.f32.gmra.mrb[84].mxu0 %v1384_v54  ;;  %v1801_v54 = vld [vmem:[#allocation8 + $0x7a8] sm:$0xff]  ;;  %v1416_v36 = vmax.f32 %v937_v8, 0.0  ;;  %v943_v42 = vadd.f32 %v5632_v56, %v4744_v46 }
 0x262   :  { %2468 = vmatprep.mubr.f32.mxu0 %v1393_v16  ;;  %v4884_v52 = vpop.f32.mrb[152].mxu1  ;;  %3425 = vmatpush1.bf16.msra.mxu0 %v3424_v30  ;;  %v1803_v16 = vld [vmem:[#allocation8 + $0x7b8] sm:$0xff]  ;;  %v5634_v8 = vld [vmem:[#allocation73_spill] sm:$0xff] }
 0x263   :  { %5620 = vst [vmem:[#allocation27_spill] sm:$0xff] %v4884_v52  ;;  %v4888_v13 = vpop.f32.mrb[153].mxu1  ;;  %3427 = vmatprep.subr.bf16.mxu0 %v3426_v43  ;;  %v3434_v35 = vpack.c.bf16 %v1803_v16, %v1801_v54  ;;  %v1409_v52 = vmax.f32 %v933_v7, 0.0  ;;  %v1804_v7 = vld [vmem:[#allocation8 + $0x7c0] sm:$0xff]  ;;  %v1806_v16 = vld [vmem:[#allocation8 + $0x7d0] sm:$0xff] }
 0x264   :  { %5622 = vst [vmem:[#allocation24_spill] sm:$0xff] %v4888_v13  ;;  %v939_v13 = vadd.f32 %v5627_v5, %v4736_v6  ;;  %v5631_v5 = vld [vmem:[#allocation72_spill] sm:$0xff]  ;;  %v3440_v37 = vpack.c.bf16 %v1806_v16, %v1804_v7  ;;  %v949_v7 = vadd.f32 %v5634_v8, %v4744_v46 }
 0x265   :  { %2469 = vmatmul.mubr.f32.gmra.mrb[86].mxu0 %v1392_v10  ;;  %v1805_v10 = vld [vmem:[#allocation8 + $0x7c8] sm:$0xff] }
 0x266   :  { %2474 = vmatprep.mubr.f32.mxu0 %v1401_v22  ;;  %v4892_v30 = vpop.f32.mrb[154].mxu1  ;;  %3429 = vmatpush1.bf16.msra.mxu0 %v3428_v19  ;;  %v1807_v22 = vld [vmem:[#allocation8 + $0x7d8] sm:$0xff] }
 0x267   :  { %5624 = vst [vmem:[#allocation29_spill] sm:$0xff] %v4892_v30  ;;  %v4896_v43 = vpop.f32.mrb[155].mxu1  ;;  %3431 = vmatprep.subr.bf16.mxu0 %v3430_v34  ;;  %v3438_v54 = vpack.c.bf16 %v1807_v22, %v1805_v10  ;;  %v1417_v30 = vmax.f32 %v939_v13, 0.0  ;;  %v1808_v13 = vld [vmem:[#allocation8 + $0x7e0] sm:$0xff]  ;;  %v1810_v22 = vld [vmem:[#allocation8 + $0x7f0] sm:$0xff] }
 0x268   :  { %5626 = vst [vmem:[#allocation26_spill] sm:$0xff] %v4896_v43  ;;  %v945_v43 = vadd.f32 %v5631_v5, %v4736_v6  ;;  %v5633_v5 = vld [vmem:[#allocation75_spill] sm:$0xff] }
 0x269   :  { %2475 = vmatmul.mubr.f32.gmra.mrb[88].mxu0 %v1400_v11  ;;  %v1809_v11 = vld [vmem:[#allocation8 + $0x7e8] sm:$0xff] }
 0x26a   :  { %2480 = vmatprep.mubr.f32.mxu0 %v1409_v52  ;;  %v4900_v19 = vpop.f32.mrb[156].mxu1  ;;  %3433 = vmatpush1.bf16.msra.mxu0 %v3432_v62  ;;  %v1811_v52 = vld [vmem:[#allocation8 + $0x7f8] sm:$0xff] }
 0x26b   :  { %5628 = vst [vmem:[#allocation31_spill] sm:$0xff] %v4900_v19  ;;  %v4904_v34 = vpop.f32.mrb[157].mxu1  ;;  %3435 = vmatprep.subr.bf16.mxu0 %v3434_v35  ;;  %v3442_v10 = vpack.c.bf16 %v1811_v52, %v1809_v11  ;;  %v1425_v19 = vmax.f32 %v945_v43, 0.0  ;;  %v957_v43 = vadd.f32 %v4533_v51, %v4736_v6  ;;  %v5635_v52 = vld [vmem:[#allocation77_spill] sm:$0xff] }
 0x26c   :  { %5630 = vst [vmem:[#allocation28_spill] sm:$0xff] %v4904_v34  ;;  %v951_v34 = vadd.f32 %v5633_v5, %v4736_v6 }
 0x26d   :  { %2481 = vmatmul.mubr.f32.gmra.mrb[90].mxu0 %v1408_v57  ;;  %v1424_v57 = vmax.f32 %v943_v42, 0.0  ;;  %v1441_v56 = vmax.f32 %v957_v43, 0.0  ;;  %v5636_v42 = vld [vmem:[#allocation79_spill] sm:$0xff] }
 0x26e   :  { %2486 = vmatprep.mubr.f32.mxu0 %v1417_v30  ;;  %v4908_v62 = vpop.f32.mrb[158].mxu1  ;;  %3437 = vmatpush1.bf16.msra.mxu0 %v3436_v55  ;;  %v3444_v55 = vpack.c.bf16 %v1810_v22, %v1808_v13  ;;  %v963_v13 = vadd.f32 %v5636_v42, %v4736_v6 }
 0x26f   :  { %v4912_v35 = vpop.f32.mrb[159].mxu1  ;;  %3439 = vmatprep.subr.bf16.mxu0 %v3438_v54  ;;  %v1433_v54 = vmax.f32 %v951_v34, 0.0 }
 0x271   :  { %2487 = vmatmul.mubr.f32.gmra.mrb[92].mxu0 %v1416_v36 }
 0x272   :  { %2492 = vmatprep.mubr.f32.mxu0 %v1425_v19  ;;  %v4916_v30 = vpop.f32.mrb[160].mxu1  ;;  %3441 = vmatpush1.bf16.msra.mxu0 %v3440_v37  ;;  %v1432_v19 = vmax.f32 %v949_v7, 0.0  ;;  %v955_v37 = vadd.f32 %v5635_v52, %v4744_v46 }
 0x273   :  { %v4920_v16 = vpop.f32.mrb[161].mxu1  ;;  %3443 = vmatprep.subr.bf16.mxu0 %v3442_v10  ;;  %v5637_v10 = vld [vmem:[#allocation78_spill] sm:$0xff] }
 0x274   :  { %v1440_v51 = vmax.f32 %v955_v37, 0.0  ;;  %v961_v22 = vadd.f32 %v5637_v10, %v4744_v46  ;;  %v975_v37 = vadd.f32 %v4567_v1, %v4736_v6  ;;  %v981_v10 = vadd.f32 %v4577_v49, %v4736_v6 }
 0x275   :  { %2493 = vmatmul.mubr.f32.gmra.mrb[94].mxu0 %v1424_v57  ;;  %v969_v57 = vadd.f32 %v4557_v25, %v4736_v6  ;;  %v973_v25 = vadd.f32 %v4563_v26, %v4744_v46  ;;  %v979_v1 = vadd.f32 %v4573_v31, %v4744_v46  ;;  %v987_v26 = vadd.f32 %v4587_v40, %v4736_v6 }
 0x276   :  { %2498 = vmatprep.mubr.f32.mxu0 %v1433_v54  ;;  %v4924_v11 = vpop.f32.mrb[162].mxu1  ;;  %3445 = vmatpush1.bf16.msra.mxu0 %v3444_v55  ;;  %v1449_v55 = vmax.f32 %v963_v13, 0.0  ;;  %v1448_v7 = vmax.f32 %v961_v22, 0.0  ;;  %v5638_v54 = vld [vmem:[#allocation80_spill] sm:$0xff]  ;;  %v985_v49 = vadd.f32 %v4583_v2, %v4744_v46  ;;  %v993_v31 = vadd.f32 %v4597_v27, %v4736_v6 }
 0x277   :  { %v4928_v36 = vpop.f32.mrb[163].mxu1  ;;  %v967_v43 = vadd.f32 %v5638_v54, %v4744_v46  ;;  %v1457_v52 = vmax.f32 %v969_v57, 0.0  ;;  %v991_v40 = vadd.f32 %v4593_v48, %v4744_v46  ;;  %v999_v2 = vadd.f32 %v4607_v15, %v4736_v6 }
 0x278   :  { %v997_v27 = vadd.f32 %v4603_v45, %v4744_v46  ;;  %v1005_v48 = vadd.f32 %v4617_v38, %v4736_v6  ;;  %v1003_v15 = vadd.f32 %v4613_v28, %v4744_v46  ;;  %v1011_v45 = vadd.f32 %v4627_v60, %v4736_v6 }
 0x279   :  { %2499 = vmatmul.mubr.f32.gmra.mrb[96].mxu0 %v1432_v19  ;;  %v1456_v42 = vmax.f32 %v967_v43, 0.0  ;;  %v1472_v43 = vmax.f32 %v979_v1, 0.0  ;;  %v1488_v1 = vmax.f32 %v991_v40, 0.0  ;;  %v1009_v38 = vadd.f32 %v4623_v20, %v4744_v46 }
 0x27a   :  { %2504 = vmatprep.mubr.f32.mxu0 %v1441_v56  ;;  %v4932_v34 = vpop.f32.mrb[164].mxu1  ;;  %v1504_v40 = vmax.f32 %v1003_v15, 0.0  ;;  %v1017_v28 = vadd.f32 %v4637_v4, %v4736_v6  ;;  %v1015_v60 = vadd.f32 %v4633_v17, %v4744_v46  ;;  %v1023_v20 = vadd.f32 %v4647_v18, %v4736_v6 }
 0x27b   :  { %v4936_v5 = vpop.f32.mrb[165].mxu1  ;;  %v1021_v4 = vadd.f32 %v4643_v63, %v4744_v46  ;;  %v1029_v17 = vadd.f32 %v4657_v58, %v4736_v6  ;;  %v1035_v63 = vadd.f32 %v4667_v61, %v4736_v6 }
 0x27c   :  { %v1520_v15 = vmax.f32 %v1015_v60, 0.0 }
 0x27d   :  { %2505 = vmatmul.mubr.f32.gmra.mrb[98].mxu0 %v1440_v51  ;;  %v1465_v51 = vmax.f32 %v975_v37, 0.0  ;;  %v1481_v37 = vmax.f32 %v987_v26, 0.0  ;;  %v1497_v26 = vmax.f32 %v999_v2, 0.0  ;;  %v1513_v2 = vmax.f32 %v1011_v45, 0.0 }
 0x27e   :  { %2510 = vmatprep.mubr.f32.mxu0 %v1449_v55  ;;  %v4940_v8 = vpop.f32.mrb[166].mxu1  ;;  %v1464_v55 = vmax.f32 %v973_v25, 0.0  ;;  %v1480_v25 = vmax.f32 %v985_v49, 0.0  ;;  %v1496_v49 = vmax.f32 %v997_v27, 0.0  ;;  %v1512_v27 = vmax.f32 %v1009_v38, 0.0 }
 0x27f   :  { %v4944_v19 = vpop.f32.mrb[167].mxu1  ;;  %v1529_v45 = vmax.f32 %v1023_v20, 0.0  ;;  %v1528_v18 = vmax.f32 %v1021_v4, 0.0  ;;  %v1545_v4 = vmax.f32 %v1035_v63, 0.0 }
 0x281   :  { %2511 = vmatmul.mubr.f32.gmra.mrb[100].mxu0 %v1448_v7  ;;  %v1473_v7 = vmax.f32 %v981_v10, 0.0  ;;  %v1489_v10 = vmax.f32 %v993_v31, 0.0  ;;  %v1505_v31 = vmax.f32 %v1005_v48, 0.0  ;;  %v1521_v48 = vmax.f32 %v1017_v28, 0.0 }
 0x282   :  { %2516 = vmatprep.mubr.f32.mxu0 %v1457_v52  ;;  %v4948_v56 = vpop.f32.mrb[168].mxu1 }
 0x283   :  { %v4952_v13 = vpop.f32.mrb[169].mxu1 }
 0x285   :  { %2517 = vmatmul.mubr.f32.gmra.mrb[102].mxu0 %v1456_v42 }
 0x286   :  { %2522 = vmatprep.mubr.f32.mxu0 %v1465_v51  ;;  %v4956_v22 = vpop.f32.mrb[170].mxu1 }
 0x287   :  { %v4960_v57 = vpop.f32.mrb[171].mxu1 }
 0x289   :  { %2523 = vmatmul.mubr.f32.gmra.mrb[104].mxu0 %v1464_v55 }
 0x28a   :  { %2528 = vmatprep.mubr.f32.mxu0 %v1473_v7  ;;  %v4964_v54 = vpop.f32.mrb[172].mxu1 }
 0x28b   :  { %v4968_v52 = vpop.f32.mrb[173].mxu1 }
 0x28d   :  { %2529 = vmatmul.mubr.f32.gmra.mrb[106].mxu0 %v1472_v43 }
 0x28e   :  { %2534 = vmatprep.mubr.f32.mxu0 %v1481_v37  ;;  %v4972_v42 = vpop.f32.mrb[174].mxu1 }
 0x28f   :  { %v4976_v51 = vpop.f32.mrb[175].mxu1 }
 0x291   :  { %2535 = vmatmul.mubr.f32.gmra.mrb[108].mxu0 %v1480_v25 }
 0x292   :  { %2540 = vmatprep.mubr.f32.mxu0 %v1489_v10  ;;  %v4980_v55 = vpop.f32.mrb[176].mxu1 }
 0x293   :  { %v4984_v7 = vpop.f32.mrb[177].mxu1 }
 0x295   :  { %2541 = vmatmul.mubr.f32.gmra.mrb[110].mxu0 %v1488_v1 }
 0x296   :  { %2546 = vmatprep.mubr.f32.mxu0 %v1497_v26  ;;  %v4988_v43 = vpop.f32.mrb[178].mxu1 }
 0x297   :  { %v4992_v37 = vpop.f32.mrb[179].mxu1 }
 0x299   :  { %2547 = vmatmul.mubr.f32.gmra.mrb[112].mxu0 %v1496_v49 }
 0x29a   :  { %2552 = vmatprep.mubr.f32.mxu0 %v1505_v31  ;;  %v4996_v25 = vpop.f32.mrb[180].mxu1 }
 0x29b   :  { %v5000_v10 = vpop.f32.mrb[181].mxu1 }
 0x29d   :  { %2553 = vmatmul.mubr.f32.gmra.mrb[114].mxu0 %v1504_v40  ;;  %v262_v40 = vsub.s32 7, %v5559_v23 }
 0x29e   :  { %2558 = vmatprep.mubr.f32.mxu0 %v1513_v2  ;;  %v5004_v1 = vpop.f32.mrb[182].mxu1  ;;  %v1027_v2 = vadd.f32 %v4653_v44, %v4744_v46 }
 0x29f   :  { %v5008_v26 = vpop.f32.mrb[183].mxu1  ;;  %v5030_v60 = vrot.slane %v4733_v29, %v262_v40 }
 0x2a0   :  { %v1536_v20 = vmax.f32 %v1027_v2, 0.0 }
 0x2a1   :  { %2559 = vmatmul.mubr.f32.gmra.mrb[116].mxu0 %v1512_v27  ;;  %v1537_v27 = vmax.f32 %v1029_v17, 0.0  ;;  %v1112_v61 = vadd.f32 %v4758_v50, %v5030_v60 }
 0x2a2   :  { %2564 = vmatprep.mubr.f32.mxu0 %v1521_v48  ;;  %v5012_v49 = vpop.f32.mrb[184].mxu1  ;;  %v258_v48 = vsub.s32 6, %v5559_v23 }
 0x2a3   :  { %v5016_v31 = vpop.f32.mrb[185].mxu1  ;;  %v1307_v63 = vmax.f32 %v1112_v61, 0.0 }
 0x2a4   :  { %v5046_v40 = vrot.slane %v4733_v29, %v258_v48 }
 0x2a5   :  { %2565 = vmatmul.mubr.f32.gmra.mrb[118].mxu0 %v1520_v15  ;;  %v1033_v15 = vadd.f32 %v4663_v41, %v4744_v46  ;;  %v1039_v41 = vadd.f32 %v4675_v9, %v4744_v46  ;;  %v1124_v9 = vadd.f32 %v4782_v21, %v5030_v60 }
 0x2a6   :  { %2570 = vmatprep.mubr.f32.mxu0 %v1529_v45  ;;  %v5021_v38 = vpop.f32.mrb[186].mxu1  ;;  %v1041_v45 = vadd.f32 %v4678_v59, %v4736_v6  ;;  %v1118_v59 = vadd.f32 %v4770_v12, %v5030_v60  ;;  %v1110_v50 = vadd.f32 %v4754_v33, %v5046_v40  ;;  %v1116_v12 = vadd.f32 %v4766_v0, %v5046_v40  ;;  %v5639_v0 = vld [vmem:[#allocation14_spill] sm:$0xff] }
 0x2a7   :  { %v5025_v28 = vpop.f32.mrb[187].mxu1  ;;  %v1552_v29 = vmax.f32 %v1039_v41, 0.0  ;;  %v1130_v33 = vadd.f32 %v4794_v24, %v5030_v60  ;;  %v1122_v21 = vadd.f32 %v4778_v3, %v5046_v40  ;;  %v5640_v24 = vld [vmem:[#allocation13_spill] sm:$0xff]  ;;  %v5642_v3 = vld [vmem:[#allocation16_spill] sm:$0xff] }
 0x2a9   :  { %2571 = vmatmul.mubr.f32.gmra.mrb[120].mxu0 %v1528_v18  ;;  %v1544_v18 = vmax.f32 %v1033_v15, 0.0  ;;  %v1306_v15 = vmax.f32 %v1110_v50, 0.0  ;;  %v1322_v50 = vmax.f32 %v1122_v21, 0.0  ;;  %v5646_v21 = vld [vmem:[#allocation18_spill] sm:$0xff] }
 0x2aa   :  { %2576 = vmatprep.mubr.f32.mxu0 %v1537_v27  ;;  %v5032_v58 = vpop.f32.mrb[188].mxu1  ;;  %v1553_v27 = vmax.f32 %v1041_v45, 0.0  ;;  %v1323_v45 = vmax.f32 %v1124_v9, 0.0 }
 0x2ab   :  { %v5037_v44 = vpop.f32.mrb[189].mxu1 }
 0x2ad   :  { %2577 = vmatmul.mubr.f32.gmra.mrb[122].mxu0 %v1536_v20  ;;  %v1315_v20 = vmax.f32 %v1118_v59, 0.0 }
 0x2ae   :  { %2582 = vmatprep.mubr.f32.mxu0 %v1545_v4  ;;  %v5043_v17 = vpop.f32.mrb[190].mxu1 }
 0x2af   :  { %v5050_v2 = vpop.f32.mrb[191].mxu1 }
 0x2b1   :  { %2583 = vmatmul.mubr.f32.gmra.mrb[124].mxu0 %v1544_v18  ;;  %v1314_v18 = vmax.f32 %v1116_v12, 0.0 }
 0x2b2   :  { %v5054_v6 = vpop.f32.mrb[192].mxu1  ;;  %2588 = vmatprep.mubr.f32.mxu0 %v1553_v27  ;;  %v1331_v27 = vmax.f32 %v1130_v33, 0.0 }
 0x2b3   :  { %v5058_v48 = vpop.f32.mrb[193].mxu1 }
 0x2b5   :  { %2589 = vmatmul.mubr.f32.gmra.mrb[126].mxu0 %v1552_v29  ;;  %v1128_v29 = vadd.f32 %v5640_v24, %v5046_v40  ;;  %v1148_v24 = vadd.f32 %v5646_v21, %v5030_v60 }
 0x2b6   :  { %v5062_v46 = vpop.f32.mrb[194].mxu1  ;;  %2659 = vmatprep.mubr.f32.mxu0 %v1307_v63  ;;  %v1136_v63 = vadd.f32 %v5639_v0, %v5030_v60 }
 0x2b7   :  { %v5066_v4 = vpop.f32.mrb[195].mxu1  ;;  %v1330_v33 = vmax.f32 %v1128_v29, 0.0  ;;  %v5649_v29 = vld [vmem:[#allocation23_spill] sm:$0xff] }
 0x2b9   :  { %2660 = vmatmul.mubr.f32.vlgmr.msra.gmra.mrb[64].mxu0 %v1306_v15  ;;  %v1142_v15 = vadd.f32 %v5642_v3, %v5030_v60 }
 0x2ba   :  { %v5070_v61 = vpop.f32.mrb[196].mxu1  ;;  %2665 = vmatprep.mubr.f32.mxu0 %v1315_v20  ;;  %v1339_v20 = vmax.f32 %v1136_v63, 0.0 }
 0x2bb   :  { %v5074_v41 = vpop.f32.mrb[197].mxu1 }
 0x2bd   :  { %2666 = vmatmul.mubr.f32.gmra.mrb[66].mxu0 %v1314_v18  ;;  %v5644_v18 = vld [vmem:[#allocation15_spill] sm:$0xff] }
 0x2be   :  { %v5078_v59 = vpop.f32.mrb[198].mxu1  ;;  %2671 = vmatprep.mubr.f32.mxu0 %v1323_v45  ;;  %v1134_v0 = vadd.f32 %v5644_v18, %v5046_v40  ;;  %v1347_v45 = vmax.f32 %v1142_v15, 0.0  ;;  %v1154_v18 = vadd.f32 %v5649_v29, %v5030_v60 }
 0x2bf   :  { %v5082_v9 = vpop.f32.mrb[199].mxu1 }
 0x2c0   :  { %5641 = vst [vmem:[#allocation33_spill] sm:$0xff] %v5082_v9  ;;  %v1338_v63 = vmax.f32 %v1134_v0, 0.0  ;;  %v1160_v0 = vadd.f32 %v4854_v47, %v5030_v60  ;;  %v5654_v47 = vld [vmem:[#allocation20_spill] sm:$0xff] }
 0x2c1   :  { %2672 = vmatmul.mubr.f32.gmra.mrb[68].mxu0 %v1322_v50  ;;  %v5648_v50 = vld [vmem:[#allocation17_spill] sm:$0xff] }
 0x2c2   :  { %v5086_v12 = vpop.f32.mrb[200].mxu1  ;;  %2677 = vmatprep.mubr.f32.mxu0 %v1331_v27  ;;  %v1140_v3 = vadd.f32 %v5648_v50, %v5046_v40  ;;  %v1355_v27 = vmax.f32 %v1148_v24, 0.0 }
 0x2c3   :  { %5643 = vst [vmem:[#allocation30_spill] sm:$0xff] %v5086_v12  ;;  %v5090_v23 = vpop.f32.mrb[201].mxu1 }
 0x2c4   :  { %5645 = vst [vmem:[#allocation35_spill] sm:$0xff] %v5090_v23  ;;  %v1346_v15 = vmax.f32 %v1140_v3, 0.0  ;;  %v1166_v3 = vadd.f32 %v4864_v32, %v5030_v60  ;;  %v1164_v32 = vadd.f32 %v4860_v39, %v5046_v40  ;;  %v5660_v39 = vld [vmem:[#allocation24_spill] sm:$0xff] }
 0x2c5   :  { %2678 = vmatmul.mubr.f32.gmra.mrb[70].mxu0 %v1330_v33  ;;  %v5651_v33 = vld [vmem:[#allocation19_spill] sm:$0xff] }
 0x2c6   :  { %v5094_v9 = vpop.f32.mrb[202].mxu1  ;;  %2683 = vmatprep.mubr.f32.mxu0 %v1339_v20  ;;  %v1146_v21 = vadd.f32 %v5651_v33, %v5046_v40  ;;  %v1363_v20 = vmax.f32 %v1154_v18, 0.0 }
 0x2c7   :  { %5647 = vst [vmem:[#allocation32_spill] sm:$0xff] %v5094_v9  ;;  %v5098_v12 = vpop.f32.mrb[203].mxu1 }
 0x2c8   :  { %v1354_v24 = vmax.f32 %v1146_v21, 0.0  ;;  %v1172_v21 = vadd.f32 %v4872_v14, %v5030_v60  ;;  %v5658_v14 = vld [vmem:[#allocation25_spill] sm:$0xff] }
 0x2c9   :  { %2684 = vmatmul.mubr.f32.gmra.mrb[72].mxu0 %v1338_v63  ;;  %v5653_v63 = vld [vmem:[#allocation21_spill] sm:$0xff] }
 0x2ca   :  { %v5102_v23 = vpop.f32.mrb[204].mxu1  ;;  %2689 = vmatprep.mubr.f32.mxu0 %v1347_v45  ;;  %v1152_v29 = vadd.f32 %v5653_v63, %v5046_v40  ;;  %v1371_v45 = vmax.f32 %v1160_v0, 0.0 }
 0x2cb   :  { %5650 = vst [vmem:[#allocation37_spill] sm:$0xff] %v5102_v23  ;;  %v5106_v9 = vpop.f32.mrb[205].mxu1 }
 0x2cc   :  { %v1362_v18 = vmax.f32 %v1152_v29, 0.0  ;;  %v1178_v29 = vadd.f32 %v4880_v53, %v5030_v60  ;;  %v5662_v53 = vld [vmem:[#allocation22_spill] sm:$0xff] }
 0x2cd   :  { %2690 = vmatmul.mubr.f32.gmra.mrb[74].mxu0 %v1346_v15  ;;  %v1158_v15 = vadd.f32 %v5654_v47, %v5046_v40 }
 0x2ce   :  { %v5110_v50 = vpop.f32.mrb[206].mxu1  ;;  %2695 = vmatprep.mubr.f32.mxu0 %v1355_v27  ;;  %v1379_v27 = vmax.f32 %v1166_v3, 0.0  ;;  %v1378_v3 = vmax.f32 %v1164_v32, 0.0  ;;  %v5664_v32 = vld [vmem:[#allocation26_spill] sm:$0xff] }
 0x2cf   :  { %5652 = vst [vmem:[#allocation34_spill] sm:$0xff] %v5110_v50  ;;  %v5114_v23 = vpop.f32.mrb[207].mxu1  ;;  %v1370_v0 = vmax.f32 %v1158_v15, 0.0  ;;  %v1184_v15 = vadd.f32 %v5660_v39, %v5030_v60 }
 0x2d1   :  { %2696 = vmatmul.mubr.f32.gmra.mrb[76].mxu0 %v1354_v24 }
 0x2d2   :  { %v5118_v33 = vpop.f32.mrb[208].mxu1  ;;  %2701 = vmatprep.mubr.f32.mxu0 %v1363_v20  ;;  %v1387_v20 = vmax.f32 %v1172_v21, 0.0 }
 0x2d3   :  { %v5122_v50 = vpop.f32.mrb[209].mxu1 }
 0x2d5   :  { %2702 = vmatmul.mubr.f32.gmra.mrb[78].mxu0 %v1362_v18  ;;  %v1170_v18 = vadd.f32 %v5658_v14, %v5046_v40  ;;  %v1190_v14 = vadd.f32 %v5664_v32, %v5030_v60 }
 0x2d6   :  { %v5126_v63 = vpop.f32.mrb[210].mxu1  ;;  %2707 = vmatprep.mubr.f32.mxu0 %v1371_v45  ;;  %v1395_v45 = vmax.f32 %v1178_v29, 0.0 }
 0x2d7   :  { %5655 = vst [vmem:[#allocation39_spill] sm:$0xff] %v5126_v63  ;;  %v5130_v24 = vpop.f32.mrb[211].mxu1  ;;  %v1386_v21 = vmax.f32 %v1170_v18, 0.0  ;;  %v5667_v18 = vld [vmem:[#allocation28_spill] sm:$0xff] }
 0x2d8   :  { %5656 = vst [vmem:[#allocation36_spill] sm:$0xff] %v5130_v24 }
 0x2d9   :  { %2708 = vmatmul.mubr.f32.gmra.mrb[80].mxu0 %v1370_v0  ;;  %v1176_v0 = vadd.f32 %v5662_v53, %v5046_v40  ;;  %v1196_v53 = vadd.f32 %v5667_v18, %v5030_v60 }
 0x2da   :  { %v5134_v47 = vpop.f32.mrb[212].mxu1  ;;  %2713 = vmatprep.mubr.f32.mxu0 %v1379_v27  ;;  %v1403_v27 = vmax.f32 %v1184_v15, 0.0 }
 0x2db   :  { %5657 = vst [vmem:[#allocation41_spill] sm:$0xff] %v5134_v47  ;;  %v5138_v63 = vpop.f32.mrb[213].mxu1  ;;  %v1394_v29 = vmax.f32 %v1176_v0, 0.0  ;;  %v1202_v0 = vadd.f32 %v4912_v35, %v5030_v60  ;;  %v1200_v35 = vadd.f32 %v4908_v62, %v5046_v40  ;;  %v1220_v62 = vadd.f32 %v4936_v5, %v5030_v60 }
 0x2dc   :  { %5659 = vst [vmem:[#allocation38_spill] sm:$0xff] %v5138_v63  ;;  %v1218_v5 = vadd.f32 %v4932_v34, %v5046_v40  ;;  %v1238_v34 = vadd.f32 %v4960_v57, %v5030_v60  ;;  %v1236_v57 = vadd.f32 %v4956_v22, %v5046_v40  ;;  %v1256_v22 = vadd.f32 %v4984_v7, %v5030_v60 }
 0x2dd   :  { %2714 = vmatmul.mubr.f32.gmra.mrb[82].mxu0 %v1378_v3  ;;  %v5666_v3 = vld [vmem:[#allocation27_spill] sm:$0xff]  ;;  %v1254_v7 = vadd.f32 %v4980_v55, %v5046_v40  ;;  %v1274_v55 = vadd.f32 %v5008_v26, %v5030_v60  ;;  %v1272_v26 = vadd.f32 %v5004_v1, %v5046_v40  ;;  %v1292_v1 = vadd.f32 %v5037_v44, %v5030_v60 }
 0x2de   :  { %v5142_v24 = vpop.f32.mrb[214].mxu1  ;;  %2719 = vmatprep.mubr.f32.mxu0 %v1387_v20  ;;  %v1182_v39 = vadd.f32 %v5666_v3, %v5046_v40  ;;  %v1411_v20 = vmax.f32 %v1190_v14, 0.0  ;;  %v1290_v44 = vadd.f32 %v5032_v58, %v5046_v40  ;;  %v1812_v58 = vld [vmem:[%s5471_s4] sm:$0x3] }
 0x2df   :  { %5661 = vst [vmem:[#allocation43_spill] sm:$0xff] %v5142_v24  ;;  %v5146_v47 = vpop.f32.mrb[215].mxu1 }
 0x2e0   :  { %5663 = vst [vmem:[#allocation40_spill] sm:$0xff] %v5146_v47  ;;  %v1402_v15 = vmax.f32 %v1182_v39, 0.0  ;;  %v1208_v39 = vadd.f32 %v4920_v16, %v5030_v60  ;;  %v1206_v16 = vadd.f32 %v4916_v30, %v5046_v40  ;;  %v1226_v30 = vadd.f32 %v4944_v19, %v5030_v60 }
 0x2e1   :  { %2720 = vmatmul.mubr.f32.gmra.mrb[84].mxu0 %v1386_v21  ;;  %v5669_v21 = vld [vmem:[#allocation29_spill] sm:$0xff]  ;;  %v1224_v19 = vadd.f32 %v4940_v8, %v5046_v40  ;;  %v1244_v8 = vadd.f32 %v4968_v52, %v5030_v60  ;;  %v1242_v52 = vadd.f32 %v4964_v54, %v5046_v40  ;;  %v1262_v54 = vadd.f32 %v4992_v37, %v5030_v60 }
 0x2e2   :  { %v5150_v63 = vpop.f32.mrb[216].mxu1  ;;  %2725 = vmatprep.mubr.f32.mxu0 %v1395_v45  ;;  %v1188_v32 = vadd.f32 %v5669_v21, %v5046_v40  ;;  %v1419_v45 = vmax.f32 %v1196_v53, 0.0  ;;  %v1260_v37 = vadd.f32 %v4988_v43, %v5046_v40  ;;  %v1280_v43 = vadd.f32 %v5016_v31, %v5030_v60 }
 0x2e3   :  { %5665 = vst [vmem:[#allocation45_spill] sm:$0xff] %v5150_v63  ;;  %v5154_v24 = vpop.f32.mrb[217].mxu1  ;;  %v1278_v31 = vadd.f32 %v5012_v49, %v5046_v40  ;;  %v1298_v49 = vadd.f32 %v5050_v2, %v5030_v60  ;;  %v5675_v2 = vld [vmem:[#allocation76_spill] sm:$0xff] }
 0x2e4   :  { %v1410_v14 = vmax.f32 %v1188_v32, 0.0  ;;  %v1214_v32 = vadd.f32 %v4928_v36, %v5030_v60  ;;  %v1212_v36 = vadd.f32 %v4924_v11, %v5046_v40  ;;  %v1232_v11 = vadd.f32 %v4952_v13, %v5030_v60 }
 0x2e5   :  { %2726 = vmatmul.mubr.f32.gmra.mrb[86].mxu0 %v1394_v29  ;;  %v5670_v29 = vld [vmem:[#allocation31_spill] sm:$0xff]  ;;  %v1230_v13 = vadd.f32 %v4948_v56, %v5046_v40  ;;  %v1250_v56 = vadd.f32 %v4976_v51, %v5030_v60  ;;  %v1248_v51 = vadd.f32 %v4972_v42, %v5046_v40  ;;  %v1268_v42 = vadd.f32 %v5000_v10, %v5030_v60 }
 0x2e6   :  { %v5158_v47 = vpop.f32.mrb[218].mxu1  ;;  %2731 = vmatprep.mubr.f32.mxu0 %v1403_v27  ;;  %v1194_v18 = vadd.f32 %v5670_v29, %v5046_v40  ;;  %v1427_v27 = vmax.f32 %v1202_v0, 0.0  ;;  %v1426_v0 = vmax.f32 %v1200_v35, 0.0  ;;  %v1266_v10 = vadd.f32 %v4996_v25, %v5046_v40 }
 0x2e7   :  { %5668 = vst [vmem:[#allocation42_spill] sm:$0xff] %v5158_v47  ;;  %v5162_v63 = vpop.f32.mrb[219].mxu1  ;;  %v1286_v25 = vadd.f32 %v5025_v28, %v5030_v60  ;;  %v1284_v28 = vadd.f32 %v5021_v38, %v5046_v40  ;;  %v1546_v38 = vmax.f32 %v1290_v44, 0.0 }
 0x2e8   :  { %v1418_v53 = vmax.f32 %v1194_v18, 0.0 }
 0x2e9   :  { %2732 = vmatmul.mubr.f32.gmra.mrb[88].mxu0 %v1402_v15 }
 0x2ea   :  { %v5166_v3 = vpop.f32.mrb[220].mxu1  ;;  %2737 = vmatprep.mubr.f32.mxu0 %v1411_v20  ;;  %v1435_v20 = vmax.f32 %v1208_v39, 0.0  ;;  %v1434_v39 = vmax.f32 %v1206_v16, 0.0 }
 0x2eb   :  { %v5170_v47 = vpop.f32.mrb[221].mxu1 }
 0x2ed   :  { %2738 = vmatmul.mubr.f32.gmra.mrb[90].mxu0 %v1410_v14 }
 0x2ee   :  { %v5174_v21 = vpop.f32.mrb[222].mxu1  ;;  %2743 = vmatprep.mubr.f32.mxu0 %v1419_v45  ;;  %v1443_v45 = vmax.f32 %v1214_v32, 0.0  ;;  %v1442_v32 = vmax.f32 %v1212_v36, 0.0 }
 0x2ef   :  { %v5178_v15 = vpop.f32.mrb[223].mxu1 }
 0x2f1   :  { %2744 = vmatmul.mubr.f32.gmra.mrb[92].mxu0 %v1418_v53 }
 0x2f2   :  { %v5182_v29 = vpop.f32.mrb[224].mxu1  ;;  %2749 = vmatprep.mubr.f32.mxu0 %v1427_v27  ;;  %v1451_v27 = vmax.f32 %v1220_v62, 0.0  ;;  %v1450_v62 = vmax.f32 %v1218_v5, 0.0 }
 0x2f3   :  { %v5186_v14 = vpop.f32.mrb[225].mxu1 }
 0x2f5   :  { %2750 = vmatmul.mubr.f32.gmra.mrb[94].mxu0 %v1426_v0 }
 0x2f6   :  { %v5190_v18 = vpop.f32.mrb[226].mxu1  ;;  %2755 = vmatprep.mubr.f32.mxu0 %v1435_v20  ;;  %v1459_v20 = vmax.f32 %v1226_v30, 0.0  ;;  %v1458_v30 = vmax.f32 %v1224_v19, 0.0 }
 0x2f7   :  { %v5194_v53 = vpop.f32.mrb[227].mxu1 }
 0x2f9   :  { %2756 = vmatmul.mubr.f32.gmra.mrb[96].mxu0 %v1434_v39 }
 0x2fa   :  { %v5198_v35 = vpop.f32.mrb[228].mxu1  ;;  %2761 = vmatprep.mubr.f32.mxu0 %v1443_v45  ;;  %v1467_v45 = vmax.f32 %v1232_v11, 0.0  ;;  %v1466_v11 = vmax.f32 %v1230_v13, 0.0 }
 0x2fb   :  { %v5202_v0 = vpop.f32.mrb[229].mxu1 }
 0x2fd   :  { %2762 = vmatmul.mubr.f32.gmra.mrb[98].mxu0 %v1442_v32 }
 0x2fe   :  { %v5206_v16 = vpop.f32.mrb[230].mxu1  ;;  %2767 = vmatprep.mubr.f32.mxu0 %v1451_v27  ;;  %v1475_v27 = vmax.f32 %v1238_v34, 0.0  ;;  %v1474_v34 = vmax.f32 %v1236_v57, 0.0 }
 0x2ff   :  { %v5210_v39 = vpop.f32.mrb[231].mxu1 }
 0x301   :  { %2768 = vmatmul.mubr.f32.gmra.mrb[100].mxu0 %v1450_v62 }
 0x302   :  { %v5214_v36 = vpop.f32.mrb[232].mxu1  ;;  %2773 = vmatprep.mubr.f32.mxu0 %v1459_v20  ;;  %v1483_v20 = vmax.f32 %v1244_v8, 0.0  ;;  %v1482_v8 = vmax.f32 %v1242_v52, 0.0 }
 0x303   :  { %v5218_v32 = vpop.f32.mrb[233].mxu1 }
 0x305   :  { %2774 = vmatmul.mubr.f32.gmra.mrb[102].mxu0 %v1458_v30 }
 0x306   :  { %v5222_v5 = vpop.f32.mrb[234].mxu1  ;;  %2779 = vmatprep.mubr.f32.mxu0 %v1467_v45  ;;  %v1491_v45 = vmax.f32 %v1250_v56, 0.0  ;;  %v1490_v56 = vmax.f32 %v1248_v51, 0.0 }
 0x307   :  { %v5226_v62 = vpop.f32.mrb[235].mxu1 }
 0x309   :  { %2780 = vmatmul.mubr.f32.gmra.mrb[104].mxu0 %v1466_v11 }
 0x30a   :  { %v5230_v19 = vpop.f32.mrb[236].mxu1  ;;  %2785 = vmatprep.mubr.f32.mxu0 %v1475_v27  ;;  %v1499_v27 = vmax.f32 %v1256_v22, 0.0  ;;  %v1498_v22 = vmax.f32 %v1254_v7, 0.0 }
 0x30b   :  { %v5234_v30 = vpop.f32.mrb[237].mxu1 }
 0x30d   :  { %2786 = vmatmul.mubr.f32.gmra.mrb[106].mxu0 %v1474_v34 }
 0x30e   :  { %v5238_v13 = vpop.f32.mrb[238].mxu1  ;;  %2791 = vmatprep.mubr.f32.mxu0 %v1483_v20  ;;  %v1507_v20 = vmax.f32 %v1262_v54, 0.0  ;;  %v1506_v54 = vmax.f32 %v1260_v37, 0.0 }
 0x30f   :  { %v5242_v11 = vpop.f32.mrb[239].mxu1 }
 0x311   :  { %2792 = vmatmul.mubr.f32.gmra.mrb[108].mxu0 %v1482_v8 }
 0x312   :  { %v5246_v57 = vpop.f32.mrb[240].mxu1  ;;  %2797 = vmatprep.mubr.f32.mxu0 %v1491_v45  ;;  %v1515_v45 = vmax.f32 %v1268_v42, 0.0  ;;  %v1514_v42 = vmax.f32 %v1266_v10, 0.0 }
 0x313   :  { %v5250_v34 = vpop.f32.mrb[241].mxu1 }
 0x315   :  { %2798 = vmatmul.mubr.f32.gmra.mrb[110].mxu0 %v1490_v56 }
 0x316   :  { %v5254_v52 = vpop.f32.mrb[242].mxu1  ;;  %2803 = vmatprep.mubr.f32.mxu0 %v1499_v27  ;;  %v1523_v27 = vmax.f32 %v1274_v55, 0.0  ;;  %v1522_v55 = vmax.f32 %v1272_v26, 0.0 }
 0x317   :  { %v5258_v8 = vpop.f32.mrb[243].mxu1 }
 0x319   :  { %2804 = vmatmul.mubr.f32.gmra.mrb[112].mxu0 %v1498_v22 }
 0x31a   :  { %v5262_v51 = vpop.f32.mrb[244].mxu1  ;;  %2809 = vmatprep.mubr.f32.mxu0 %v1507_v20  ;;  %v1531_v20 = vmax.f32 %v1280_v43, 0.0  ;;  %v1530_v43 = vmax.f32 %v1278_v31, 0.0 }
 0x31b   :  { %v5266_v56 = vpop.f32.mrb[245].mxu1 }
 0x31d   :  { %2810 = vmatmul.mubr.f32.gmra.mrb[114].mxu0 %v1506_v54 }
 0x31e   :  { %v5270_v7 = vpop.f32.mrb[246].mxu1  ;;  %2815 = vmatprep.mubr.f32.mxu0 %v1515_v45  ;;  %v1539_v45 = vmax.f32 %v1286_v25, 0.0  ;;  %v1538_v25 = vmax.f32 %v1284_v28, 0.0  ;;  %v5676_v28 = vld [vmem:[#allocation74_spill] sm:$0xff] }
 0x31f   :  { %v5274_v22 = vpop.f32.mrb[247].mxu1 }
 0x321   :  { %2816 = vmatmul.mubr.f32.gmra.mrb[116].mxu0 %v1514_v42 }
 0x322   :  { %v5278_v37 = vpop.f32.mrb[248].mxu1  ;;  %2821 = vmatprep.mubr.f32.mxu0 %v1523_v27  ;;  %v1547_v27 = vmax.f32 %v1292_v1, 0.0  ;;  %v1296_v1 = vadd.f32 %v5043_v17, %v5046_v40 }
 0x323   :  { %v5282_v54 = vpop.f32.mrb[249].mxu1 }
 0x324   :  { %v1554_v60 = vmax.f32 %v1296_v1, 0.0 }
 0x325   :  { %2822 = vmatmul.mubr.f32.gmra.mrb[118].mxu0 %v1522_v55 }
 0x326   :  { %v5286_v10 = vpop.f32.mrb[250].mxu1  ;;  %2827 = vmatprep.mubr.f32.mxu0 %v1531_v20  ;;  %v1555_v20 = vmax.f32 %v1298_v49, 0.0  ;;  %v5313_v49 = vrot.slane %v1812_v58, %v5676_v28 }
 0x327   :  { %v5290_v42 = vpop.f32.mrb[251].mxu1 }
 0x328   :  { %v1893_v17 = vadd.f32 %v5058_v48, %v5313_v49  ;;  %v1899_v1 = vadd.f32 %v5066_v4, %v5313_v49  ;;  %v1905_v4 = vadd.f32 %v5074_v41, %v5313_v49 }
 0x329   :  { %2828 = vmatmul.mubr.f32.gmra.mrb[120].mxu0 %v1530_v43 }
 0x32a   :  { %v5294_v26 = vpop.f32.mrb[252].mxu1  ;;  %2833 = vmatprep.mubr.f32.mxu0 %v1539_v45  ;;  %v5310_v45 = vrot.slane %v1812_v58, %v5675_v2 }
 0x32b   :  { %5671 = vst [vmem:[#allocation47_spill] sm:$0xff] %v5294_v26  ;;  %v5298_v55 = vpop.f32.mrb[253].mxu1 }
 0x32c   :  { %5672 = vst [vmem:[#allocation44_spill] sm:$0xff] %v5298_v55 }
 0x32d   :  { %2834 = vmatmul.mubr.f32.gmra.mrb[122].mxu0 %v1538_v25 }
 0x32e   :  { %v5300_v31 = vpop.f32.mrb[254].mxu1  ;;  %2839 = vmatprep.mubr.f32.mxu0 %v1547_v27  ;;  %v1891_v27 = vadd.f32 %v5054_v6, %v5310_v45  ;;  %v5326_v6 = vld [vmem:[%s5472_s5] sm:$0x3]  ;;  %s3927_s5 = smov [#allocation9]  }
 0x32f   :  { %5673 = vst [vmem:[#allocation49_spill] sm:$0xff] %v5300_v31  ;;  %v5304_v43 = vpop.f32.mrb[255].mxu1  ;;  %5677 = vst [vmem:[#allocation52_spill] sm:$0xff] %v5326_v6  ;;  %v2935_v48 = vrot.slane %v5326_v6, %v5676_v28  ;;  %v1909_v28 = vadd.f32 %v5078_v59, %v5310_v45  ;;  %v5680_v59 = vld [vmem:[#allocation35_spill] sm:$0xff]  ;;  %s3050_s23 = sshll.u32 %s3927_s5, 4  ;;  %s3051_s23 = int_to_ptr.vmem [resolvable:$true] %s3050_s23 }
 0x330   :  { %5674 = vst [vmem:[#allocation46_spill] sm:$0xff] %v5304_v43  ;;  %s3887_s24 = scalar_lea.vmem %s3051_s23, 32  ;;  %p3892_p11 = scmp.lt.s32.totalorder %s3051_s23, %s3051_s23 }
 0x331   :  { %2840 = vmatmul.mubr.f32.gmra.mrb[124].mxu0 %v1546_v38  ;;  %v1897_v38 = vadd.f32 %v5062_v46, %v5310_v45  ;;  %3002 = vmatprep.mubr.f32.mxu1 %v2935_v48  ;;  %v5679_v48 = vld [vmem:[#allocation30_spill] sm:$0xff]  ;;  %p3888_p10 = scmp.ne.s32.totalorder %s3051_s23, %s3887_s24  ;;  %p3893_p12 = scmp.lt.s32.totalorder %s3887_s24, %s3887_s24 }
 0x332   :  { %2845 = vmatprep.mubr.f32.mxu0 %v1555_v20 }
 0x333   :  { %p3894_p13 = por %p3893_p12, %p3892_p11 }
 0x335   :  { %2846 = vmatmul.mubr.f32.gmra.mrb[126].mxu0 %v1554_v60  ;;  %p3895_p0 = pnand %p3894_p13, %p3888_p10 }
 0x38c   :  { %v2661_v40 = vpop.f32.mrb[64].mxu0 }
 0x38d   :  { %v3511_v25 = vadd.f32 %v2661_v40, %v1891_v27  ;;  %v2663_v44 = vpop.f32.mrb[65].mxu0  ;;  %v1903_v27 = vadd.f32 %v5070_v61, %v5310_v45 }
 0x38e   :  { %v3513_v20 = vadd.f32 %v2663_v44, %v1893_v17 }
 0x38f   :  { %v2852_v17 = vmax.f32 %v3511_v25, 0.0 }
 0x390   :  { %v2667_v60 = vpop.f32.mrb[66].mxu0  ;;  %v2853_v40 = vmax.f32 %v3513_v20, 0.0 }
 0x391   :  { %v3515_v2 = vadd.f32 %v2667_v60, %v1897_v38  ;;  %v2669_v58 = vpop.f32.mrb[67].mxu0 }
 0x392   :  { %v3517_v43 = vadd.f32 %v2669_v58, %v1899_v1  ;;  %v5678_v58 = vld [vmem:[#allocation33_spill] sm:$0xff] }
 0x393   :  { %v2854_v46 = vmax.f32 %v3515_v2, 0.0  ;;  %v1911_v61 = vadd.f32 %v5678_v58, %v5313_v49  ;;  %v2917_v2 = vld [vmem:[#allocation2] sm:$0x1] }
 0x394   :  { %v2855_v44 = vmax.f32 %v3517_v43, 0.0  ;;  %v2673_v38 = vpop.f32.mrb[68].mxu0  ;;  %v3925_v43 = vmov 0  }
 0x395   :  { %v3448_v60 = vpack.c.bf16 %v2854_v46, %v2852_v17  ;;  %v3519_v31 = vadd.f32 %v2673_v38, %v1903_v27  ;;  %v2675_v55 = vpop.f32.mrb[69].mxu0  ;;  %3779 = vset.pattern.permute.xlu0 %v3925_v43  ;;  %v1915_v27 = vadd.f32 %v5679_v48, %v5310_v45  ;;  %v1917_v46 = vadd.f32 %v5680_v59, %v5313_v49 }
 0x396   :  { %v3446_v26 = vpack.c.bf16 %v2855_v44, %v2853_v40  ;;  %v3521_v1 = vadd.f32 %v2675_v55, %v1905_v4  ;;  %2920 = vperm.xlu0 %3779, %v2917_v2   ;;  %v1923_v2 = vadd.f32 %v5098_v12, %v5313_v49 }
 0x397   :  { %v2856_v55 = vmax.f32 %v3519_v31, 0.0 }
 0x398   :  { %v2679_v25 = vpop.f32.mrb[70].mxu0  ;;  %3447 = vmatprep.subr.bf16.mxu1 %v3446_v26  ;;  %v2857_v4 = vmax.f32 %v3521_v1, 0.0  ;;  %v5682_v1 = vld [vmem:[#allocation37_spill] sm:$0xff] }
 0x399   :  { %v3523_v6 = vadd.f32 %v2679_v25, %v1909_v28  ;;  %v2681_v41 = vpop.f32.mrb[71].mxu0  ;;  %3449 = vmatpush1.bf16.xpose.msra.mxu1 %v3448_v60  ;;  %v5681_v25 = vld [vmem:[#allocation32_spill] sm:$0xff] }
 0x39a   :  { %v3525_v20 = vadd.f32 %v2681_v41, %v1911_v61  ;;  %v1921_v61 = vadd.f32 %v5681_v25, %v5310_v45  ;;  %v1935_v25 = vadd.f32 %v5114_v23, %v5313_v49 }
 0x39b   :  { %v2858_v17 = vmax.f32 %v3523_v6, 0.0 }
 0x39c   :  { %v2859_v40 = vmax.f32 %v3525_v20, 0.0  ;;  %v2685_v44 = vpop.f32.mrb[72].mxu0  ;;  %v1927_v20 = vadd.f32 %v5682_v1, %v5310_v45 }
 0x39d   :  { %v3452_v26 = vpack.c.bf16 %v2858_v17, %v2856_v55  ;;  %v3527_v38 = vadd.f32 %v2685_v44, %v1915_v27  ;;  %v2687_v28 = vpop.f32.mrb[73].mxu0  ;;  %v1929_v55 = vadd.f32 %v5106_v9, %v5313_v49 }
 0x39e   :  { %v3450_v58 = vpack.c.bf16 %v2859_v40, %v2857_v4  ;;  %v3529_v60 = vadd.f32 %v2687_v28, %v1917_v46 }
 0x39f   :  { %v2860_v48 = vmax.f32 %v3527_v38, 0.0 }
 0x3a0   :  { %v2691_v41 = vpop.f32.mrb[74].mxu0  ;;  %3451 = vmatprep.subr.bf16.mxu1 %v3450_v58  ;;  %v2861_v17 = vmax.f32 %v3529_v60, 0.0  ;;  %v5683_v58 = vld [vmem:[#allocation34_spill] sm:$0xff]  ;;  %v1939_v60 = vadd.f32 %v5118_v33, %v5310_v45 }
 0x3a1   :  { %v3531_v31 = vadd.f32 %v2691_v41, %v1921_v61  ;;  %v2693_v6 = vpop.f32.mrb[75].mxu0  ;;  %3453 = vmatpush1.bf16.xpose.msra.mxu1 %v3452_v26  ;;  %v1933_v26 = vadd.f32 %v5683_v58, %v5310_v45 }
 0x3a2   :  { %v3533_v43 = vadd.f32 %v2693_v6, %v1923_v2  ;;  %v1941_v6 = vadd.f32 %v5122_v50, %v5313_v49 }
 0x3a3   :  { %v2862_v27 = vmax.f32 %v3531_v31, 0.0 }
 0x3a4   :  { %v2863_v59 = vmax.f32 %v3533_v43, 0.0  ;;  %v2697_v46 = vpop.f32.mrb[76].mxu0 }
 0x3a5   :  { %v3456_v4 = vpack.c.bf16 %v2862_v27, %v2860_v48  ;;  %v3535_v40 = vadd.f32 %v2697_v46, %v1927_v20  ;;  %v2699_v12 = vpop.f32.mrb[77].mxu0 }
 0x3a6   :  { %v3454_v44 = vpack.c.bf16 %v2863_v59, %v2861_v17  ;;  %v3537_v28 = vadd.f32 %v2699_v12, %v1929_v55  ;;  %v5684_v59 = vld [vmem:[#allocation39_spill] sm:$0xff] }
 0x3a7   :  { %v2864_v41 = vmax.f32 %v3535_v40, 0.0  ;;  %v1945_v46 = vadd.f32 %v5684_v59, %v5310_v45 }
 0x3a8   :  { %v2703_v61 = vpop.f32.mrb[78].mxu0  ;;  %3455 = vmatprep.subr.bf16.mxu1 %v3454_v44  ;;  %v2865_v43 = vmax.f32 %v3537_v28, 0.0  ;;  %v5686_v28 = vld [vmem:[#allocation41_spill] sm:$0xff] }
 0x3a9   :  { %v3539_v38 = vadd.f32 %v2703_v61, %v1933_v26  ;;  %v2705_v2 = vpop.f32.mrb[79].mxu0  ;;  %3457 = vmatpush1.bf16.xpose.msra.mxu1 %v3456_v4  ;;  %v5685_v4 = vld [vmem:[#allocation36_spill] sm:$0xff]  ;;  %v1951_v58 = vadd.f32 %v5686_v28, %v5310_v45  ;;  %v5687_v61 = vld [vmem:[#allocation38_spill] sm:$0xff] }
 0x3aa   :  { %v3541_v9 = vadd.f32 %v2705_v2, %v1935_v25  ;;  %v1947_v12 = vadd.f32 %v5685_v4, %v5313_v49 }
 0x3ab   :  { %v2866_v31 = vmax.f32 %v3539_v38, 0.0  ;;  %v1953_v38 = vadd.f32 %v5687_v61, %v5313_v49 }
 0x3ac   :  { %v2867_v1 = vmax.f32 %v3541_v9, 0.0  ;;  %v2709_v20 = vpop.f32.mrb[80].mxu0 }
 0x3ad   :  { %v3460_v48 = vpack.c.bf16 %v2866_v31, %v2864_v41  ;;  %v3543_v27 = vadd.f32 %v2709_v20, %v1939_v60  ;;  %v2711_v23 = vpop.f32.mrb[81].mxu0  ;;  %v5688_v20 = vld [vmem:[#allocation43_spill] sm:$0xff] }
 0x3ae   :  { %v3458_v55 = vpack.c.bf16 %v2867_v1, %v2865_v43  ;;  %v3545_v17 = vadd.f32 %v2711_v23, %v1941_v6  ;;  %v5689_v23 = vld [vmem:[#allocation40_spill] sm:$0xff] }
 0x3af   :  { %v2868_v26 = vmax.f32 %v3543_v27, 0.0 }
 0x3b0   :  { %v2715_v33 = vpop.f32.mrb[82].mxu0  ;;  %3459 = vmatprep.subr.bf16.mxu1 %v3458_v55  ;;  %v2869_v2 = vmax.f32 %v3545_v17, 0.0  ;;  %v1959_v55 = vadd.f32 %v5689_v23, %v5313_v49  ;;  %v5690_v17 = vld [vmem:[#allocation45_spill] sm:$0xff]  ;;  %v1977_v23 = vadd.f32 %v5170_v47, %v5313_v49 }
 0x3b1   :  { %v3547_v40 = vadd.f32 %v2715_v33, %v1945_v46  ;;  %v2717_v44 = vpop.f32.mrb[83].mxu0  ;;  %3461 = vmatpush1.bf16.xpose.msra.mxu1 %v3460_v48  ;;  %v1957_v48 = vadd.f32 %v5688_v20, %v5310_v45 }
 0x3b2   :  { %v3549_v50 = vadd.f32 %v2717_v44, %v1947_v12  ;;  %v1963_v12 = vadd.f32 %v5690_v17, %v5310_v45  ;;  %v1965_v44 = vadd.f32 %v5154_v24, %v5313_v49 }
 0x3b3   :  { %v2870_v25 = vmax.f32 %v3547_v40, 0.0 }
 0x3b4   :  { %v2871_v9 = vmax.f32 %v3549_v50, 0.0  ;;  %v2721_v60 = vpop.f32.mrb[84].mxu0 }
 0x3b5   :  { %v3464_v41 = vpack.c.bf16 %v2870_v25, %v2868_v26  ;;  %v3551_v31 = vadd.f32 %v2721_v60, %v1951_v58  ;;  %v2723_v6 = vpop.f32.mrb[85].mxu0 }
 0x3b6   :  { %v3462_v43 = vpack.c.bf16 %v2871_v9, %v2869_v2  ;;  %v3553_v1 = vadd.f32 %v2723_v6, %v1953_v38  ;;  %v5691_v9 = vld [vmem:[#allocation42_spill] sm:$0xff] }
 0x3b7   :  { %v2872_v33 = vmax.f32 %v3551_v31, 0.0  ;;  %v1969_v60 = vadd.f32 %v5691_v9, %v5310_v45 }
 0x3b8   :  { %v2727_v59 = vpop.f32.mrb[86].mxu0  ;;  %3463 = vmatprep.subr.bf16.mxu1 %v3462_v43  ;;  %v2873_v50 = vmax.f32 %v3553_v1, 0.0  ;;  %v1975_v1 = vadd.f32 %v5166_v3, %v5310_v45 }
 0x3b9   :  { %v3555_v27 = vadd.f32 %v2727_v59, %v1957_v48  ;;  %v2729_v46 = vpop.f32.mrb[87].mxu0  ;;  %3465 = vmatpush1.bf16.xpose.msra.mxu1 %v3464_v41  ;;  %v1971_v41 = vadd.f32 %v5162_v63, %v5313_v49 }
 0x3ba   :  { %v3557_v4 = vadd.f32 %v2729_v46, %v1959_v55 }
 0x3bb   :  { %v2874_v40 = vmax.f32 %v3555_v27, 0.0 }
 0x3bc   :  { %v2875_v28 = vmax.f32 %v3557_v4, 0.0  ;;  %v2733_v58 = vpop.f32.mrb[88].mxu0 }
 0x3bd   :  { %v3468_v26 = vpack.c.bf16 %v2874_v40, %v2872_v33  ;;  %v3559_v25 = vadd.f32 %v2733_v58, %v1963_v12  ;;  %v2735_v61 = vpop.f32.mrb[89].mxu0  ;;  %v1981_v33 = vadd.f32 %v5174_v21, %v5310_v45  ;;  %v1983_v40 = vadd.f32 %v5178_v15, %v5313_v49 }
 0x3be   :  { %v3466_v38 = vpack.c.bf16 %v2875_v28, %v2873_v50  ;;  %v3561_v2 = vadd.f32 %v2735_v61, %v1965_v44  ;;  %v1987_v28 = vadd.f32 %v5182_v29, %v5310_v45 }
 0x3bf   :  { %v2876_v20 = vmax.f32 %v3559_v25, 0.0  ;;  %v1989_v25 = vadd.f32 %v5186_v14, %v5313_v49 }
 0x3c0   :  { %v2739_v6 = vpop.f32.mrb[90].mxu0  ;;  %3467 = vmatprep.subr.bf16.mxu1 %v3466_v38  ;;  %v2877_v55 = vmax.f32 %v3561_v2, 0.0 }
 0x3c1   :  { %v3563_v31 = vadd.f32 %v2739_v6, %v1969_v60  ;;  %v2741_v43 = vpop.f32.mrb[91].mxu0  ;;  %3469 = vmatpush1.bf16.xpose.msra.mxu1 %v3468_v26  ;;  %v1993_v6 = vadd.f32 %v5190_v18, %v5310_v45 }
 0x3c2   :  { %v3565_v24 = vadd.f32 %v2741_v43, %v1971_v41 }
 0x3c3   :  { %v2878_v48 = vmax.f32 %v3563_v31, 0.0  ;;  %v1995_v31 = vadd.f32 %v5194_v53, %v5313_v49 }
 0x3c4   :  { %v2879_v59 = vmax.f32 %v3565_v24, 0.0  ;;  %v2745_v27 = vpop.f32.mrb[92].mxu0 }
 0x3c5   :  { %v3472_v46 = vpack.c.bf16 %v2878_v48, %v2876_v20  ;;  %v3567_v4 = vadd.f32 %v2745_v27, %v1975_v1  ;;  %v2747_v63 = vpop.f32.mrb[93].mxu0  ;;  %v1999_v1 = vadd.f32 %v5198_v35, %v5310_v45 }
 0x3c6   :  { %v3470_v17 = vpack.c.bf16 %v2879_v59, %v2877_v55  ;;  %v3569_v12 = vadd.f32 %v2747_v63, %v1977_v23  ;;  %v2001_v23 = vadd.f32 %v5202_v0, %v5313_v49 }
 0x3c7   :  { %v2880_v58 = vmax.f32 %v3567_v4, 0.0 }
 0x3c8   :  { %v2751_v3 = vpop.f32.mrb[94].mxu0  ;;  %3471 = vmatprep.subr.bf16.mxu1 %v3470_v17  ;;  %v2881_v61 = vmax.f32 %v3569_v12, 0.0  ;;  %v2005_v17 = vadd.f32 %v5206_v16, %v5310_v45  ;;  %v2007_v12 = vadd.f32 %v5210_v39, %v5313_v49 }
 0x3c9   :  { %v3571_v44 = vadd.f32 %v2751_v3, %v1981_v33  ;;  %v2753_v50 = vpop.f32.mrb[95].mxu0  ;;  %3473 = vmatpush1.bf16.xpose.msra.mxu1 %v3472_v46  ;;  %v2011_v3 = vadd.f32 %v5214_v36, %v5310_v45 }
 0x3ca   :  { %v3573_v47 = vadd.f32 %v2753_v50, %v1983_v40 }
 0x3cb   :  { %v2882_v26 = vmax.f32 %v3571_v44, 0.0 }
 0x3cc   :  { %v2883_v38 = vmax.f32 %v3573_v47, 0.0  ;;  %v2757_v21 = vpop.f32.mrb[96].mxu0  ;;  %v2013_v47 = vadd.f32 %v5218_v32, %v5313_v49 }
 0x3cd   :  { %v3476_v2 = vpack.c.bf16 %v2882_v26, %v2880_v58  ;;  %v3575_v9 = vadd.f32 %v2757_v21, %v1987_v28  ;;  %v2759_v15 = vpop.f32.mrb[97].mxu0  ;;  %v2017_v21 = vadd.f32 %v5222_v5, %v5310_v45 }
 0x3ce   :  { %v3474_v60 = vpack.c.bf16 %v2883_v38, %v2881_v61  ;;  %v3577_v41 = vadd.f32 %v2759_v15, %v1989_v25 }
 0x3cf   :  { %v2884_v20 = vmax.f32 %v3575_v9, 0.0 }
 0x3d0   :  { %v2763_v29 = vpop.f32.mrb[98].mxu0  ;;  %3475 = vmatprep.subr.bf16.mxu1 %v3474_v60  ;;  %v2885_v55 = vmax.f32 %v3577_v41, 0.0  ;;  %v2023_v60 = vadd.f32 %v5230_v19, %v5310_v45 }
 0x3d1   :  { %v3579_v43 = vadd.f32 %v2763_v29, %v1993_v6  ;;  %v2765_v24 = vpop.f32.mrb[99].mxu0  ;;  %3477 = vmatpush1.bf16.xpose.msra.mxu1 %v3476_v2  ;;  %v2019_v2 = vadd.f32 %v5226_v62, %v5313_v49 }
 0x3d2   :  { %v3581_v14 = vadd.f32 %v2765_v24, %v1995_v31  ;;  %v2025_v31 = vadd.f32 %v5234_v30, %v5313_v49 }
 0x3d3   :  { %v2886_v48 = vmax.f32 %v3579_v43, 0.0 }
 0x3d4   :  { %v2887_v59 = vmax.f32 %v3581_v14, 0.0  ;;  %v2769_v18 = vpop.f32.mrb[100].mxu0 }
 0x3d5   :  { %v3480_v27 = vpack.c.bf16 %v2886_v48, %v2884_v20  ;;  %v3583_v46 = vadd.f32 %v2769_v18, %v1999_v1  ;;  %v2771_v53 = vpop.f32.mrb[101].mxu0  ;;  %v2029_v48 = vadd.f32 %v5238_v13, %v5310_v45  ;;  %v2035_v18 = vadd.f32 %v5246_v57, %v5310_v45 }
 0x3d6   :  { %v3478_v4 = vpack.c.bf16 %v2887_v59, %v2885_v55  ;;  %v3585_v63 = vadd.f32 %v2771_v53, %v2001_v23  ;;  %v2031_v23 = vadd.f32 %v5242_v11, %v5313_v49  ;;  %v2037_v53 = vadd.f32 %v5250_v34, %v5313_v49 }
 0x3d7   :  { %v2888_v44 = vmax.f32 %v3583_v46, 0.0 }
 0x3d8   :  { %v2775_v35 = vpop.f32.mrb[102].mxu0  ;;  %3479 = vmatprep.subr.bf16.mxu1 %v3478_v4  ;;  %v2889_v28 = vmax.f32 %v3585_v63, 0.0 }
 0x3d9   :  { %v3587_v33 = vadd.f32 %v2775_v35, %v2005_v17  ;;  %v2777_v40 = vpop.f32.mrb[103].mxu0  ;;  %3481 = vmatpush1.bf16.xpose.msra.mxu1 %v3480_v27 }
 0x3da   :  { %v3589_v0 = vadd.f32 %v2777_v40, %v2007_v12  ;;  %v2041_v40 = vadd.f32 %v5254_v52, %v5310_v45 }
 0x3db   :  { %v2890_v50 = vmax.f32 %v3587_v33, 0.0 }
 0x3dc   :  { %v2891_v58 = vmax.f32 %v3589_v0, 0.0  ;;  %v2781_v16 = vpop.f32.mrb[104].mxu0  ;;  %v2043_v0 = vadd.f32 %v5258_v8, %v5313_v49 }
 0x3dd   :  { %v3484_v26 = vpack.c.bf16 %v2890_v50, %v2888_v44  ;;  %v3591_v25 = vadd.f32 %v2781_v16, %v2011_v3  ;;  %v2783_v39 = vpop.f32.mrb[105].mxu0  ;;  %v2047_v50 = vadd.f32 %v5262_v51, %v5310_v45 }
 0x3de   :  { %v3482_v61 = vpack.c.bf16 %v2891_v58, %v2889_v28  ;;  %v3593_v38 = vadd.f32 %v2783_v39, %v2013_v47  ;;  %v2049_v58 = vadd.f32 %v5266_v56, %v5313_v49 }
 0x3df   :  { %v2892_v41 = vmax.f32 %v3591_v25, 0.0 }
 0x3e0   :  { %v2787_v36 = vpop.f32.mrb[106].mxu0  ;;  %3483 = vmatprep.subr.bf16.mxu1 %v3482_v61  ;;  %v2893_v29 = vmax.f32 %v3593_v38, 0.0 }
 0x3e1   :  { %v3595_v9 = vadd.f32 %v2787_v36, %v2017_v21  ;;  %v2789_v15 = vpop.f32.mrb[107].mxu0  ;;  %3485 = vmatpush1.bf16.xpose.msra.mxu1 %v3484_v26  ;;  %v2053_v21 = vadd.f32 %v5270_v7, %v5310_v45 }
 0x3e2   :  { %v3597_v32 = vadd.f32 %v2789_v15, %v2019_v2  ;;  %v2055_v2 = vadd.f32 %v5274_v22, %v5313_v49  ;;  %v2059_v15 = vadd.f32 %v5278_v37, %v5310_v45 }
 0x3e3   :  { %v2894_v6 = vmax.f32 %v3595_v9, 0.0 }
 0x3e4   :  { %v2895_v43 = vmax.f32 %v3597_v32, 0.0  ;;  %v2793_v5 = vpop.f32.mrb[108].mxu0 }
 0x3e5   :  { %v3488_v24 = vpack.c.bf16 %v2894_v6, %v2892_v41  ;;  %v3599_v14 = vadd.f32 %v2793_v5, %v2023_v60  ;;  %v2795_v62 = vpop.f32.mrb[109].mxu0  ;;  %v2061_v41 = vadd.f32 %v5282_v54, %v5313_v49 }
 0x3e6   :  { %v3486_v1 = vpack.c.bf16 %v2895_v43, %v2893_v29  ;;  %v3601_v20 = vadd.f32 %v2795_v62, %v2025_v31  ;;  %v2067_v62 = vadd.f32 %v5290_v42, %v5313_v49 }
 0x3e7   :  { %v2896_v27 = vmax.f32 %v3599_v14, 0.0  ;;  %v2065_v14 = vadd.f32 %v5286_v10, %v5310_v45 }
 0x3e8   :  { %v2799_v19 = vpop.f32.mrb[110].mxu0  ;;  %3487 = vmatprep.subr.bf16.mxu1 %v3486_v1  ;;  %v2897_v4 = vmax.f32 %v3601_v20, 0.0 }
 0x3e9   :  { %v3603_v55 = vadd.f32 %v2799_v19, %v2029_v48  ;;  %v2801_v59 = vpop.f32.mrb[111].mxu0  ;;  %3489 = vmatpush1.bf16.xpose.msra.mxu1 %v3488_v24  ;;  %v5692_v48 = vld [vmem:[#allocation47_spill] sm:$0xff] }
 0x3ea   :  { %v3605_v30 = vadd.f32 %v2801_v59, %v2031_v23  ;;  %v2071_v23 = vadd.f32 %v5692_v48, %v5310_v45  ;;  %v5693_v59 = vld [vmem:[#allocation44_spill] sm:$0xff] }
 0x3eb   :  { %v2898_v46 = vmax.f32 %v3603_v55, 0.0 }
 0x3ec   :  { %v2899_v63 = vmax.f32 %v3605_v30, 0.0  ;;  %v2805_v13 = vpop.f32.mrb[112].mxu0  ;;  %v2073_v30 = vadd.f32 %v5693_v59, %v5313_v49 }
 0x3ed   :  { %v3492_v17 = vpack.c.bf16 %v2898_v46, %v2896_v27  ;;  %v3607_v12 = vadd.f32 %v2805_v13, %v2035_v18  ;;  %v2807_v11 = vpop.f32.mrb[113].mxu0  ;;  %v5694_v13 = vld [vmem:[#allocation49_spill] sm:$0xff] }
 0x3ee   :  { %v3490_v35 = vpack.c.bf16 %v2899_v63, %v2897_v4  ;;  %v3609_v33 = vadd.f32 %v2807_v11, %v2037_v53 }
 0x3ef   :  { %v2900_v47 = vmax.f32 %v3607_v12, 0.0  ;;  %v5695_v12 = vld [vmem:[#allocation46_spill] sm:$0xff] }
 0x3f0   :  { %v2811_v57 = vpop.f32.mrb[114].mxu0  ;;  %3491 = vmatprep.subr.bf16.mxu1 %v3490_v35  ;;  %v2901_v16 = vmax.f32 %v3609_v33, 0.0  ;;  %v2079_v11 = vadd.f32 %v5695_v12, %v5313_v49 }
 0x3f1   :  { %v3611_v3 = vadd.f32 %v2811_v57, %v2041_v40  ;;  %v2813_v44 = vpop.f32.mrb[115].mxu0  ;;  %3493 = vmatpush1.bf16.xpose.msra.mxu1 %v3492_v17  ;;  %v2077_v17 = vadd.f32 %v5694_v13, %v5310_v45 }
 0x3f2   :  { %v3613_v34 = vadd.f32 %v2813_v44, %v2043_v0 }
 0x3f3   :  { %v2902_v28 = vmax.f32 %v3611_v3, 0.0 }
 0x3f4   :  { %v2903_v26 = vmax.f32 %v3613_v34, 0.0  ;;  %v2817_v52 = vpop.f32.mrb[116].mxu0 }
 0x3f5   :  { %v3496_v25 = vpack.c.bf16 %v2902_v28, %v2900_v47  ;;  %v3615_v39 = vadd.f32 %v2817_v52, %v2047_v50  ;;  %v2819_v8 = vpop.f32.mrb[117].mxu0  ;;  %v5696_v28 = vld [vmem:[#allocation76_spill] sm:$0xff] }
 0x3f6   :  { %v3494_v61 = vpack.c.bf16 %v2903_v26, %v2901_v16  ;;  %v3617_v38 = vadd.f32 %v2819_v8, %v2049_v58  ;;  %v5697_v58 = vld [vmem:[#allocation52_spill] sm:$0xff] }
 0x3f7   :  { %v2904_v32 = vmax.f32 %v3615_v39, 0.0  ;;  %v2931_v45 = vrot.slane %v5697_v58, %v5696_v28 }
 0x3f8   :  { %v2823_v51 = vpop.f32.mrb[118].mxu0  ;;  %3495 = vmatprep.subr.bf16.mxu1 %v3494_v61  ;;  %v2905_v6 = vmax.f32 %v3617_v38, 0.0 }
 0x3f9   :  { %v3619_v36 = vadd.f32 %v2823_v51, %v2053_v21  ;;  %v2825_v9 = vpop.f32.mrb[119].mxu0  ;;  %3497 = vmatpush1.bf16.xpose.msra.mxu1 %v3496_v25 }
 0x3fa   :  { %v3621_v56 = vadd.f32 %v2825_v9, %v2055_v2 }
 0x3fb   :  { %v2906_v60 = vmax.f32 %v3619_v36, 0.0  ;;  %v3926_v36 = vmov 1966171168  }
 0x3fc   :  { %v2907_v31 = vmax.f32 %v3621_v56, 0.0  ;;  %v2829_v7 = vpop.f32.mrb[120].mxu0  ;;  %v3025_v9 = vunpack.c.l.s4 %v3926_v36 }
 0x3fd   :  { %v3500_v29 = vpack.c.bf16 %v2906_v60, %v2904_v32  ;;  %v3623_v43 = vadd.f32 %v2829_v7, %v2059_v15  ;;  %v2831_v22 = vpop.f32.mrb[121].mxu0  ;;  %v5698_v32 = vld [vmem:[#allocation51_spill] sm:$0xff]  ;;  %v5699_v7 = vlaneseq }
 0x3fe   :  { %v3498_v5 = vpack.c.bf16 %v2907_v31, %v2905_v6  ;;  %v3625_v24 = vadd.f32 %v2831_v22, %v2061_v41  ;;  %v3026_v56 = vunpack.c.0.s8 %v3025_v9 }
 0x3ff   :  { %v2908_v19 = vmax.f32 %v3623_v43, 0.0  ;;  %vm3041_vm0 = vcmp.lt.s32.totalorder %v5699_v7, 256 }
 0x400   :  { %v2835_v37 = vpop.f32.mrb[122].mxu0  ;;  %3499 = vmatprep.subr.bf16.mxu1 %v3498_v5  ;;  %v2909_v18 = vmax.f32 %v3625_v24, 0.0  ;;  %v3029_v60 = vsub.s32 %v3026_v56, %v5698_v32 }
 0x401   :  { %v3627_v1 = vadd.f32 %v2835_v37, %v2065_v14  ;;  %v2837_v20 = vpop.f32.mrb[123].mxu0  ;;  %3501 = vmatpush1.bf16.xpose.msra.mxu1 %v3500_v29 }
 0x402   :  { %v3629_v54 = vadd.f32 %v2837_v20, %v2067_v62 }
 0x403   :  { %v2910_v55 = vmax.f32 %v3627_v1, 0.0 }
 0x404   :  { %v2911_v27 = vmax.f32 %v3629_v54, 0.0  ;;  %v2841_v10 = vpop.f32.mrb[124].mxu0 }
 0x405   :  { %v3504_v46 = vpack.c.bf16 %v2910_v55, %v2908_v19  ;;  %v3631_v53 = vadd.f32 %v2841_v10, %v2071_v23  ;;  %v2843_v42 = vpop.f32.mrb[125].mxu0 }
 0x406   :  { %v3502_v4 = vpack.c.bf16 %v2911_v27, %v2909_v18  ;;  %v3633_v63 = vadd.f32 %v2843_v42, %v2073_v30 }
 0x407   :  { %v2912_v57 = vmax.f32 %v3631_v53, 0.0 }
 0x408   :  { %v2847_v35 = vpop.f32.mrb[126].mxu0  ;;  %3503 = vmatprep.subr.bf16.mxu1 %v3502_v4  ;;  %v2913_v44 = vmax.f32 %v3633_v63, 0.0 }
 0x409   :  { %v3635_v33 = vadd.f32 %v2847_v35, %v2077_v17  ;;  %v2849_v40 = vpop.f32.mrb[127].mxu0  ;;  %3505 = vmatpush1.bf16.xpose.msra.mxu1 %v3504_v46 }
 0x40a   :  { %v3637_v0 = vadd.f32 %v2849_v40, %v2079_v11 }
 0x40b   :  { %v2914_v3 = vmax.f32 %v3635_v33, 0.0 }
 0x40c   :  { %v2915_v34 = vmax.f32 %v3637_v0, 0.0 }
 0x40d   :  { %v3508_v50 = vpack.c.bf16 %v2914_v3, %v2912_v57 }
 0x40e   :  { %v3506_v47 = vpack.c.bf16 %v2915_v34, %v2913_v44 }
 0x410   :  { %3507 = vmatprep.subr.bf16.mxu1 %v3506_v47 }
 0x411   :  { %3509 = vmatpush1.bf16.xpose.msra.mxu1 %v3508_v50 }
 0x415   :  { %v2921_v16 = vpop.permute.xlu0 %2920 }
 0x416   :  { %v2926_v49 = vrot.slane %v2921_v16, %v5696_v28 }
 0x418   :  { %3003 = vmatmul.mubr.f32.vlgmr.msra.gmra.mrb[0].mxu1 %v2931_v45 }
 0x4eb   :  { %v3004_v26 = vpop.f32.mrb[0].mxu1 }
 0x4ec   :  { %v3005_v52 = vadd.f32 %v3004_v26, %v2926_v49  ;;  %v3006_v25 = vpop.f32.mrb[1].mxu1 }
 0x4ed   :  { %v3007_v39 = vadd.f32 %v3006_v25, %v2926_v49 }
 0x4ee   :  { %v3060_v8 = vmul.f32 -1.442695, %v3005_v52 }
 0x4ef   :  { %v3061_v61 = vmul.f32 -1.442695, %v3007_v39 }
 0x4f0   :  { %3780 = vpow2.f32 %v3060_v8 }
 0x4f1   :  { %3782 = vpow2.f32 %v3061_v61 }
 0x4fa   :  { %v3781_v38 = vpop.eup %3780 }
 0x4fb   :  { %v3783_v21 = vpop.eup %3782  ;;  %v3015_v2 = vadd.f32 1.0, %v3781_v38 }
 0x4fc   :  { %v3016_v51 = vadd.f32 1.0, %v3783_v21 }
 0x4fd   :  { %3784 = vrcp.f32 %v3015_v2 }
 0x4fe   :  { %3786 = vrcp.f32 %v3016_v51 }
 0x507   :  { %v3785_v15 = vpop.eup %3784 }
 0x508   :  { %v3787_v41 = vpop.eup %3786 }
 0x509   :  { %v3023_v6 = vcombine.low %v3785_v15, %v3787_v41 }
 0x50b   :  { %v3030_v31 = vrot.slane %v3023_v6, %v3029_v60 }
 0x50d   :  { %v3037_v29 = vrot.slane %v3030_v31, %v3029_v60 }
 0x50f   :  { %3043 = vst.msk [vmem:[#allocation9] sm:$0x3] %vm3041_vm0, %v3037_v29 }
 0x510   :  { %3898 = shalt.err (!%p3895_p0)
}
 0x511   :  { %s3899_s26 = scalar_lea.hbm %s5474_s7, 32 }
 0x512   :  { %p3900_p1 = scmp.ne.s32.totalorder %s5474_s7, %s3899_s26  ;;  %p3903_p2 = scmp.lt.u32.totalorder %s3899_s26, %s5474_s7 }
 0x514   :  { %p3905_p3 = pnand %p3903_p2, %p3900_p1 }
 0x516   :  { %3908 = shalt.err (!%p3905_p3)
}
 0x517   :  { %3053 = dma.vmem_to_hbm [thread:$0]  %s3051_s23, 32, %s5474_s7, [#allocation5]  }
 0x518   :  { %3913 = dma.done.wait [#allocation5], 32  }
 0x519   :  { %3914 = vsyncadd [#allocation5], 4294967264 }
 0x51a   :  { %3057 = vsyncpa [#allocation4], 1 }
 0x51b   :  { %3058 = vsyncpa [#allocation7], 1 }
 0x51c   :  { %3059 = vsyncpa [#allocation5], 1 }

</bundles_post_ra>
